<compile_context>
chip_gen: v6e
topology: v6e:2x2x1
jax: 0.10.0
libtpu: 0.0.40
codegen_flags: <defaults>
</compile_context>

<pallas_src>
import functools

import numpy as np
import jax
import jax.numpy as jnp
from jax import lax
from jax.experimental import pallas as pl
from jax.experimental.pallas import tpu as pltpu

# ---- model / problem sizes ----
N = 8              # batch (N*D = 128 rows -> full MXU sublane utilization)
D = 16             # sequence length (input_dims)
M = 32             # hidden conv channels
K = 3              # conv kernel size
NUM_CLASSES = 256
EPS = 1e-5
NEG_SLOPE = 0.01   # nn.LeakyReLU() default

LOG_EPS = float(np.log(EPS))
LOG_1M_EPS = float(np.log(1.0 - EPS))


def arm_kernel(x_ref, sp_ref, w23_ref, w4_ref, out_ref, *, inv_batch):
    """Single-shot kernel over all rows.

    x_ref   : (rows, 1)    f32   flattened inputs in [0, 1]   (rows = N*D)
    sp_ref  : (8, 256)     f32   packed small operands:
                                 rows 0..K-1 = w1 taps (lanes 0:M),
                                 rows K..K+2 = b1, b2, b3 (lanes 0:M),
                                 row  K+3    = b4 (all 256 lanes)
    w23_ref : (K*M, 2*M)   bf16  [w2_stacked | w3_stacked] along lanes
    w4_ref  : (K*M, 256)   bf16  stacked layer-4 weights
    out_ref : (8, 128)     f32   lane-dense tile filled with the scalar NLL
    """
    rows = x_ref.shape[0]
    x = x_ref[...]                                   # (rows, 1) f32
    sp = sp_ref[...]                                 # (8, 256)  f32

    # --- hoisted per-row position masks (samples are contiguous D-row blocks) ----
    pos = lax.broadcasted_iota(jnp.int32, (rows, 1), 0) % D
    mask = {s: jnp.broadcast_to(pos >= s, (rows, M)) for s in (1, 2, 3)}

    def shift(v, s):
        # v[i] -> v[i - s] within each sample; rows whose source crosses a sample
        # boundary (i % D < s) are zeroed.  XLU sublane rotate + VPU select.
        if s == 0:
            return v
        return jnp.where(mask[s], pltpu.roll(v, s, axis=0), 0.0)

    def lrelu(h):
        return jnp.where(h > 0, h, NEG_SLOPE * h)

    # --- unpack small operands (static slices of one loaded tile) -----------------
    w1 = sp[0:K, 0:M]                                # (K, M)
    b1 = sp[K:K + 1, 0:M]                            # (1, M)
    b2 = sp[K + 1:K + 2, 0:M]
    b3 = sp[K + 2:K + 3, 0:M]
    b4 = sp[K + 3:K + 4, :]                          # (1, 256)

    # ---- layer 1: CausalConv1d(1, M, K, A=True) + LeakyReLU ----------------------
    # offsets {-3,-2,-1}; C_in == 1 -> broadcast FMA on the VPU (no MXU op).
    xb = jnp.broadcast_to(x, (rows, M))              # broadcast x across lanes ONCE
    acc = shift(xb, K) * w1[0:1, :]
    for k in range(1, K):
        acc = acc + shift(xb, K - k) * w1[k:k + 1, :]
    h = lrelu(acc + b1)                              # (rows, M) f32

    # ---- layers 2, 3: CausalConv1d(M, M, K) + LeakyReLU ---------------------------
    # All K taps fused into one (rows, K*M) @ (K*M, M) MXU matmul, bf16 in / f32 acc.
    w23 = w23_ref[...]                               # (K*M, 2*M) bf16
    for li, b in enumerate((b2, b3)):
        hcat = jnp.concatenate(
            [shift(h, (K - 1) - k) for k in range(K)], axis=-1).astype(jnp.bfloat16)
        w = w23[:, li * M:(li + 1) * M]              # (K*M, M) bf16
        h = lrelu(jnp.dot(hcat, w, preferred_element_type=jnp.float32) + b)

    # ---- layer 4: CausalConv1d(M, NUM_CLASSES, K) ---------------------------------
    hcat = jnp.concatenate(
        [shift(h, (K - 1) - k) for k in range(K)], axis=-1).astype(jnp.bfloat16)
    logits = (jnp.dot(hcat, w4_ref[...], preferred_element_type=jnp.float32)
              + b4)                                  # (rows, 256) f32

    # ---- log-softmax + one-hot select + clamp (log-domain, exact parity) ----------
    # Select straight from `logits` (keeps z's live range short), then
    # logp = clip(sel - mx - lse, log EPS, log(1-EPS)).
    cls = (x * float(NUM_CLASSES - 1)).astype(jnp.int32)          # (rows, 1)
    classes = lax.broadcasted_iota(jnp.int32, (rows, NUM_CLASSES), 1)
    sel = jnp.sum(jnp.where(classes == cls, logits, 0.0),
                  axis=-1, keepdims=True)                         # (rows, 1)
    mx = jnp.max(logits, axis=-1, keepdims=True)
    lse = jnp.log(jnp.sum(jnp.exp(logits - mx), axis=-1, keepdims=True))
    logp = jnp.clip(sel - mx - lse, LOG_EPS, LOG_1M_EPS)

    # ---- final reduction folded in-kernel: NLL = -sum(logp) / batch ---------------
    total = jnp.sum(logp, axis=0, keepdims=True)                  # (1, 1)
    loss = total * (-inv_batch)
    out_ref[...] = jnp.broadcast_to(loss, out_ref.shape)          # lane-dense tile


def arm_forward(x, params):
    """x: (n, D) float32 in [0, 1].  Returns the scalar NLL (reduction='avg')."""
    w1, b1, w2, b2, w3, b3, w4, b4 = params
    n, d = x.shape
    assert d == D

    x_flat = x.reshape(n * d, 1).astype(jnp.float32)

    # Taps-first stacked weights: each conv layer is ONE (rows, K*C_in)@(K*C_in, C_out).
    w1_s = jnp.transpose(w1, (2, 1, 0)).reshape(K, M).astype(jnp.float32)
    w2_s = jnp.transpose(w2, (2, 1, 0)).reshape(K * M, M)
    w3_s = jnp.transpose(w3, (2, 1, 0)).reshape(K * M, M)
    w4_s = jnp.transpose(w4, (2, 1, 0)).reshape(K * M, NUM_CLASSES)

    # Pack the matmul weights (bf16) and the tiny operands (f32) to cut operand count.
    w23 = jnp.concatenate([w2_s, w3_s], axis=-1).astype(jnp.bfloat16)   # (K*M, 2*M)
    w4_bf = w4_s.astype(jnp.bfloat16)                                   # (K*M, 256)

    sp = jnp.zeros((8, NUM_CLASSES), jnp.float32)
    sp = sp.at[0:K, 0:M].set(w1_s)
    sp = sp.at[K, 0:M].set(b1.astype(jnp.float32))
    sp = sp.at[K + 1, 0:M].set(b2.astype(jnp.float32))
    sp = sp.at[K + 2, 0:M].set(b3.astype(jnp.float32))
    sp = sp.at[K + 3, :].set(b4.astype(jnp.float32))

    kernel = functools.partial(arm_kernel, inv_batch=1.0 / n)
    out = pl.pallas_call(
        kernel,
        out_shape=jax.ShapeDtypeStruct((8, 128), jnp.float32),
    )(x_flat, sp, w23, w4_bf)
    return out[0, 0]


# --------- pure-numpy reference (mirrors the PyTorch forward exactly) ---------
def ref_arm_forward(x, params):
    x = np.asarray(x, np.float32)
    w1, b1, w2, b2, w3, b3, w4, b4 = [np.asarray(p, np.float32) for p in params]

    def causal_conv1d(h, w, b, A):
        n, c_in, L = h.shape
        c_out, _, ks = w.shape
        pad = (ks - 1) + (1 if A else 0)
        hp = np.pad(h, ((0, 0), (0, 0), (pad, 0)))
        L_out = L + pad - ks + 1
        out = np.zeros((n, c_out, L_out), np.float32)
        for d in range(L_out):
            out[:, :, d] = np.einsum('nck,ock->no', hp[:, :, d:d + ks], w) + b
        return out[:, :, :-1] if A else out

    def lrelu(h):
        return np.where(h > 0, h, NEG_SLOPE * h)

    h = x[:, None, :]                              # (N, 1, D)  -- x.unsqueeze(1)
    h = lrelu(causal_conv1d(h, w1, b1, True))
    h = lrelu(causal_conv1d(h, w2, b2, False))
    h = lrelu(causal_conv1d(h, w3, b3, False))
    h = causal_conv1d(h, w4, b4, False)            # (N, 256, D)
    h = np.transpose(h, (0, 2, 1))                 # (N, D, 256) -- permute(0,2,1)
    e = np.exp(h - h.max(-1, keepdims=True))
    prob = e / e.sum(-1, keepdims=True)
    cls = (x * np.float32(NUM_CLASSES - 1)).astype(np.int32)
    logp = np.log(np.clip(prob, EPS, 1.0 - EPS))
    picked = np.take_along_axis(logp, cls[..., None], axis=-1)[..., 0]   # (N, D)
    log_p = picked.sum(-1)                         # (N,)
    return float((-log_p).mean())


def init_params(key):
    def conv_init(k, c_out, c_in, ks):
        kw, kb = jax.random.split(k)
        scale = 1.0 / np.sqrt(c_in * ks)
        w = jax.random.uniform(kw, (c_out, c_in, ks), jnp.float32, -scale, scale)
        b = jax.random.uniform(kb, (c_out,), jnp.float32, -scale, scale)
        return w, b

    k1, k2, k3, k4 = jax.random.split(key, 4)
    w1, b1 = conv_init(k1, M, 1, K)
    w2, b2 = conv_init(k2, M, M, K)
    w3, b3 = conv_init(k3, M, M, K)
    w4, b4 = conv_init(k4, NUM_CLASSES, M, K)
    return (w1, b1, w2, b2, w3, b3, w4, b4)


if __name__ == "__main__":
    key = jax.random.PRNGKey(0)
    k_params, k_data = jax.random.split(key)
    params = init_params(k_params)

    # inputs are quantized intensities in [0, 1], like the tutorial data
    x_int = jax.random.randint(k_data, (N, D), 0, NUM_CLASSES)
    x = x_int.astype(jnp.float32) / (NUM_CLASSES - 1)

    nll = arm_forward(x, params)
    nll = jax.block_until_ready(nll)

    ref = ref_arm_forward(np.asarray(x), params)
    # Slightly relaxed tolerance: matmul operands are bf16 (f32 accumulation); the
    # bf16-induced error in the summed log-probs is ~1e-2 absolute vs a ~90 reference.
    np.testing.assert_allclose(float(nll), ref, rtol=2e-3, atol=2e-3)
    print("KERNEL_OK")
</pallas_src>

<mosaic_0001>
module attributes {stable_mosaic.version = 11 : i64} {
  func.func @arm_kernel(%arg0: memref<128x1xf32, #tpu.memory_space<vmem>>, %arg1: memref<8x256xf32, #tpu.memory_space<vmem>>, %arg2: memref<96x64xbf16, #tpu.memory_space<vmem>>, %arg3: memref<96x256xbf16, #tpu.memory_space<vmem>>, %arg4: memref<8x128xf32, #tpu.memory_space<vmem>>) attributes {dimension_semantics = [], scalar_prefetch = 0 : i64, scratch_operands = 0 : i64, tpu.core_type = #tpu.core_type<tc>} {
    %c0 = arith.constant 0 : index
    %c0_0 = arith.constant 0 : index
    %0 = vector.load %arg0[%c0, %c0_0] : memref<128x1xf32, #tpu.memory_space<vmem>>, vector<128x1xf32>
    %c0_1 = arith.constant 0 : index
    %c0_2 = arith.constant 0 : index
    %1 = vector.load %arg1[%c0_1, %c0_2] : memref<8x256xf32, #tpu.memory_space<vmem>>, vector<8x256xf32>
    %2 = tpu.iota {dimensions = array<i32: 0>} : vector<128x1xi32>
    %c16_i32 = arith.constant 16 : i32
    %c0_i32 = arith.constant 0 : i32
    %3 = arith.cmpi eq, %c16_i32, %c0_i32 : i32
    %c1_i32 = arith.constant 1 : i32
    %4 = arith.select %3, %c1_i32, %c16_i32 : i32
    %5 = vector.broadcast %4 : i32 to vector<128x1xi32>
    %6 = arith.remsi %2, %5 : vector<128x1xi32>
    %c0_i32_3 = arith.constant 0 : i32
    %7 = vector.broadcast %c0_i32_3 : i32 to vector<128x1xi32>
    %8 = arith.cmpi ne, %6, %7 : vector<128x1xi32>
    %c0_i32_4 = arith.constant 0 : i32
    %9 = vector.broadcast %c0_i32_4 : i32 to vector<128x1xi32>
    %10 = arith.cmpi slt, %6, %9 : vector<128x1xi32>
    %c0_i32_5 = arith.constant 0 : i32
    %11 = arith.cmpi slt, %4, %c0_i32_5 : i32
    %12 = vector.broadcast %11 : i1 to vector<128x1xi1>
    %13 = vector.broadcast %12 : vector<128x1xi1> to vector<128x1xi1>
    %14 = arith.xori %10, %13 : vector<128x1xi1>
    %15 = arith.andi %14, %8 : vector<128x1xi1>
    %16 = vector.broadcast %4 : i32 to vector<128x1xi32>
    %17 = arith.addi %6, %16 : vector<128x1xi32>
    %18 = arith.select %15, %17, %6 : vector<128x1xi1>, vector<128x1xi32>
    %c1_i32_6 = arith.constant 1 : i32
    %19 = vector.broadcast %c1_i32_6 : i32 to vector<128x1xi32>
    %20 = arith.cmpi sge, %18, %19 : vector<128x1xi32>
    %21 = vector.shape_cast %20 : vector<128x1xi1> to vector<128x1xi1>
    %22 = vector.broadcast %21 : vector<128x1xi1> to vector<128x32xi1>
    %c2_i32 = arith.constant 2 : i32
    %23 = vector.broadcast %c2_i32 : i32 to vector<128x1xi32>
    %24 = arith.cmpi sge, %18, %23 : vector<128x1xi32>
    %25 = vector.shape_cast %24 : vector<128x1xi1> to vector<128x1xi1>
    %26 = vector.broadcast %25 : vector<128x1xi1> to vector<128x32xi1>
    %c3_i32 = arith.constant 3 : i32
    %27 = vector.broadcast %c3_i32 : i32 to vector<128x1xi32>
    %28 = arith.cmpi sge, %18, %27 : vector<128x1xi32>
    %29 = vector.shape_cast %28 : vector<128x1xi1> to vector<128x1xi1>
    %30 = vector.broadcast %29 : vector<128x1xi1> to vector<128x32xi1>
    %31 = vector.extract_strided_slice %1 {offsets = [0, 0], sizes = [3, 32], strides = [1, 1]} : vector<8x256xf32> to vector<3x32xf32>
    %32 = vector.extract_strided_slice %1 {offsets = [3, 0], sizes = [1, 32], strides = [1, 1]} : vector<8x256xf32> to vector<1x32xf32>
    %33 = vector.extract_strided_slice %1 {offsets = [4, 0], sizes = [1, 32], strides = [1, 1]} : vector<8x256xf32> to vector<1x32xf32>
    %34 = vector.extract_strided_slice %1 {offsets = [5, 0], sizes = [1, 32], strides = [1, 1]} : vector<8x256xf32> to vector<1x32xf32>
    %35 = vector.extract_strided_slice %1 {offsets = [6, 0], sizes = [1, 256], strides = [1, 1]} : vector<8x256xf32> to vector<1x256xf32>
    %36 = vector.shape_cast %0 : vector<128x1xf32> to vector<128x1xf32>
    %37 = vector.broadcast %36 : vector<128x1xf32> to vector<128x32xf32>
    %c3_i32_7 = arith.constant 3 : i32
    %38 = tpu.dynamic_rotate %37 by %c3_i32_7 dim 0 : vector<128x32xf32>, i32 -> vector<128x32xf32>
    %cst = arith.constant 0.000000e+00 : f32
    %39 = vector.broadcast %cst : f32 to vector<128x32xf32>
    %40 = arith.select %30, %38, %39 : vector<128x32xi1>, vector<128x32xf32>
    %41 = vector.extract_strided_slice %31 {offsets = [0, 0], sizes = [1, 32], strides = [1, 1]} : vector<3x32xf32> to vector<1x32xf32>
    %42 = vector.broadcast %41 : vector<1x32xf32> to vector<128x32xf32>
    %43 = arith.mulf %40, %42 : vector<128x32xf32>
    %c2_i32_8 = arith.constant 2 : i32
    %44 = tpu.dynamic_rotate %37 by %c2_i32_8 dim 0 : vector<128x32xf32>, i32 -> vector<128x32xf32>
    %cst_9 = arith.constant 0.000000e+00 : f32
    %45 = vector.broadcast %cst_9 : f32 to vector<128x32xf32>
    %46 = arith.select %26, %44, %45 : vector<128x32xi1>, vector<128x32xf32>
    %47 = vector.extract_strided_slice %31 {offsets = [1, 0], sizes = [1, 32], strides = [1, 1]} : vector<3x32xf32> to vector<1x32xf32>
    %48 = vector.broadcast %47 : vector<1x32xf32> to vector<128x32xf32>
    %49 = arith.mulf %46, %48 : vector<128x32xf32>
    %50 = arith.addf %43, %49 : vector<128x32xf32>
    %c1_i32_10 = arith.constant 1 : i32
    %51 = tpu.dynamic_rotate %37 by %c1_i32_10 dim 0 : vector<128x32xf32>, i32 -> vector<128x32xf32>
    %cst_11 = arith.constant 0.000000e+00 : f32
    %52 = vector.broadcast %cst_11 : f32 to vector<128x32xf32>
    %53 = arith.select %22, %51, %52 : vector<128x32xi1>, vector<128x32xf32>
    %54 = vector.extract_strided_slice %31 {offsets = [2, 0], sizes = [1, 32], strides = [1, 1]} : vector<3x32xf32> to vector<1x32xf32>
    %55 = vector.broadcast %54 : vector<1x32xf32> to vector<128x32xf32>
    %56 = arith.mulf %53, %55 : vector<128x32xf32>
    %57 = arith.addf %50, %56 : vector<128x32xf32>
    %58 = vector.broadcast %32 : vector<1x32xf32> to vector<128x32xf32>
    %59 = arith.addf %57, %58 : vector<128x32xf32>
    %cst_12 = arith.constant 0.000000e+00 : f32
    %60 = vector.broadcast %cst_12 : f32 to vector<128x32xf32>
    %61 = arith.cmpf ogt, %59, %60 : vector<128x32xf32>
    %cst_13 = arith.constant 0.00999999977 : f32
    %62 = vector.broadcast %cst_13 : f32 to vector<128x32xf32>
    %63 = arith.mulf %62, %59 : vector<128x32xf32>
    %64 = arith.select %61, %59, %63 : vector<128x32xi1>, vector<128x32xf32>
    %c0_14 = arith.constant 0 : index
    %c0_15 = arith.constant 0 : index
    %65 = vector.load %arg2[%c0_14, %c0_15] : memref<96x64xbf16, #tpu.memory_space<vmem>>, vector<96x64xbf16>
    %c2_i32_16 = arith.constant 2 : i32
    %66 = tpu.dynamic_rotate %64 by %c2_i32_16 dim 0 : vector<128x32xf32>, i32 -> vector<128x32xf32>
    %cst_17 = arith.constant 0.000000e+00 : f32
    %67 = vector.broadcast %cst_17 : f32 to vector<128x32xf32>
    %68 = arith.select %26, %66, %67 : vector<128x32xi1>, vector<128x32xf32>
    %c1_i32_18 = arith.constant 1 : i32
    %69 = tpu.dynamic_rotate %64 by %c1_i32_18 dim 0 : vector<128x32xf32>, i32 -> vector<128x32xf32>
    %cst_19 = arith.constant 0.000000e+00 : f32
    %70 = vector.broadcast %cst_19 : f32 to vector<128x32xf32>
    %71 = arith.select %22, %69, %70 : vector<128x32xi1>, vector<128x32xf32>
    %72 = tpu.concatenate %68, %71, %64 in 1 : vector<128x32xf32>, vector<128x32xf32>, vector<128x32xf32> -> vector<128x96xf32>
    %73 = arith.truncf %72 : vector<128x96xf32> to vector<128x96xbf16>
    %74 = vector.extract_strided_slice %65 {offsets = [0, 0], sizes = [96, 32], strides = [1, 1]} : vector<96x64xbf16> to vector<96x32xbf16>
    %cst_20 = arith.constant dense<0.000000e+00> : vector<128x32xf32>
    %75 = tpu.matmul %73, %74, %cst_20 {dimension_numbers = #tpu.dot_dimension_numbers<[1], [0], [0], [1], [0, 0, 1, 1], [], []>} : vector<128x96xbf16>, vector<96x32xbf16>, vector<128x32xf32> -> vector<128x32xf32>
    %76 = vector.broadcast %33 : vector<1x32xf32> to vector<128x32xf32>
    %77 = arith.addf %75, %76 : vector<128x32xf32>
    %cst_21 = arith.constant 0.000000e+00 : f32
    %78 = vector.broadcast %cst_21 : f32 to vector<128x32xf32>
    %79 = arith.cmpf ogt, %77, %78 : vector<128x32xf32>
    %cst_22 = arith.constant 0.00999999977 : f32
    %80 = vector.broadcast %cst_22 : f32 to vector<128x32xf32>
    %81 = arith.mulf %80, %77 : vector<128x32xf32>
    %82 = arith.select %79, %77, %81 : vector<128x32xi1>, vector<128x32xf32>
    %c2_i32_23 = arith.constant 2 : i32
    %83 = tpu.dynamic_rotate %82 by %c2_i32_23 dim 0 : vector<128x32xf32>, i32 -> vector<128x32xf32>
    %cst_24 = arith.constant 0.000000e+00 : f32
    %84 = vector.broadcast %cst_24 : f32 to vector<128x32xf32>
    %85 = arith.select %26, %83, %84 : vector<128x32xi1>, vector<128x32xf32>
    %c1_i32_25 = arith.constant 1 : i32
    %86 = tpu.dynamic_rotate %82 by %c1_i32_25 dim 0 : vector<128x32xf32>, i32 -> vector<128x32xf32>
    %cst_26 = arith.constant 0.000000e+00 : f32
    %87 = vector.broadcast %cst_26 : f32 to vector<128x32xf32>
    %88 = arith.select %22, %86, %87 : vector<128x32xi1>, vector<128x32xf32>
    %89 = tpu.concatenate %85, %88, %82 in 1 : vector<128x32xf32>, vector<128x32xf32>, vector<128x32xf32> -> vector<128x96xf32>
    %90 = arith.truncf %89 : vector<128x96xf32> to vector<128x96xbf16>
    %91 = vector.extract_strided_slice %65 {offsets = [0, 32], sizes = [96, 32], strides = [1, 1]} : vector<96x64xbf16> to vector<96x32xbf16>
    %cst_27 = arith.constant dense<0.000000e+00> : vector<128x32xf32>
    %92 = tpu.matmul %90, %91, %cst_27 {dimension_numbers = #tpu.dot_dimension_numbers<[1], [0], [0], [1], [0, 0, 1, 1], [], []>} : vector<128x96xbf16>, vector<96x32xbf16>, vector<128x32xf32> -> vector<128x32xf32>
    %93 = vector.broadcast %34 : vector<1x32xf32> to vector<128x32xf32>
    %94 = arith.addf %92, %93 : vector<128x32xf32>
    %cst_28 = arith.constant 0.000000e+00 : f32
    %95 = vector.broadcast %cst_28 : f32 to vector<128x32xf32>
    %96 = arith.cmpf ogt, %94, %95 : vector<128x32xf32>
    %cst_29 = arith.constant 0.00999999977 : f32
    %97 = vector.broadcast %cst_29 : f32 to vector<128x32xf32>
    %98 = arith.mulf %97, %94 : vector<128x32xf32>
    %99 = arith.select %96, %94, %98 : vector<128x32xi1>, vector<128x32xf32>
    %c2_i32_30 = arith.constant 2 : i32
    %100 = tpu.dynamic_rotate %99 by %c2_i32_30 dim 0 : vector<128x32xf32>, i32 -> vector<128x32xf32>
    %cst_31 = arith.constant 0.000000e+00 : f32
    %101 = vector.broadcast %cst_31 : f32 to vector<128x32xf32>
    %102 = arith.select %26, %100, %101 : vector<128x32xi1>, vector<128x32xf32>
    %c1_i32_32 = arith.constant 1 : i32
    %103 = tpu.dynamic_rotate %99 by %c1_i32_32 dim 0 : vector<128x32xf32>, i32 -> vector<128x32xf32>
    %cst_33 = arith.constant 0.000000e+00 : f32
    %104 = vector.broadcast %cst_33 : f32 to vector<128x32xf32>
    %105 = arith.select %22, %103, %104 : vector<128x32xi1>, vector<128x32xf32>
    %106 = tpu.concatenate %102, %105, %99 in 1 : vector<128x32xf32>, vector<128x32xf32>, vector<128x32xf32> -> vector<128x96xf32>
    %107 = arith.truncf %106 : vector<128x96xf32> to vector<128x96xbf16>
    %c0_34 = arith.constant 0 : index
    %c0_35 = arith.constant 0 : index
    %108 = vector.load %arg3[%c0_34, %c0_35] : memref<96x256xbf16, #tpu.memory_space<vmem>>, vector<96x256xbf16>
    %cst_36 = arith.constant dense<0.000000e+00> : vector<128x256xf32>
    %109 = tpu.matmul %107, %108, %cst_36 {dimension_numbers = #tpu.dot_dimension_numbers<[1], [0], [0], [1], [0, 0, 1, 1], [], []>} : vector<128x96xbf16>, vector<96x256xbf16>, vector<128x256xf32> -> vector<128x256xf32>
    %110 = vector.broadcast %35 : vector<1x256xf32> to vector<128x256xf32>
    %111 = arith.addf %109, %110 : vector<128x256xf32>
    %cst_37 = arith.constant 2.550000e+02 : f32
    %112 = vector.broadcast %cst_37 : f32 to vector<128x1xf32>
    %113 = arith.mulf %0, %112 : vector<128x1xf32>
    %114 = arith.fptosi %113 : vector<128x1xf32> to vector<128x1xi32>
    %115 = tpu.iota {dimensions = array<i32: 1>} : vector<128x256xi32>
    %116 = vector.broadcast %114 : vector<128x1xi32> to vector<128x256xi32>
    %117 = arith.cmpi eq, %115, %116 : vector<128x256xi32>
    %cst_38 = arith.constant 0.000000e+00 : f32
    %118 = vector.broadcast %cst_38 : f32 to vector<128x256xf32>
    %119 = arith.select %117, %111, %118 : vector<128x256xi1>, vector<128x256xf32>
    %cst_39 = arith.constant dense<0.000000e+00> : vector<128xf32>
    %120 = vector.multi_reduction <add>, %119, %cst_39 [1] : vector<128x256xf32> to vector<128xf32>
    %121 = vector.shape_cast %120 : vector<128xf32> to vector<128x1xf32>
    %cst_40 = arith.constant dense<0xFF800000> : vector<128xf32>
    %122 = vector.multi_reduction <maximumf>, %111, %cst_40 [1] : vector<128x256xf32> to vector<128xf32>
    %123 = vector.shape_cast %122 : vector<128xf32> to vector<128x1xf32>
    %124 = vector.broadcast %123 : vector<128x1xf32> to vector<128x256xf32>
    %125 = arith.subf %111, %124 : vector<128x256xf32>
    %126 = math.exp %125 : vector<128x256xf32>
    %cst_41 = arith.constant dense<0.000000e+00> : vector<128xf32>
    %127 = vector.multi_reduction <add>, %126, %cst_41 [1] : vector<128x256xf32> to vector<128xf32>
    %128 = vector.shape_cast %127 : vector<128xf32> to vector<128x1xf32>
    %129 = math.log %128 : vector<128x1xf32>
    %130 = arith.subf %121, %123 : vector<128x1xf32>
    %131 = arith.subf %130, %129 : vector<128x1xf32>
    %cst_42 = arith.constant -11.5129251 : f32
    %cst_43 = arith.constant -1.00000498E-5 : f32
    %132 = vector.broadcast %cst_42 : f32 to vector<128x1xf32>
    %133 = arith.maximumf %132, %131 : vector<128x1xf32>
    %134 = vector.broadcast %cst_43 : f32 to vector<128x1xf32>
    %135 = arith.minimumf %134, %133 : vector<128x1xf32>
    %cst_44 = arith.constant dense<0.000000e+00> : vector<1xf32>
    %136 = vector.multi_reduction <add>, %135, %cst_44 [0] : vector<128x1xf32> to vector<1xf32>
    %137 = vector.shape_cast %136 : vector<1xf32> to vector<1x1xf32>
    %cst_45 = arith.constant -1.250000e-01 : f32
    %138 = vector.broadcast %cst_45 : f32 to vector<1x1xf32>
    %139 = arith.mulf %137, %138 : vector<1x1xf32>
    %140 = vector.shape_cast %139 : vector<1x1xf32> to vector<1x1xf32>
    %141 = vector.broadcast %140 : vector<1x1xf32> to vector<8x128xf32>
    %c0_46 = arith.constant 0 : index
    %c0_47 = arith.constant 0 : index
    %142 = vector.load %arg4[%c0_46, %c0_47] : memref<8x128xf32, #tpu.memory_space<vmem>>, vector<8x128xf32>
    tpu.vector_store %arg4[%c0_46, %c0_47], %141 {strides = array<i32>} : memref<8x128xf32, #tpu.memory_space<vmem>>, vector<8x128xf32>,
    return
  }
}

</mosaic_0001>

<bundles_post_ra>
// kernel: tpu_custom_call.1
= control target key start
LH: loop header
LB: loop body
LE: loop exit
PB: predicated region body
PF: predicated region fallthrough
CT: control target
= control target key end

     0   :  { %v3290_v2 = vmov 0   ;;  %s5277_s0 = inlined_call_operand.vmem [shape: f32[128,1], index: 0, kind: input, shape index: {}]   ;;  %s5278_s1 = inlined_call_operand.vmem [shape: f32[8,256], index: 1, kind: input, shape index: {}]   ;;  %s5279_s2 = inlined_call_operand.vmem [shape: bf16[96,64], index: 2, kind: input, shape index: {}]   ;;  %s5280_s3 = inlined_call_operand.vmem [shape: bf16[96,256], index: 3, kind: input, shape index: {}]   ;;  %s5281_s4 = inlined_call_operand.hbm [shape: f32[8,128], index: 4, kind: output, shape index: {}]  }
   0x1   :  { %v20_v0 = vld [vmem:[%s5277_s0 + $0x8] sm:$0xff]  ;;  %v19_v1 = vld [vmem:[%s5277_s0] sm:$0xff]  ;;  %2885 = vset.pattern.permute.xlu1 %v3290_v2  ;;  %2884 = vset.pattern.permute.xlu0 %v3290_v2  ;;  %v21_v3 = vld [vmem:[%s5277_s0 + $0x10] sm:$0xff] }
   0x2   :  { %397 = vperm.xlu1 %2885, %v20_v0   ;;  %392 = vperm.xlu0 %2884, %v19_v1   ;;  %v34_v4 = vld [vmem:[%s5277_s0 + $0x78] sm:$0xff]  ;;  %v33_v6 = vld [vmem:[%s5277_s0 + $0x70] sm:$0xff]  ;;  %v24_v7 = vld [vmem:[%s5277_s0 + $0x28] sm:$0xff] }
   0x3   :  { %2120 = vmatprep.mubr.bf16.mxu0 %v3290_v2  ;;  %v22_v5 = vld [vmem:[%s5277_s0 + $0x18] sm:$0xff]  ;;  %v23_v8 = vld [vmem:[%s5277_s0 + $0x20] sm:$0xff] }
   0x6   :  { %402 = vperm.xlu1 %2885, %v21_v3   ;;  %467 = vperm.xlu0 %2884, %v34_v4  }
   0xa   :  { %407 = vperm.xlu1 %2885, %v22_v5   ;;  %462 = vperm.xlu0 %2884, %v33_v6  }
   0xe   :  { %417 = vperm.xlu1 %2885, %v24_v7   ;;  %412 = vperm.xlu0 %2884, %v23_v8  }
   0xf   :  { %9 = vsyncpa [#allocation3], 0  ;;  %v26_v9 = vld [vmem:[%s5277_s0 + $0x38] sm:$0xff]  ;;  %v25_v10 = vld [vmem:[%s5277_s0 + $0x30] sm:$0xff]  ;;  %v37_v21 = vlaneseq  ;;  %s3291_s7 = smov 32   ;;  %s3292_s10 = smov 64  }
  0x10   :  { %v28_v11 = vld [vmem:[%s5277_s0 + $0x48] sm:$0xff]  ;;  %v27_v12 = vld [vmem:[%s5277_s0 + $0x40] sm:$0xff]  ;;  %v30_v13 = vld [vmem:[%s5277_s0 + $0x58] sm:$0xff]  ;;  %s3293_s13 = smov 96  }
  0x11   :  { %v29_v14 = vld [vmem:[%s5277_s0 + $0x50] sm:$0xff]  ;;  %v32_v15 = vld [vmem:[%s5277_s0 + $0x68] sm:$0xff]  ;;  %v31_v16 = vld [vmem:[%s5277_s0 + $0x60] sm:$0xff]  ;;  %v3384_v22 = vshrl.u32 %v37_v21, 7 }
  0x12   :  { %427 = vperm.xlu1 %2885, %v26_v9   ;;  %422 = vperm.xlu0 %2884, %v25_v10   ;;  %v3126_v17 = vld [vmem:[%s5279_s2 + $0x28] sm:$0xff]   ;;  %v3127_v18 = vld [vmem:[%s5279_s2 + $0x20] sm:$0xff]   ;;  %v3128_v19 = vld [vmem:[%s5279_s2 + $0x18] sm:$0xff]  }
  0x13   :  { %2791 = vmatprep.subr.bf16.mxu1 %v3126_v17  ;;  %v3129_v20 = vld [vmem:[%s5279_s2 + $0x10] sm:$0xff]   ;;  %v40_v23 = vadd.s32 16, %v3384_v22  ;;  %v521_v24 = vsub.s32 0, %v3384_v22  ;;  %v590_v25 = vsub.s32 1, %v3384_v22  ;;  %v675_v26 = vsub.s32 2, %v3384_v22  ;;  %v35_v28 = vld [vmem:[%s5278_s1] sm:$0xff] }
  0x14   :  { %2792 = vmatpush3.bf16.msra.mxu1 %v3126_v17  ;;  %v711_v27 = vsub.s32 3, %v3384_v22  ;;  %v3395_v29 = vand.u32 15, %v3384_v22  ;;  %v42_v30 = vadd.s32 32, %v3384_v22  ;;  %vm486_vm0 = vcmp.lt.s32.totalorder %v3384_v22, 3 }
  0x15   :  { %2793 = vmatprep.subr.bf16.mxu1 %v3127_v18  ;;  %vm555_vm1 = vcmp.lt.s32.totalorder %v3384_v22, 2  ;;  %vm640_vm2 = vcmp.lt.s32.totalorder %v3384_v22, 1  ;;  %v3401_v31 = vand.u32 15, %v40_v23  ;;  %v3403_v33 = vrot.slane %v35_v28, %v521_v24 }
  0x16   :  { %437 = vperm.xlu1 %2885, %v28_v11   ;;  %432 = vperm.xlu0 %2884, %v27_v12   ;;  %v3405_v34 = vrot.slane %v35_v28, %v590_v25  ;;  %v3407_v35 = vrot.slane %v35_v28, %v675_v26  ;;  %v3409_v36 = vrot.slane %v35_v28, %v711_v27  ;;  %vm342_vm3 = vcmp.ge.s32.totalorder %v3395_v29, 3 }
  0x17   :  { %v3417_v44 = vand.u32 15, %v42_v30  ;;  %vm344_vm4 = vcmp.ge.s32.totalorder %v3401_v31, 3  ;;  %v44_v46 = vadd.s32 48, %v3384_v22  ;;  %v46_v47 = vadd.s32 64, %v3384_v22 }
  0x18   :  { %2794 = vmatpush3.bf16.msra.mxu1 %v3127_v18  ;;  %vm5290_vm5 = vcmp.ge.s32.totalorder %v3395_v29, 2  ;;  %v48_v52 = vadd.s32 80, %v3384_v22  ;;  %v52_v53 = vadd.s32 112, %v3384_v22  ;;  %v50_v57 = vadd.s32 96, %v3384_v22 }
  0x19   :  { %2795 = vmatprep.subr.bf16.mxu1 %v3128_v19  ;;  %vm5288_vm6 = vcmp.ge.s32.totalorder %v3401_v31, 2  ;;  %v3439_v0 = vand.u32 15, %v44_v46  ;;  %v3449_v7 = vand.u32 15, %v46_v47  ;;  %vm346_vm7 = vcmp.ge.s32.totalorder %v3417_v44, 3 }
  0x1a   :  { %447 = vperm.xlu1 %2885, %v30_v13   ;;  %442 = vperm.xlu0 %2884, %v29_v14   ;;  %v3453_v9 = vand.u32 15, %v48_v52  ;;  %v3455_v10 = vand.u32 15, %v52_v53  ;;  %v3457_v11 = vand.u32 15, %v50_v57  ;;  %vm298_vm8 = vcmp.ge.s32.totalorder %v3417_v44, 2 }
  0x1b   :  { %vm348_vm9 = vcmp.ge.s32.totalorder %v3439_v0, 3  ;;  %vm5287_vm10 = vcmp.ge.s32.totalorder %v3439_v0, 2  ;;  %vm350_vm11 = vcmp.ge.s32.totalorder %v3449_v7, 3  ;;  %vm5284_vm12 = vcmp.ge.s32.totalorder %v3449_v7, 2 }
  0x1c   :  { %2796 = vmatpush3.bf16.msra.mxu1 %v3128_v19  ;;  %vm5283_vm13 = vcmp.ge.s32.totalorder %v3453_v9, 2  ;;  %vm352_vm14 = vcmp.ge.s32.totalorder %v3453_v9, 3  ;;  %vm5282_vm15 = vcmp.ge.s32.totalorder %v3455_v10, 2 }
  0x1d   :  { %2797 = vmatprep.subr.bf16.mxu1 %v3129_v20 }
  0x1e   :  { %457 = vperm.xlu1 %2885, %v32_v15   ;;  %452 = vperm.xlu0 %2884, %v31_v16  }
  0x20   :  { %2798 = vmatpush3.bf16.msra.mxu1 %v3129_v20 }
  0x7d   :  { %v398_v32 = vpop.permute.xlu1 %397  ;;  %v3411_v37 = vpop.permute.xlu0 %392 }
  0x7e   :  { %v471_v38 = vrot.slane %v398_v32, 5  ;;  %v540_v39 = vrot.slane %v398_v32, 6  ;;  %v470_v40 = vrot.slane %v3411_v37, 5  ;;  %v625_v41 = vrot.slane %v398_v32, 7 }
  0x7f   :  { %v539_v42 = vrot.slane %v3411_v37, 6  ;;  %v624_v43 = vrot.slane %v3411_v37, 7 }
  0x80   :  { %v501_v45 = vsel %vm486_vm0, %v470_v40, %v471_v38 }
  0x81   :  { %v524_v48 = vmul.f32 %v3403_v33, %v501_v45  ;;  %v570_v49 = vsel %vm555_vm1, %v539_v42, %v540_v39  ;;  %v403_v50 = vpop.permute.xlu1 %402  ;;  %v468_v51 = vpop.permute.xlu0 %467  ;;  %v655_v58 = vsel %vm640_vm2, %v624_v43, %v625_v41 }
  0x82   :  { %v593_v54 = vmul.f32 %v3405_v34, %v570_v49  ;;  %v472_v55 = vrot.slane %v403_v50, 5  ;;  %v541_v56 = vrot.slane %v403_v50, 6  ;;  %v626_v59 = vrot.slane %v403_v50, 7 }
  0x83   :  { %v485_v60 = vrot.slane %v468_v51, 5  ;;  %v554_v4 = vrot.slane %v468_v51, 6  ;;  %v678_v8 = vmul.f32 %v3407_v35, %v655_v58  ;;  %v639_v14 = vrot.slane %v468_v51, 7 }
  0x84   :  { %v609_v61 = vadd.f32 %v593_v54, %v524_v48  ;;  %v500_v62 = vsel %vm486_vm0, %v471_v38, %v472_v55  ;;  %v569_v63 = vsel %vm555_vm1, %v540_v39, %v541_v56  ;;  %v3463_v13 = vsel %vm640_vm2, %v625_v41, %v626_v59 }
  0x85   :  { %v505_v1 = vsel %vm344_vm4, %v500_v62, 0.0  ;;  %v502_v3 = vsel %vm486_vm0, %v485_v60, %v470_v40  ;;  %v3445_v5 = vpop.permute.xlu1 %407  ;;  %v3447_v6 = vpop.permute.xlu0 %462  ;;  %v574_v12 = vsel %vm5288_vm6, %v569_v63, 0.0  ;;  %v571_v20 = vsel %vm555_vm1, %v554_v4, %v539_v42 }
  0x86   :  { %v473_v15 = vrot.slane %v3445_v5, 5  ;;  %v694_v16 = vadd.f32 %v678_v8, %v609_v61  ;;  %v3468_v17 = vmul.f32 %v3403_v33, %v505_v1  ;;  %v503_v18 = vsel %vm342_vm3, %v502_v3, 0.0 }
  0x87   :  { %v542_v19 = vrot.slane %v3445_v5, 6  ;;  %v627_v24 = vrot.slane %v3445_v5, 7  ;;  %v484_v25 = vrot.slane %v3447_v6, 5  ;;  %v594_v27 = vmul.f32 %v3405_v34, %v574_v12 }
  0x88   :  { %v499_v23 = vsel %vm486_vm0, %v472_v55, %v473_v15  ;;  %v553_v30 = vrot.slane %v3447_v6, 6  ;;  %v638_v32 = vrot.slane %v3447_v6, 7  ;;  %v523_v37 = vmul.f32 %v3403_v33, %v503_v18 }
  0x89   :  { %v3479_v26 = vpop.permute.xlu1 %417  ;;  %v568_v28 = vsel %vm555_vm1, %v541_v56, %v542_v19  ;;  %v526_v38 = vmul.f32 %v3403_v33, %v499_v23  ;;  %v487_v40 = vsel %vm486_vm0, %v484_v25, %v485_v60  ;;  %v3493_v41 = vpop.permute.xlu0 %412  ;;  %v572_v42 = vsel %vm5290_vm5, %v571_v20, 0.0 }
  0x8a   :  { %v595_v39 = vmul.f32 %v3405_v34, %v568_v28  ;;  %v3499_v45 = vsel %vm640_vm2, %v639_v14, %v624_v43  ;;  %v538_v46 = vmul.f32 %v3403_v33, %v487_v40  ;;  %v556_v47 = vsel %vm555_vm1, %v553_v30, %v554_v4 }
  0x8b   :  { %v653_v48 = vsel %vm640_vm2, %v626_v59, %v627_v24  ;;  %v607_v49 = vmul.f32 %v3405_v34, %v556_v47  ;;  %v641_v43 = vsel %vm640_vm2, %v638_v32, %v639_v14  ;;  %v475_v50 = vrot.slane %v3479_v26, 5 }
  0x8c   :  { %v544_v52 = vrot.slane %v3479_v26, 6  ;;  %v629_v53 = vrot.slane %v3479_v26, 7  ;;  %v474_v54 = vrot.slane %v3493_v41, 5  ;;  %v543_v55 = vrot.slane %v3493_v41, 6 }
  0x8d   :  { %v3516_v51 = vpop.permute.xlu1 %427  ;;  %v592_v56 = vmul.f32 %v3405_v34, %v572_v42  ;;  %v611_v57 = vadd.f32 %v595_v39, %v526_v38  ;;  %v623_v58 = vadd.f32 %v607_v49, %v538_v46  ;;  %v628_v59 = vrot.slane %v3493_v41, 7  ;;  %v3539_v12 = vpop.permute.xlu0 %422 }
  0x8e   :  { %v497_v60 = vsel %vm486_vm0, %v474_v54, %v475_v50  ;;  %v498_v61 = vsel %vm486_vm0, %v473_v15, %v474_v54  ;;  %v566_v62 = vsel %vm555_vm1, %v543_v55, %v544_v52  ;;  %v567_v63 = vsel %vm555_vm1, %v542_v19, %v543_v55 }
  0x8f   :  { %v680_v1 = vmul.f32 %v3407_v35, %v653_v48  ;;  %v692_v3 = vmul.f32 %v3407_v35, %v641_v43  ;;  %v507_v4 = vsel %vm346_vm7, %v498_v61, 0.0  ;;  %v528_v8 = vmul.f32 %v3403_v33, %v497_v60 }
  0x90   :  { %v576_v14 = vsel %vm298_vm8, %v567_v63, 0.0  ;;  %v597_v15 = vmul.f32 %v3405_v34, %v566_v62  ;;  %v651_v18 = vsel %vm640_vm2, %v628_v59, %v629_v53  ;;  %v477_v19 = vrot.slane %v3516_v51, 5 }
  0x91   :  { %v3549_v20 = vpop.permute.xlu1 %437  ;;  %v3553_v23 = vadd.f32 %v3409_v36, %v694_v16  ;;  %v696_v28 = vadd.f32 %v680_v1, %v611_v57  ;;  %v708_v38 = vadd.f32 %v692_v3, %v623_v58  ;;  %v527_v39 = vmul.f32 %v3403_v33, %v507_v4  ;;  %v3579_v63 = vpop.permute.xlu0 %432 }
  0x92   :  { %v613_v40 = vadd.f32 %v597_v15, %v528_v8  ;;  %v682_v41 = vmul.f32 %v3407_v35, %v651_v18  ;;  %v546_v42 = vrot.slane %v3516_v51, 6  ;;  %v476_v46 = vrot.slane %v3539_v12, 5 }
  0x93   :  { %v596_v47 = vmul.f32 %v3405_v34, %v576_v14  ;;  %v631_v48 = vrot.slane %v3516_v51, 7  ;;  %v545_v16 = vrot.slane %v3539_v12, 6  ;;  %v630_v49 = vrot.slane %v3539_v12, 7 }
  0x94   :  { %v3565_v43 = vadd.f32 %v594_v27, %v3468_v17  ;;  %v3567_v54 = vadd.f32 %v592_v56, %v523_v37  ;;  %v698_v55 = vadd.f32 %v682_v41, %v613_v40  ;;  %v495_v57 = vsel %vm486_vm0, %v476_v46, %v477_v19 }
  0x95   :  { %v3572_v58 = vadd.f32 %v3409_v36, %v696_v28  ;;  %v496_v60 = vsel %vm486_vm0, %v475_v50, %v476_v46  ;;  %v530_v61 = vmul.f32 %v3403_v33, %v495_v57  ;;  %v564_v62 = vsel %vm555_vm1, %v545_v16, %v546_v42  ;;  %v3586_v1 = vpop.permute.xlu1 %447  ;;  %v443_v57 = vpop.permute.xlu0 %442 }
  0x96   :  { %v565_v17 = vsel %vm555_vm1, %v544_v52, %v545_v16  ;;  %v599_v27 = vmul.f32 %v3405_v34, %v564_v62  ;;  %v479_v37 = vrot.slane %v3549_v20, 5  ;;  %v548_v56 = vrot.slane %v3549_v20, 6 }
  0x97   :  { %v3589_v50 = vadd.f32 %v3409_v36, %v708_v38  ;;  %v3591_v3 = vadd.f32 %v596_v47, %v527_v39  ;;  %v3597_v4 = vsel %vm640_vm2, %v627_v24, %v628_v59  ;;  %v649_v52 = vsel %vm640_vm2, %v630_v49, %v631_v48 }
  0x98   :  { %v3608_v8 = vadd.f32 %v3409_v36, %v698_v55  ;;  %v509_v5 = vsel %vm348_vm9, %v496_v60, 0.0  ;;  %v478_v24 = vrot.slane %v3579_v63, 5  ;;  %v547_v59 = vrot.slane %v3579_v63, 6 }
  0x99   :  { %v578_v14 = vsel %vm5287_vm10, %v565_v17, 0.0  ;;  %v615_v15 = vadd.f32 %v599_v27, %v530_v61  ;;  %v633_v18 = vrot.slane %v3549_v20, 7  ;;  %v632_v28 = vrot.slane %v3579_v63, 7  ;;  %v3639_v63 = vpop.permute.xlu1 %457 }
  0x9a   :  { %vm356_vm3 = vcmp.ge.s32.totalorder %v3455_v10, 3  ;;  %v684_v38 = vmul.f32 %v3407_v35, %v649_v52  ;;  %v493_v39 = vsel %vm486_vm0, %v478_v24, %v479_v37  ;;  %v494_v40 = vsel %vm486_vm0, %v477_v19, %v478_v24 }
  0x9b   :  { %v562_v41 = vsel %vm555_vm1, %v547_v59, %v548_v56  ;;  %vm5285_vm4 = vcmp.ge.s32.totalorder %v3401_v31, 1  ;;  %v511_v46 = vsel %vm350_vm11, %v494_v40, 0.0  ;;  %v532_v47 = vmul.f32 %v3403_v33, %v493_v39 }
  0x9c   :  { %v563_v16 = vsel %vm555_vm1, %v546_v42, %v547_v59  ;;  %v601_v55 = vmul.f32 %v3405_v34, %v562_v41  ;;  %v529_v60 = vmul.f32 %v3403_v33, %v509_v5  ;;  %v481_v61 = vrot.slane %v3586_v1, 5 }
  0x9d   :  { %v580_v19 = vsel %vm5284_vm12, %v563_v16, 0.0  ;;  %v550_v62 = vrot.slane %v3586_v1, 6  ;;  %v598_v17 = vmul.f32 %v3405_v34, %v578_v14  ;;  %v700_v27 = vadd.f32 %v684_v38, %v615_v15 }
  0x9e   :  { %v531_v52 = vmul.f32 %v3403_v33, %v511_v46  ;;  %v647_v42 = vsel %vm640_vm2, %v632_v28, %v633_v18  ;;  %v600_v5 = vmul.f32 %v3405_v34, %v580_v19  ;;  %v617_v24 = vadd.f32 %v601_v55, %v532_v47 }
  0x9f   :  { %v480_v59 = vrot.slane %v443_v57, 5  ;;  %v549_v39 = vrot.slane %v443_v57, 6  ;;  %v635_v40 = vrot.slane %v3586_v1, 7  ;;  %v634_v41 = vrot.slane %v443_v57, 7 }
  0xa0   :  { %v483_v16 = vrot.slane %v3639_v63, 5  ;;  %v552_v14 = vrot.slane %v3639_v63, 6  ;;  %v3663_v55 = vadd.f32 %v598_v17, %v529_v60  ;;  %v3671_v57 = vsel %vm640_vm2, %v629_v53, %v630_v49 }
  0xa1   :  { %v491_v15 = vsel %vm486_vm0, %v480_v59, %v481_v61  ;;  %v492_v38 = vsel %vm486_vm0, %v479_v37, %v480_v59  ;;  %v560_v46 = vsel %vm555_vm1, %v549_v39, %v550_v62  ;;  %v561_v47 = vsel %vm555_vm1, %v548_v56, %v549_v39 }
  0xa2   :  { %v3674_v37 = vadd.f32 %v3409_v36, %v700_v27  ;;  %v534_v19 = vmul.f32 %v3403_v33, %v491_v15  ;;  %vm246_vm7 = vcmp.ge.s32.totalorder %v3395_v29, 1  ;;  %v686_v59 = vmul.f32 %v3407_v35, %v647_v42  ;;  %v453_v15 = vpop.permute.xlu0 %452 }
  0xa3   :  { %v513_v56 = vsel %vm352_vm14, %v492_v38, 0.0  ;;  %v582_v12 = vsel %vm5283_vm13, %v561_v47, 0.0  ;;  %v603_v26 = vmul.f32 %v3405_v34, %v560_v46  ;;  %vm354_vm9 = vcmp.ge.s32.totalorder %v3457_v11, 3 }
  0xa4   :  { %v3689_v53 = vsel %vm640_vm2, %v631_v48, %v632_v28  ;;  %v645_v49 = vsel %vm640_vm2, %v634_v41, %v635_v40  ;;  %v488_v60 = vsel %vm486_vm0, %v483_v16, %v484_v25  ;;  %v557_v17 = vsel %vm555_vm1, %v552_v14, %v553_v30 }
  0xa5   :  { %vm5286_vm11 = vcmp.ge.s32.totalorder %v3457_v11, 2  ;;  %v3704_v51 = vadd.f32 %v600_v5, %v531_v52  ;;  %v702_v48 = vadd.f32 %v686_v59, %v617_v24  ;;  %v517_v28 = vsel %vm356_vm3, %v488_v60, 0.0 }
  0xa6   :  { %v586_v27 = vsel %vm5282_vm15, %v557_v17, 0.0  ;;  %v533_v42 = vmul.f32 %v3403_v33, %v513_v56  ;;  %v602_v25 = vmul.f32 %v3405_v34, %v582_v12  ;;  %v619_v39 = vadd.f32 %v603_v26, %v534_v19 }
  0xa7   :  { %v659_v30 = vsel %vm5285_vm4, %v3463_v13, 0.0  ;;  %v688_v52 = vmul.f32 %v3407_v35, %v645_v49  ;;  %v537_v5 = vmul.f32 %v3403_v33, %v517_v28  ;;  %v606_v24 = vmul.f32 %v3405_v34, %v586_v27 }
  0xa8   :  { %v679_v38 = vmul.f32 %v3407_v35, %v659_v30  ;;  %vm730_vm14 = vcmp.gt.f32.partialorder %v3553_v23, 0.0  ;;  %vm732_vm3 = vcmp.gt.f32.partialorder %v3572_v58, 0.0  ;;  %v746_v46 = vmul.f32 0.01, %v3553_v23 }
  0xa9   :  { %v748_v47 = vmul.f32 0.01, %v3572_v58  ;;  %vm250_vm15 = vcmp.ge.s32.totalorder %v3417_v44, 1  ;;  %v3725_v13 = vadd.f32 %v3409_v36, %v702_v48  ;;  %v482_v59 = vrot.slane %v453_v15, 5 }
  0xaa   :  { %v695_v19 = vadd.f32 %v679_v38, %v3565_v43  ;;  %v551_v56 = vrot.slane %v453_v15, 6  ;;  %v3728_v12 = vadd.f32 %v602_v25, %v533_v42  ;;  %v3734_v26 = vsel %vm640_vm2, %v633_v18, %v634_v41 }
  0xab   :  { %v704_v49 = vadd.f32 %v688_v52, %v619_v39  ;;  %v637_v60 = vrot.slane %v3639_v63, 7  ;;  %vm252_vm13 = vcmp.ge.s32.totalorder %v3439_v0, 1  ;;  %v3738_v17 = vadd.f32 %v606_v24, %v537_v5 }
  0xac   :  { %v715_v48 = vadd.f32 %v3409_v36, %v695_v19  ;;  %v3744_v43 = vsel %vm730_vm14, %v3553_v23, %v746_v46  ;;  %v3749_v20 = vsel %vm732_vm3, %v3572_v58, %v748_v47  ;;  %v489_v18 = vsel %vm486_vm0, %v482_v59, %v483_v16 }
  0xad   :  { %v490_v63 = vsel %vm486_vm0, %v481_v61, %v482_v59  ;;  %v559_v41 = vsel %vm555_vm1, %v550_v62, %v551_v56  ;;  %v636_v23 = vrot.slane %v453_v15, 7  ;;  %vm254_vm14 = vcmp.ge.s32.totalorder %v3449_v7, 1 }
  0xae   :  { %vm731_vm12 = vcmp.gt.f32.partialorder %v715_v48, 0.0  ;;  %v747_v28 = vmul.f32 0.01, %v715_v48  ;;  %v558_v58 = vsel %vm555_vm1, %v551_v56, %v552_v14  ;;  %v657_v16 = vsel %vm246_vm7, %v3499_v45, 0.0 }
  0xaf   :  { %v3768_v27 = vadd.f32 %v3409_v36, %v704_v49  ;;  %v3774_v61 = vsel %vm640_vm2, %v637_v60, %v638_v32  ;;  %v840_v62 = vrot.slane %v3749_v20, 7  ;;  %v515_v42 = vsel %vm354_vm9, %v490_v63, 0.0 }
  0xb0   :  { %v3779_v25 = vsel %vm731_vm12, %v715_v48, %v747_v28  ;;  %v838_v14 = vrot.slane %v3744_v43, 7  ;;  %v536_v45 = vmul.f32 %v3403_v33, %v489_v18  ;;  %v584_v39 = vsel %vm5286_vm11, %v559_v41, 0.0 }
  0xb1   :  { %v839_v6 = vrot.slane %v3779_v25, 7  ;;  %v605_v30 = vmul.f32 %v3405_v34, %v558_v58  ;;  %v643_v32 = vsel %vm640_vm2, %v636_v23, %v637_v60  ;;  %v677_v15 = vmul.f32 %v3407_v35, %v657_v16 }
  0xb2   :  { %v792_v52 = vrot.slane %v3749_v20, 6  ;;  %v3792_v5 = vmul.f32 %v3403_v33, %v515_v42  ;;  %vm744_vm0 = vcmp.gt.f32.partialorder %v3589_v50, 0.0  ;;  %v760_v24 = vmul.f32 0.01, %v3589_v50  ;;  %v3809_v33 = vld [vmem:[%s5279_s2 + $0x8] sm:$0xff]  }
  0xb3   :  { %v865_v38 = vsel %vm640_vm2, %v839_v6, %v840_v62  ;;  %v866_v46 = vsel %vm640_vm2, %v838_v14, %v839_v6  ;;  %v3803_v47 = vmul.f32 %v3405_v34, %v584_v39  ;;  %v693_v19 = vadd.f32 %v677_v15, %v3567_v54  ;;  %2799 = vmatprep.subr.bf16.mxu1 %v3809_v33 }
  0xb4   :  { %v871_v59 = vsel %vm5285_vm4, %v866_v46, 0.0  ;;  %v3817_v56 = vsel %vm640_vm2, %v635_v40, %v636_v23  ;;  %v690_v49 = vmul.f32 %v3407_v35, %v643_v32  ;;  %v661_v34 = vsel %vm250_vm15, %v3597_v4, 0.0  ;;  %2800 = vmatpush3.bf16.msra.mxu1 %v3809_v33  ;;  %v3842_v23 = vld [vmem:[%s5279_s2] sm:$0xff]  }
  0xb5   :  { %vm256_vm12 = vcmp.ge.s32.totalorder %v3453_v9, 1  ;;  %v2896_v54 = vpack.i.bf16 %v865_v38, %v871_v59  ;;  %v621_v60 = vadd.f32 %v605_v30, %v536_v45  ;;  %v713_v48 = vadd.f32 %v3409_v36, %v693_v19  ;;  %2801 = vmatprep.subr.bf16.mxu1 %v3842_v23 }
  0xb6   :  { %v3826_v18 = vsel %vm744_vm0, %v3589_v50, %v760_v24  ;;  %v681_v1 = vmul.f32 %v3407_v35, %v661_v34  ;;  %vm734_vm9 = vcmp.gt.f32.partialorder %v3608_v8, 0.0  ;;  %v750_v40 = vmul.f32 0.01, %v3608_v8 }
  0xb7   :  { %v663_v4 = vsel %vm252_vm13, %v3671_v57, 0.0  ;;  %2897 = vrot.lane.b32.xlu1 %v2896_v54, %s3291_s7  ;;  %vm729_vm3 = vcmp.gt.f32.partialorder %v713_v48, 0.0  ;;  %v745_v50 = vmul.f32 0.01, %v713_v48  ;;  %v752_v41 = vmul.f32 0.01, %v3674_v37 }
  0xb8   :  { %v683_v63 = vmul.f32 %v3407_v35, %v663_v4  ;;  %v852_v28 = vrot.slane %v3826_v18, 7  ;;  %v697_v57 = vadd.f32 %v681_v1, %v3591_v3  ;;  %vm736_vm0 = vcmp.gt.f32.partialorder %v3674_v37, 0.0  ;;  %2802 = vmatpush3.bf16.msra.mxu1 %v3842_v23 }
  0xb9   :  { %v665_v58 = vsel %vm254_vm14, %v3689_v53, 0.0  ;;  %v791_v16 = vrot.slane %v3779_v25, 6  ;;  %v3851_v42 = vsel %vm729_vm3, %v713_v48, %v745_v50  ;;  %v2901_v45 = vpack.i.bf16 %v3749_v20, %v3779_v25 }
  0xba   :  { %v699_v39 = vadd.f32 %v683_v63, %v3663_v55  ;;  %v706_v6 = vadd.f32 %v690_v49, %v621_v60  ;;  %v837_v3 = vrot.slane %v3851_v42, 7  ;;  %v717_v30 = vadd.f32 %v3409_v36, %v697_v57 }
  0xbb   :  { %v3862_v53 = vsel %vm734_vm9, %v3608_v8, %v750_v40  ;;  %vm258_vm3 = vcmp.ge.s32.totalorder %v3457_v11, 1  ;;  %2902 = vrot.lane.b32.xlu1 %v2901_v45, %s3292_s10  ;;  %v3871_v32 = vsel %vm736_vm0, %v3674_v37, %v752_v41  ;;  %v685_v15 = vmul.f32 %v3407_v35, %v665_v58 }
  0xbc   :  { %v719_v55 = vadd.f32 %v3409_v36, %v699_v39  ;;  %vm738_vm4 = vcmp.gt.f32.partialorder %v3725_v13, 0.0  ;;  %v867_v8 = vsel %vm640_vm2, %v837_v3, %v838_v14  ;;  %v868_v24 = vsel %vm640_vm2, %v852_v28, %v837_v3 }
  0xbd   :  { %vm733_vm9 = vcmp.gt.f32.partialorder %v717_v30, 0.0  ;;  %v749_v38 = vmul.f32 0.01, %v717_v30  ;;  %vm260_vm11 = vcmp.ge.s32.totalorder %v3455_v10, 1  ;;  %v869_v37 = vsel %vm246_vm7, %v868_v24, 0.0 }
  0xbe   :  { %vm735_vm0 = vcmp.gt.f32.partialorder %v719_v55, 0.0  ;;  %v751_v46 = vmul.f32 0.01, %v719_v55  ;;  %v701_v19 = vadd.f32 %v685_v15, %v3704_v51  ;;  %v2886_v59 = vpack.i.bf16 %v867_v8, %v869_v37 }
  0xbf   :  { %v3885_v49 = vsel %vm733_vm9, %v717_v30, %v749_v38  ;;  %v844_v14 = vrot.slane %v3871_v32, 7  ;;  %v754_v34 = vmul.f32 0.01, %v3725_v13  ;;  %v842_v60 = vrot.slane %v3862_v53, 7 }
  0xc0   :  { %v841_v54 = vrot.slane %v3885_v49, 7  ;;  %v3891_v48 = vsel %vm735_vm0, %v719_v55, %v751_v46  ;;  %v667_v1 = vsel %vm256_vm12, %v3734_v26, 0.0  ;;  %v620_v51 = vadd.f32 %v3803_v47, %v3792_v5  ;;  %2887 = vrot.lane.b32.xlu0 %v2886_v59, %s3291_s7 }
  0xc1   :  { %v726_v40 = vadd.f32 %v3409_v36, %v706_v6  ;;  %v843_v4 = vrot.slane %v3891_v48, 7  ;;  %v721_v50 = vadd.f32 %v3409_v36, %v701_v19  ;;  %v2891_v63 = vpack.i.bf16 %v3744_v43, %v3851_v42 }
  0xc2   :  { %v864_v41 = vsel %vm640_vm2, %v840_v62, %v841_v54  ;;  %v794_v26 = vrot.slane %v3862_v53, 6  ;;  %v3912_v5 = vsel %vm738_vm4, %v3725_v13, %v754_v34  ;;  %v687_v58 = vmul.f32 %v3407_v35, %v667_v1 }
  0xc3   :  { %v861_v47 = vsel %vm640_vm2, %v843_v4, %v844_v14  ;;  %v862_v57 = vsel %vm640_vm2, %v842_v60, %v843_v4  ;;  %vm737_vm9 = vcmp.gt.f32.partialorder %v721_v50, 0.0  ;;  %v863_v45 = vsel %vm640_vm2, %v841_v54, %v842_v60 }
  0xc4   :  { %v873_v62 = vsel %vm250_vm15, %v864_v41, 0.0  ;;  %v875_v39 = vsel %vm252_vm13, %v862_v57, 0.0  ;;  %v753_v13 = vmul.f32 0.01, %v721_v50  ;;  %2892 = vrot.lane.b32.xlu0 %v2891_v63, %s3292_s10  ;;  %v796_v3 = vrot.slane %v3871_v32, 6 }
  0xc5   :  { %v2916_v6 = vpack.i.bf16 %v861_v47, %v875_v39  ;;  %v703_v30 = vadd.f32 %v687_v58, %v3728_v12  ;;  %vm740_vm4 = vcmp.gt.f32.partialorder %v3768_v27, 0.0  ;;  %v846_v15 = vrot.slane %v3912_v5, 7 }
  0xc6   :  { %v3929_v55 = vsel %vm737_vm9, %v721_v50, %v753_v13  ;;  %v756_v8 = vmul.f32 0.01, %v3768_v27  ;;  %v669_v24 = vsel %vm258_vm3, %v3817_v56, 0.0  ;;  %v2906_v38 = vpack.i.bf16 %v863_v45, %v873_v62 }
  0xc7   :  { %2917 = vrot.lane.b32.xlu1 %v2916_v6, %s3291_s7  ;;  %v2921_v37 = vpack.i.bf16 %v3871_v32, %v3891_v48  ;;  %v845_v12 = vrot.slane %v3929_v55, 7  ;;  %v723_v46 = vadd.f32 %v3409_v36, %v703_v30  ;;  %v689_v59 = vmul.f32 %v3407_v35, %v669_v24 }
  0xc8   :  { %v3942_v19 = vsel %vm740_vm4, %v3768_v27, %v756_v8  ;;  %v758_v34 = vmul.f32 0.01, %v726_v40  ;;  %v671_v56 = vsel %vm260_vm11, %v3774_v61, 0.0  ;;  %2907 = vrot.lane.b32.xlu0 %v2906_v38, %s3291_s7  ;;  %vm742_vm9 = vcmp.gt.f32.partialorder %v726_v40, 0.0 }
  0xc9   :  { %v860_v54 = vsel %vm640_vm2, %v844_v14, %v845_v12  ;;  %vm739_vm0 = vcmp.gt.f32.partialorder %v723_v46, 0.0  ;;  %v755_v60 = vmul.f32 0.01, %v723_v46  ;;  %v859_v1 = vsel %vm640_vm2, %v845_v12, %v846_v15 }
  0xca   :  { %v877_v27 = vsel %vm254_vm14, %v860_v54, 0.0  ;;  %v848_v4 = vrot.slane %v3942_v19, 7  ;;  %v705_v50 = vadd.f32 %v689_v59, %v620_v51  ;;  %v793_v63 = vrot.slane %v3885_v49, 6 }
  0xcb   :  { %v2911_v61 = vpack.i.bf16 %v3862_v53, %v3885_v49  ;;  %2922 = vrot.lane.b32.xlu1 %v2921_v37, %s3292_s10  ;;  %v771_v14 = vsel %vm739_vm0, %v723_v46, %v755_v60  ;;  %v691_v41 = vmul.f32 %v3407_v35, %v671_v56  ;;  %v795_v47 = vrot.slane %v3891_v48, 6 }
  0xcc   :  { %v847_v57 = vrot.slane %v771_v14, 7  ;;  %v725_v58 = vadd.f32 %v3409_v36, %v705_v50  ;;  %v774_v45 = vsel %vm742_vm9, %v726_v40, %v758_v34  ;;  %v2926_v62 = vpack.i.bf16 %v859_v1, %v877_v27 }
  0xcd   :  { %2912 = vrot.lane.b32.xlu0 %v2911_v61, %s3292_s10  ;;  %v798_v51 = vrot.slane %v3912_v5, 6  ;;  %v707_v39 = vadd.f32 %v691_v41, %v3738_v17  ;;  %v3972_v35 = vsel %vm555_vm1, %v791_v16, %v792_v52  ;;  %v850_v17 = vrot.slane %v774_v45, 7 }
  0xce   :  { %v857_v49 = vsel %vm640_vm2, %v847_v57, %v848_v4  ;;  %v858_v48 = vsel %vm640_vm2, %v846_v15, %v847_v57  ;;  %vm741_vm4 = vcmp.gt.f32.partialorder %v725_v58, 0.0  ;;  %v757_v40 = vmul.f32 0.01, %v725_v58 }
  0xcf   :  { %v879_v13 = vsel %vm256_vm12, %v858_v48, 0.0  ;;  %v727_v6 = vadd.f32 %v3409_v36, %v707_v39  ;;  %v790_v30 = vrot.slane %v3744_v43, 6  ;;  %v3986_v38 = vsel %vm555_vm1, %v793_v63, %v794_v26 }
  0xd0   :  { %v2936_v8 = vpack.i.bf16 %v857_v49, %v879_v13  ;;  %v773_v24 = vsel %vm741_vm4, %v725_v58, %v757_v40  ;;  %v3992_v15 = vsel %vm555_vm1, %v792_v52, %v793_v63  ;;  %v797_v37 = vrot.slane %v3929_v55, 6 }
  0xd1   :  { %2927 = vrot.lane.b32.xlu0 %v2926_v62, %s3291_s7  ;;  %v849_v36 = vrot.slane %v773_v24, 7  ;;  %vm743_vm0 = vcmp.gt.f32.partialorder %v727_v6, 0.0  ;;  %v759_v43 = vmul.f32 0.01, %v727_v6  ;;  %v800_v12 = vrot.slane %v3942_v19, 6 }
  0xd2   :  { %2937 = vrot.lane.b32.xlu1 %v2936_v8, %s3291_s7  ;;  %v2931_v46 = vpack.i.bf16 %v3912_v5, %v3929_v55  ;;  %v818_v20 = vsel %vm555_vm1, %v790_v30, %v791_v16  ;;  %v4008_v52 = vsel %vm555_vm1, %v794_v26, %v795_v47  ;;  %v799_v59 = vrot.slane %v771_v14, 6 }
  0xd3   :  { %v855_v34 = vsel %vm640_vm2, %v849_v36, %v850_v17  ;;  %v856_v56 = vsel %vm640_vm2, %v848_v4, %v849_v36  ;;  %v775_v54 = vsel %vm743_vm0, %v727_v6, %v759_v43  ;;  %v2941_v5 = vpack.i.bf16 %v3942_v19, %v771_v14 }
  0xd4   :  { %v881_v25 = vsel %vm258_vm3, %v856_v56, 0.0  ;;  %v802_v16 = vrot.slane %v774_v45, 6  ;;  %v851_v55 = vrot.slane %v775_v54, 7  ;;  %v801_v53 = vrot.slane %v773_v24, 6 }
  0xd5   :  { %2932 = vrot.lane.b32.xlu0 %v2931_v46, %s3292_s10  ;;  %v803_v26 = vrot.slane %v775_v54, 6  ;;  %v4022_v60 = vsel %vm555_vm1, %v795_v47, %v796_v3  ;;  %v789_v1 = vrot.slane %v3851_v42, 6  ;;  %v2946_v19 = vpack.i.bf16 %v855_v34, %v881_v25 }
  0xd6   :  { %2942 = vrot.lane.b32.xlu1 %v2941_v5, %s3292_s10  ;;  %v853_v27 = vsel %vm640_vm2, %v851_v55, %v852_v28  ;;  %v854_v4 = vsel %vm640_vm2, %v850_v17, %v851_v55  ;;  %v804_v50 = vrot.slane %v3826_v18, 6  ;;  %v4039_v42 = vsel %vm555_vm1, %v797_v37, %v798_v51 }
  0xd7   :  { %v883_v63 = vsel %vm260_vm11, %v854_v4, 0.0  ;;  %v819_v61 = vsel %vm555_vm1, %v789_v1, %v790_v30  ;;  %v4045_v28 = vsel %vm555_vm1, %v796_v3, %v797_v37  ;;  %v4051_v47 = vsel %vm555_vm1, %v798_v51, %v799_v59 }
  0xd8   :  { %v2956_v14 = vpack.i.bf16 %v853_v27, %v883_v63  ;;  %v820_v41 = vsel %vm555_vm1, %v804_v50, %v789_v1  ;;  %v4056_v57 = vsel %vm555_vm1, %v799_v59, %v800_v12  ;;  %v4060_v32 = vsel %vm555_vm1, %v801_v53, %v802_v16 }
  0xd9   :  { %2947 = vrot.lane.b32.xlu0 %v2946_v19, %s3291_s7  ;;  %v4065_v3 = vsel %vm555_vm1, %v800_v12, %v801_v53  ;;  %v4069_v58 = vsel %vm555_vm1, %v803_v26, %v804_v50  ;;  %v4073_v62 = vsel %vm555_vm1, %v802_v16, %v803_v26  ;;  %v2951_v51 = vpack.i.bf16 %v774_v45, %v773_v24 }
  0xda   :  { %2957 = vrot.lane.b32.xlu1 %v2956_v14, %s3291_s7  ;;  %v2961_v39 = vpack.i.bf16 %v3826_v18, %v775_v54  ;;  %vm1013_vm9 = vcmask 261120   ;;  %vm1030_vm4 = vcmask 523264   ;;  %v823_v17 = vsel %vm5288_vm6, %v818_v20, 0.0 }
  0xdb   :  { %v821_v20 = vsel %vm5290_vm5, %v820_v41, 0.0  ;;  %vm5289_vm0 = vcmask 785408   ;;  %v827_v4 = vsel %vm5287_vm10, %v4008_v52, 0.0  ;;  %vm5291_vm10 = vcmp.ge.s32.totalorder %v3449_v7, 2 }
  0xdc   :  { %vm5292_vm6 = vcmp.ge.s32.totalorder %v3453_v9, 2 }
  0xdd   :  { %2952 = vrot.lane.b32.xlu0 %v2951_v51, %s3292_s10 }
  0xde   :  { %2962 = vrot.lane.b32.xlu1 %v2961_v39, %s3292_s10 }
 0x129   :  { %v2898_v49 = vpop.permute.xlu1 %2897 }
 0x12a   :  { %v2900_v48 = vunpack.i.h.bf16 %v2898_v49  ;;  %v2899_v40 = vunpack.i.l.bf16 %v2898_v49 }
 0x12c   :  { %v1017_v45 = vsel %vm1013_vm9, %v3972_v35, %v2900_v48  ;;  %v1016_v18 = vsel %vm1013_vm9, %v823_v17, %v2899_v40 }
 0x12d   :  { %v2903_v13 = vpop.permute.xlu1 %2902 }
 0x12e   :  { %v2905_v6 = vunpack.i.h.bf16 %v2903_v13  ;;  %v2904_v30 = vunpack.i.l.bf16 %v2903_v13 }
 0x130   :  { %v1033_v8 = vsel %vm1030_vm4, %v1016_v18, %v2904_v30  ;;  %v1034_v24 = vsel %vm1030_vm4, %v1017_v45, %v2905_v6 }
 0x131   :  { %v1048_v37 = vpack.c.bf16 %v1034_v24, %v1033_v8 }
 0x132   :  { %v2888_v36 = vpop.permute.xlu0 %2887 }
 0x133   :  { %v2890_v43 = vunpack.i.h.bf16 %v2888_v36  ;;  %v2889_v12 = vunpack.i.l.bf16 %v2888_v36 }
 0x135   :  { %v1014_v54 = vsel %vm1013_vm9, %v821_v20, %v2889_v12  ;;  %v1015_v35 = vsel %vm1013_vm9, %v819_v61, %v2890_v43  ;;  %v825_v61 = vsel %vm298_vm8, %v3992_v15, 0.0  ;;  %v831_v43 = vsel %vm5292_vm6, %v4051_v47, 0.0 }
 0x136   :  { %v2893_v46 = vpop.permute.xlu0 %2892  ;;  %vm5293_vm6 = vcmp.ge.s32.totalorder %v3457_v11, 2 }
 0x137   :  { %v2895_v59 = vunpack.i.h.bf16 %v2893_v46  ;;  %v2894_v34 = vunpack.i.l.bf16 %v2893_v46 }
 0x139   :  { %v2918_v56 = vpop.permute.xlu1 %2917  ;;  %v1031_v5 = vsel %vm1030_vm4, %v1014_v54, %v2894_v34  ;;  %v1032_v25 = vsel %vm1030_vm4, %v1015_v35, %v2895_v59 }
 0x13a   :  { %v2908_v16 = vpop.permute.xlu0 %2907  ;;  %v2920_v55 = vunpack.i.h.bf16 %v2918_v56  ;;  %v2919_v53 = vunpack.i.l.bf16 %v2918_v56  ;;  %v1047_v26 = vpack.c.bf16 %v1032_v25, %v1031_v5 }
 0x13b   :  { %v2910_v1 = vunpack.i.h.bf16 %v2908_v16  ;;  %v2909_v19 = vunpack.i.l.bf16 %v2908_v16 }
 0x13c   :  { %2803 = vmatprep.mubr.msk.bf16.mxu1 %vm5289_vm0, %v1047_v26  ;;  %v1020_v14 = vsel %vm1013_vm9, %v827_v4, %v2919_v53  ;;  %v1021_v41 = vsel %vm1013_vm9, %v4022_v60, %v2920_v55 }
 0x13d   :  { %v2923_v27 = vpop.permute.xlu1 %2922  ;;  %2804 = vmatmul.mubr.msk.bf16.vlgmr.msra.gmra.mxu1 %vm5289_vm0, %v1048_v37  ;;  %v1019_v40 = vsel %vm1013_vm9, %v3986_v38, %v2910_v1  ;;  %v1018_v13 = vsel %vm1013_vm9, %v825_v61, %v2909_v19  ;;  %v829_v38 = vsel %vm5291_vm10, %v4045_v28, 0.0  ;;  %vm5294_vm10 = vcmp.ge.s32.totalorder %v3455_v10, 2 }
 0x13e   :  { %v2925_v50 = vunpack.i.h.bf16 %v2923_v27  ;;  %v2924_v63 = vunpack.i.l.bf16 %v2923_v27 }
 0x13f   :  { %v2913_v51 = vpop.permute.xlu0 %2912 }
 0x140   :  { %v2915_v39 = vunpack.i.h.bf16 %v2913_v51  ;;  %v2914_v49 = vunpack.i.l.bf16 %v2913_v51  ;;  %v1037_v48 = vsel %vm1030_vm4, %v1020_v14, %v2924_v63  ;;  %v1038_v52 = vsel %vm1030_vm4, %v1021_v41, %v2925_v50 }
 0x141   :  { %v1050_v17 = vpack.c.bf16 %v1038_v52, %v1037_v48  ;;  %v833_v50 = vsel %vm5293_vm6, %v4065_v3, 0.0  ;;  %v835_v63 = vsel %vm5294_vm10, %v4073_v62, 0.0 }
 0x142   :  { %v1035_v15 = vsel %vm1030_vm4, %v1018_v13, %v2914_v49  ;;  %v1036_v6 = vsel %vm1030_vm4, %v1019_v40, %v2915_v39 }
 0x143   :  { %v2928_v30 = vpop.permute.xlu0 %2927  ;;  %v1049_v45 = vpack.c.bf16 %v1036_v6, %v1035_v15 }
 0x144   :  { %v2938_v60 = vpop.permute.xlu1 %2937  ;;  %v2930_v18 = vunpack.i.h.bf16 %v2928_v30  ;;  %v2929_v8 = vunpack.i.l.bf16 %v2928_v30  ;;  %v3248_v30 = vld [vmem:[%s5279_s2 + $0x18] sm:$0xff]  }
 0x145   :  { %2807 = vmatprep.mubr.msk.bf16.mxu1 %vm5289_vm0, %v1049_v45  ;;  %v2940_v24 = vunpack.i.h.bf16 %v2938_v60  ;;  %v2939_v37 = vunpack.i.l.bf16 %v2938_v60  ;;  %v3249_v45 = vld [vmem:[%s5279_s2 + $0x10] sm:$0xff]   ;;  %v1057_v60 = vsub.s32 4, %v3384_v22 }
 0x146   :  { %2808 = vmatmul.mubr.msk.bf16.gmra.mxu1 %vm5289_vm0, %v1050_v17  ;;  %v1023_v34 = vsel %vm1013_vm9, %v4039_v42, %v2930_v18  ;;  %v1022_v20 = vsel %vm1013_vm9, %v829_v38, %v2929_v8 }
 0x147   :  { %v2933_v36 = vpop.permute.xlu0 %2932  ;;  %v1024_v35 = vsel %vm1013_vm9, %v831_v43, %v2939_v37  ;;  %v1025_v5 = vsel %vm1013_vm9, %v4056_v57, %v2940_v24  ;;  %v4165_v24 = vld [vmem:[%s5278_s1] sm:$0xff] }
 0x148   :  { %v2935_v12 = vunpack.i.h.bf16 %v2933_v36  ;;  %v2934_v46 = vunpack.i.l.bf16 %v2933_v36  ;;  %v2943_v59 = vpop.permute.xlu1 %2942  ;;  %v4168_v37 = vrot.slane %v4165_v24, %v1057_v60 }
 0x149   :  { %v2945_v56 = vunpack.i.h.bf16 %v2943_v59  ;;  %v2944_v54 = vunpack.i.l.bf16 %v2943_v59 }
 0x14a   :  { %v1039_v28 = vsel %vm1030_vm4, %v1022_v20, %v2934_v46  ;;  %v1040_v25 = vsel %vm1030_vm4, %v1023_v34, %v2935_v12 }
 0x14b   :  { %v1041_v47 = vsel %vm1030_vm4, %v1024_v35, %v2944_v54  ;;  %v1042_v16 = vsel %vm1030_vm4, %v1025_v5, %v2945_v56  ;;  %v2948_v55 = vpop.permute.xlu0 %2947  ;;  %v1051_v53 = vpack.c.bf16 %v1040_v25, %v1039_v28 }
 0x14c   :  { %v2958_v42 = vpop.permute.xlu1 %2957  ;;  %v1052_v26 = vpack.c.bf16 %v1042_v16, %v1041_v47  ;;  %v2950_v1 = vunpack.i.h.bf16 %v2948_v55  ;;  %v2949_v19 = vunpack.i.l.bf16 %v2948_v55 }
 0x14d   :  { %2811 = vmatprep.mubr.msk.bf16.mxu1 %vm5289_vm0, %v1051_v53  ;;  %v2960_v27 = vunpack.i.h.bf16 %v2958_v42  ;;  %v2959_v4 = vunpack.i.l.bf16 %v2958_v42 }
 0x14e   :  { %2812 = vmatmul.mubr.msk.bf16.gmra.mxu1 %vm5289_vm0, %v1052_v26  ;;  %v1027_v51 = vsel %vm1013_vm9, %v4060_v32, %v2950_v1  ;;  %v1026_v39 = vsel %vm1013_vm9, %v833_v50, %v2949_v19  ;;  %v3246_v32 = vld [vmem:[%s5279_s2 + $0x28] sm:$0xff]  }
 0x14f   :  { %v2953_v57 = vpop.permute.xlu0 %2952  ;;  %v1029_v52 = vsel %vm1013_vm9, %v4069_v58, %v2960_v27  ;;  %v1028_v40 = vsel %vm1013_vm9, %v835_v63, %v2959_v4  ;;  %1543 = vrot.lane.b32.xlu0 %v3246_v32, %s3293_s13  ;;  %v3247_v58 = vld [vmem:[%s5279_s2 + $0x20] sm:$0xff]  }
 0x150   :  { %v2955_v61 = vunpack.i.h.bf16 %v2953_v57  ;;  %v2954_v14 = vunpack.i.l.bf16 %v2953_v57  ;;  %v2963_v41 = vpop.permute.xlu1 %2962  ;;  %1541 = vrot.lane.b32.xlu1 %v3247_v58, %s3293_s13 }
 0x151   :  { %v2965_v49 = vunpack.i.h.bf16 %v2963_v41  ;;  %v2964_v48 = vunpack.i.l.bf16 %v2963_v41 }
 0x152   :  { %v1043_v3 = vsel %vm1030_vm4, %v1026_v39, %v2954_v14  ;;  %v1044_v13 = vsel %vm1030_vm4, %v1027_v51, %v2955_v61 }
 0x153   :  { %v1045_v62 = vsel %vm1030_vm4, %v1028_v40, %v2964_v48  ;;  %v1046_v17 = vsel %vm1030_vm4, %v1029_v52, %v2965_v49  ;;  %v1053_v15 = vpack.c.bf16 %v1044_v13, %v1043_v3  ;;  %1539 = vrot.lane.b32.xlu0 %v3248_v30, %s3293_s13 }
 0x154   :  { %v1054_v6 = vpack.c.bf16 %v1046_v17, %v1045_v62  ;;  %1537 = vrot.lane.b32.xlu1 %v3249_v45, %s3293_s13 }
 0x155   :  { %2815 = vmatprep.mubr.msk.bf16.mxu1 %vm5289_vm0, %v1053_v15 }
 0x156   :  { %2816 = vmatmul.mubr.msk.bf16.gmra.mxu1 %vm5289_vm0, %v1054_v6 }
 0x157   :  { %1535 = vrot.lane.b32.xlu0 %v3809_v33, %s3293_s13 }
 0x15b   :  { %1533 = vrot.lane.b32.xlu0 %v3842_v23, %s3293_s13 }
 0x1c1   :  { %v1544_v18 = vpop.permute.xlu0 %1543 }
 0x1c2   :  { %2819 = vmatprep.subr.bf16.mxu1 %v1544_v18  ;;  %v1542_v8 = vpop.permute.xlu1 %1541 }
 0x1c3   :  { %2820 = vmatpush3.bf16.msra.mxu1 %v1544_v18 }
 0x1c4   :  { %2821 = vmatprep.subr.bf16.mxu1 %v1542_v8 }
 0x1c5   :  { %v1540_v36 = vpop.permute.xlu0 %1539 }
 0x1c6   :  { %v1538_v12 = vpop.permute.xlu1 %1537 }
 0x1c7   :  { %2822 = vmatpush3.bf16.msra.mxu1 %v1542_v8 }
 0x1c8   :  { %2823 = vmatprep.subr.bf16.mxu1 %v1540_v36 }
 0x1c9   :  { %v1536_v20 = vpop.permute.xlu0 %1535 }
 0x1cb   :  { %2824 = vmatpush3.bf16.msra.mxu1 %v1540_v36 }
 0x1cc   :  { %2825 = vmatprep.subr.bf16.mxu1 %v1538_v12 }
 0x1cd   :  { %v1534_v1 = vpop.permute.xlu0 %1533 }
 0x1cf   :  { %2826 = vmatpush3.bf16.msra.mxu1 %v1538_v12 }
 0x1d0   :  { %2827 = vmatprep.subr.bf16.mxu1 %v1536_v20 }
 0x1d3   :  { %2828 = vmatpush3.bf16.msra.mxu1 %v1536_v20 }
 0x1d4   :  { %2829 = vmatprep.subr.bf16.mxu1 %v1534_v1 }
 0x1d7   :  { %2830 = vmatpush3.bf16.msra.mxu1 %v1534_v1 }
 0x1fd   :  { %v2805_v33 = vpop.f32.mrf.mxu1 }
 0x1fe   :  { %v1163_v23 = vadd.f32 %v2805_v33, %v4168_v37 }
 0x1ff   :  { %v1154_v38 = vpop.f32.mrf.mxu1 }
 0x200   :  { %v1155_v43 = vadd.f32 %v1154_v38, %v4168_v37  ;;  %v1235_v59 = vmul.f32 0.01, %v1163_v23  ;;  %vm1219_vm6 = vcmp.gt.f32.partialorder %v1163_v23, 0.0 }
 0x201   :  { %v2806_v46 = vpop.f32.mrf.mxu1 }
 0x202   :  { %v1166_v34 = vadd.f32 %v2806_v46, %v4168_v37  ;;  %v1233_v54 = vmul.f32 0.01, %v1155_v43  ;;  %vm1217_vm0 = vcmp.gt.f32.partialorder %v1155_v43, 0.0  ;;  %v4174_v25 = vsel %vm1219_vm6, %v1163_v23, %v1235_v59 }
 0x203   :  { %v1157_v56 = vpop.f32.mrf.mxu1  ;;  %v1315_v19 = vrot.slane %v4174_v25, 7  ;;  %v1267_v14 = vrot.slane %v4174_v25, 6 }
 0x204   :  { %vm1220_vm10 = vcmp.gt.f32.partialorder %v1166_v34, 0.0  ;;  %v1236_v35 = vmul.f32 0.01, %v1166_v34  ;;  %v1158_v5 = vadd.f32 %v1157_v56, %v4168_v37  ;;  %v4178_v53 = vsel %vm1217_vm0, %v1155_v43, %v1233_v54 }
 0x205   :  { %v1265_v56 = vrot.slane %v4178_v53, 6  ;;  %v1313_v1 = vrot.slane %v4178_v53, 7 }
 0x206   :  { %v2809_v28 = vpop.f32.mrf.mxu1  ;;  %v4176_v47 = vsel %vm1220_vm10, %v1166_v34, %v1236_v35  ;;  %vm1218_vm5 = vcmp.gt.f32.partialorder %v1158_v5, 0.0  ;;  %v1234_v16 = vmul.f32 0.01, %v1158_v5 }
 0x207   :  { %v1268_v27 = vrot.slane %v4176_v47, 6  ;;  %v1316_v63 = vrot.slane %v4176_v47, 7  ;;  %v1179_v49 = vadd.f32 %v2809_v28, %v4168_v37 }
 0x208   :  { %v1170_v55 = vpop.f32.mrf.mxu1  ;;  %v4180_v42 = vsel %vm1218_vm5, %v1158_v5, %v1234_v16  ;;  %vm5295_vm5 = vcmp.ge.s32.totalorder %v3401_v31, 1 }
 0x209   :  { %v1171_v26 = vadd.f32 %v1170_v55, %v4168_v37  ;;  %v1314_v4 = vrot.slane %v4180_v42, 7  ;;  %v2966_v50 = vpack.i.bf16 %v4180_v42, %v4178_v53  ;;  %v4209_v62 = vsel %vm555_vm1, %v1267_v14, %v1268_v27 }
 0x20a   :  { %v2810_v57 = vpop.f32.mrf.mxu1  ;;  %v1341_v15 = vsel %vm640_vm2, %v1315_v19, %v1316_v63  ;;  %v1239_v30 = vmul.f32 0.01, %v1179_v49 }
 0x20b   :  { %vm1221_vm0 = vcmp.gt.f32.partialorder %v1171_v26, 0.0  ;;  %v1237_v61 = vmul.f32 0.01, %v1171_v26  ;;  %v1182_v41 = vadd.f32 %v2810_v57, %v4168_v37  ;;  %2967 = vrot.lane.b32.xlu1 %v2966_v50, %s3292_s10  ;;  %v1342_v39 = vsel %vm640_vm2, %v1314_v4, %v1315_v19 }
 0x20c   :  { %v1173_v51 = vpop.f32.mrf.mxu1  ;;  %v1347_v13 = vsel %vm5295_vm5, %v1342_v39, 0.0  ;;  %v1266_v19 = vrot.slane %v4180_v42, 6 }
 0x20d   :  { %v4197_v48 = vsel %vm1221_vm0, %v1171_v26, %v1237_v61  ;;  %v1174_v52 = vadd.f32 %v1173_v51, %v4168_v37  ;;  %v1240_v6 = vmul.f32 0.01, %v1182_v41  ;;  %v2971_v58 = vpack.i.bf16 %v1341_v15, %v1347_v13 }
 0x20e   :  { %v1317_v40 = vrot.slane %v4197_v48, 7  ;;  %v2813_v3 = vpop.f32.mrf.mxu1  ;;  %vm1224_vm10 = vcmp.gt.f32.partialorder %v1182_v41, 0.0  ;;  %vm1223_vm0 = vcmp.gt.f32.partialorder %v1179_v49, 0.0 }
 0x20f   :  { %vm1222_vm6 = vcmp.gt.f32.partialorder %v1174_v52, 0.0  ;;  %v1238_v17 = vmul.f32 0.01, %v1174_v52  ;;  %2972 = vrot.lane.b32.xlu0 %v2971_v58, %s3291_s7  ;;  %v4221_v38 = vsel %vm1224_vm10, %v1182_v41, %v1240_v6  ;;  %v4227_v46 = vsel %vm1223_vm0, %v1179_v49, %v1239_v30 }
 0x210   :  { %v1186_v32 = vpop.f32.mrf.mxu1  ;;  %v1340_v36 = vsel %vm640_vm2, %v1316_v63, %v1317_v40  ;;  %v1195_v54 = vadd.f32 %v2813_v3, %v4168_v37  ;;  %v1320_v16 = vrot.slane %v4221_v38, 7  ;;  %v1271_v57 = vrot.slane %v4227_v46, 6 }
 0x211   :  { %v4213_v45 = vsel %vm1222_vm6, %v1174_v52, %v1238_v17  ;;  %v1187_v60 = vadd.f32 %v1186_v32, %v4168_v37  ;;  %v1349_v20 = vsel %vm250_vm15, %v1340_v36, 0.0  ;;  %v1319_v63 = vrot.slane %v4227_v46, 7 }
 0x212   :  { %v1318_v18 = vrot.slane %v4213_v45, 7  ;;  %v2814_v8 = vpop.f32.mrf.mxu1  ;;  %vm1227_vm0 = vcmp.gt.f32.partialorder %v1195_v54, 0.0  ;;  %v2996_v52 = vpack.i.bf16 %v4213_v45, %v4197_v48  ;;  %v1243_v15 = vmul.f32 0.01, %v1195_v54 }
 0x213   :  { %vm1225_vm5 = vcmp.gt.f32.partialorder %v1187_v60, 0.0  ;;  %v1241_v33 = vmul.f32 0.01, %v1187_v60  ;;  %v1198_v23 = vadd.f32 %v2814_v8, %v4168_v37  ;;  %v1269_v36 = vrot.slane %v4197_v48, 6 }
 0x214   :  { %v1189_v43 = vpop.f32.mrf.mxu1  ;;  %v1339_v12 = vsel %vm640_vm2, %v1317_v40, %v1318_v18  ;;  %v1343_v40 = vsel %vm640_vm2, %v1313_v1, %v1314_v4 }
 0x215   :  { %v4229_v59 = vsel %vm1225_vm5, %v1187_v60, %v1241_v33  ;;  %v1190_v34 = vadd.f32 %v1189_v43, %v4168_v37  ;;  %v2986_v28 = vpack.i.bf16 %v1339_v12, %v1349_v20  ;;  %v1244_v55 = vmul.f32 0.01, %v1198_v23 }
 0x216   :  { %v1321_v35 = vrot.slane %v4229_v59, 7  ;;  %v2817_v5 = vpop.f32.mrf.mxu1  ;;  %vm1228_vm10 = vcmp.gt.f32.partialorder %v1198_v23, 0.0  ;;  %v1272_v12 = vrot.slane %v4221_v38, 6  ;;  %v1273_v48 = vrot.slane %v4229_v59, 6 }
 0x217   :  { %vm1226_vm6 = vcmp.gt.f32.partialorder %v1190_v34, 0.0  ;;  %v1242_v26 = vmul.f32 0.01, %v1190_v34  ;;  %2987 = vrot.lane.b32.xlu0 %v2986_v28, %s3291_s7  ;;  %v4257_v3 = vsel %vm1228_vm10, %v1198_v23, %v1244_v55  ;;  %v1211_v6 = vadd.f32 %v2817_v5, %v4168_v37 }
 0x218   :  { %v1202_v50 = vpop.f32.mrf.mxu1  ;;  %v1336_v51 = vsel %vm640_vm2, %v1320_v16, %v1321_v35  ;;  %v1324_v33 = vrot.slane %v4257_v3, 7  ;;  %v4276_v5 = vsel %vm1227_vm0, %v1195_v54, %v1243_v15  ;;  %vm5296_vm0 = vcmp.ge.s32.totalorder %v3449_v7, 2 }
 0x219   :  { %v4243_v61 = vsel %vm1226_vm6, %v1190_v34, %v1242_v26  ;;  %v1203_v41 = vadd.f32 %v1202_v50, %v4168_v37  ;;  %v1353_v4 = vsel %vm254_vm14, %v1336_v51, 0.0  ;;  %v1247_v55 = vmul.f32 0.01, %v1211_v6 }
 0x21a   :  { %v1322_v39 = vrot.slane %v4243_v61, 7  ;;  %v2818_v49 = vpop.f32.mrf.mxu1  ;;  %v1274_v50 = vrot.slane %v4243_v61, 6  ;;  %v3016_v54 = vpack.i.bf16 %v4243_v61, %v4229_v59 }
 0x21b   :  { %vm1229_vm5 = vcmp.gt.f32.partialorder %v1203_v41, 0.0  ;;  %v1245_v13 = vmul.f32 0.01, %v1203_v41  ;;  %v1214_v17 = vadd.f32 %v2818_v49, %v4168_v37  ;;  %2997 = vrot.lane.b32.xlu0 %v2996_v52, %s3292_s10 }
 0x21c   :  { %v1205_v32 = vpop.f32.mrf.mxu1  ;;  %v1335_v58 = vsel %vm640_vm2, %v1321_v35, %v1322_v39  ;;  %v1270_v35 = vrot.slane %v4213_v45, 6  ;;  %v2981_v45 = vpack.i.bf16 %v4176_v47, %v4174_v25  ;;  %v4357_v47 = vsel %vm555_vm1, %v1271_v57, %v1272_v12 }
 0x21d   :  { %v1261_v30 = vsel %vm1229_vm5, %v1203_v41, %v1245_v13  ;;  %vm1232_vm6 = vcmp.gt.f32.partialorder %v1214_v17, 0.0  ;;  %v1248_v60 = vmul.f32 0.01, %v1214_v17  ;;  %v1206_v8 = vadd.f32 %v1205_v32, %v4168_v37 }
 0x21e   :  { %v1325_v23 = vrot.slane %v1261_v30, 7  ;;  %v3006_v43 = vpack.i.bf16 %v1335_v58, %v1353_v4  ;;  %vm1231_vm5 = vcmp.gt.f32.partialorder %v1211_v6, 0.0  ;;  %v1277_v49 = vrot.slane %v1261_v30, 6 }
 0x21f   :  { %v4272_v34 = vsel %vm1232_vm6, %v1214_v17, %v1248_v60  ;;  %vm1230_vm10 = vcmp.gt.f32.partialorder %v1206_v8, 0.0  ;;  %v1246_v20 = vmul.f32 0.01, %v1206_v8  ;;  %v1276_v58 = vrot.slane %v4257_v3, 6 }
 0x220   :  { %v1328_v28 = vrot.slane %v4272_v34, 7  ;;  %3007 = vrot.lane.b32.xlu0 %v3006_v43, %s3291_s7  ;;  %v1332_v37 = vsel %vm640_vm2, %v1324_v33, %v1325_v23  ;;  %v1280_v52 = vrot.slane %v4272_v34, 6  ;;  %v1263_v4 = vsel %vm1231_vm5, %v1211_v6, %v1247_v55 }
 0x221   :  { %v1262_v26 = vsel %vm1230_vm10, %v1206_v8, %v1246_v20  ;;  %v1357_v17 = vsel %vm258_vm3, %v1332_v37, 0.0  ;;  %v1291_v8 = vsel %vm555_vm1, %v1269_v36, %v1270_v35  ;;  %v4325_v6 = vsel %vm555_vm1, %v1273_v48, %v1274_v50 }
 0x222   :  { %v1326_v41 = vrot.slane %v1262_v26, 7  ;;  %v1344_v51 = vsel %vm640_vm2, %v1328_v28, %v1313_v1  ;;  %v1278_v15 = vrot.slane %v1262_v26, 6  ;;  %v4306_v1 = vsel %vm555_vm1, %v1266_v19, %v1267_v14 }
 0x223   :  { %v1345_v13 = vsel %vm246_vm7, %v1344_v51, 0.0  ;;  %v1292_v14 = vsel %vm555_vm1, %v1268_v27, %v1269_v36  ;;  %v1275_v43 = vrot.slane %v4276_v5, 6  ;;  %v1296_v27 = vsel %vm555_vm1, %v1280_v52, %v1265_v56 }
 0x224   :  { %3017 = vrot.lane.b32.xlu0 %v3016_v54, %s3292_s10  ;;  %v2976_v32 = vpack.i.bf16 %v1343_v40, %v1345_v13  ;;  %v1331_v59 = vsel %vm640_vm2, %v1325_v23, %v1326_v41  ;;  %v1338_v40 = vsel %vm640_vm2, %v1318_v18, %v1319_v63  ;;  %v1288_v23 = vsel %vm555_vm1, %v1272_v12, %v1273_v48 }
 0x225   :  { %v3026_v60 = vpack.i.bf16 %v1331_v59, %v1357_v17  ;;  %v4338_v18 = vsel %vm555_vm1, %v1265_v56, %v1266_v19  ;;  %v1279_v36 = vrot.slane %v1263_v4, 6  ;;  %v4347_v20 = vsel %vm555_vm1, %v1277_v49, %v1278_v15 }
 0x226   :  { %2977 = vrot.lane.b32.xlu1 %v2976_v32, %s3291_s7  ;;  %v4351_v25 = vsel %vm555_vm1, %v1276_v58, %v1277_v49  ;;  %v1351_v53 = vsel %vm252_vm13, %v1338_v40, 0.0  ;;  %v4365_v42 = vsel %vm555_vm1, %v1270_v35, %v1271_v57  ;;  %v4369_v56 = vsel %vm555_vm1, %v1275_v43, %v1276_v58 }
 0x227   :  { %v4373_v19 = vsel %vm555_vm1, %v1274_v50, %v1275_v43  ;;  %v3031_v12 = vpack.i.bf16 %v1262_v26, %v1261_v30  ;;  %v4378_v37 = vsel %vm555_vm1, %v1279_v36, %v1280_v52  ;;  %v4382_v48 = vsel %vm555_vm1, %v1278_v15, %v1279_v36 }
 0x228   :  { %3027 = vrot.lane.b32.xlu0 %v3026_v60, %s3291_s7  ;;  %v1337_v57 = vsel %vm640_vm2, %v1319_v63, %v1320_v16  ;;  %v1323_v35 = vrot.slane %v4276_v5, 7  ;;  %v3001_v26 = vpack.i.bf16 %v4221_v38, %v4227_v46  ;;  %v1327_v63 = vrot.slane %v1263_v4, 7 }
 0x229   :  { %v2991_v30 = vpack.i.bf16 %v1337_v57, %v1351_v53  ;;  %v3021_v38 = vpack.i.bf16 %v4257_v3, %v4276_v5  ;;  %v3041_v51 = vpack.i.bf16 %v4272_v34, %v1263_v4  ;;  %v1301_v13 = vsel %vm298_vm8, %v1292_v14, 0.0 }
 0x22a   :  { %2982 = vrot.lane.b32.xlu1 %v2981_v45, %s3292_s10  ;;  %v1334_v55 = vsel %vm640_vm2, %v1322_v39, %v1323_v35  ;;  %v1333_v16 = vsel %vm640_vm2, %v1323_v35, %v1324_v33  ;;  %v1330_v61 = vsel %vm640_vm2, %v1326_v41, %v1327_v63  ;;  %v1329_v39 = vsel %vm640_vm2, %v1327_v63, %v1328_v28 }
 0x22b   :  { %v1355_v50 = vsel %vm256_vm12, %v1334_v55, 0.0  ;;  %v1359_v46 = vsel %vm260_vm11, %v1330_v61, 0.0  ;;  %v1305_v36 = vsel %vm5296_vm0, %v1288_v23, 0.0  ;;  %vm5297_vm6 = vcmp.ge.s32.totalorder %v3395_v29, 2 }
 0x22c   :  { %3032 = vrot.lane.b32.xlu0 %v3031_v12, %s3292_s10  ;;  %v3011_v54 = vpack.i.bf16 %v1333_v16, %v1355_v50  ;;  %v3036_v33 = vpack.i.bf16 %v1329_v39, %v1359_v46  ;;  %vm5298_vm10 = vcmp.ge.s32.totalorder %v3401_v31, 2  ;;  %vm5299_vm5 = vcmp.ge.s32.totalorder %v3457_v11, 2 }
 0x22d   :  { %vm5300_vm0 = vcmask 785408  }
 0x22e   :  { %2992 = vrot.lane.b32.xlu1 %v2991_v30, %s3291_s7  ;;  %v1297_v30 = vsel %vm5297_vm6, %v1296_v27, 0.0  ;;  %vm5301_vm6 = vmmov %vm5300_vm0 }
 0x232   :  { %3002 = vrot.lane.b32.xlu1 %v3001_v26, %s3292_s10 }
 0x236   :  { %3012 = vrot.lane.b32.xlu1 %v3011_v54, %s3291_s7 }
 0x23a   :  { %3022 = vrot.lane.b32.xlu1 %v3021_v38, %s3292_s10 }
 0x23e   :  { %3037 = vrot.lane.b32.xlu1 %v3036_v33, %s3291_s7 }
 0x242   :  { %3042 = vrot.lane.b32.xlu1 %v3041_v51, %s3292_s10 }
 0x27d   :  { %v2968_v60 = vpop.permute.xlu1 %2967 }
 0x27e   :  { %v2970_v12 = vunpack.i.h.bf16 %v2968_v60  ;;  %v2969_v63 = vunpack.i.l.bf16 %v2968_v60 }
 0x281   :  { %v2973_v41 = vpop.permute.xlu0 %2972 }
 0x282   :  { %v2975_v23 = vunpack.i.h.bf16 %v2973_v41  ;;  %v2974_v54 = vunpack.i.l.bf16 %v2973_v41 }
 0x289   :  { %v2988_v49 = vpop.permute.xlu0 %2987 }
 0x28a   :  { %v2990_v3 = vunpack.i.h.bf16 %v2988_v49  ;;  %v2989_v5 = vunpack.i.l.bf16 %v2988_v49 }
 0x28c   :  { %v1494_v32 = vsel %vm1013_vm9, %v1291_v8, %v2990_v3  ;;  %v1493_v28 = vsel %vm1013_vm9, %v1301_v13, %v2989_v5  ;;  %v1299_v3 = vsel %vm5298_vm10, %v4306_v1, 0.0  ;;  %vm5302_vm10 = vmmov %vm5300_vm0 }
 0x28d   :  { %v2998_v52 = vpop.permute.xlu0 %2997  ;;  %v1491_v13 = vsel %vm1013_vm9, %v1299_v3, %v2974_v54 }
 0x28e   :  { %v3000_v17 = vunpack.i.h.bf16 %v2998_v52  ;;  %v2999_v15 = vunpack.i.l.bf16 %v2998_v52  ;;  %v1492_v52 = vsel %vm1013_vm9, %v4209_v62, %v2975_v23 }
 0x290   :  { %v1509_v59 = vsel %vm1030_vm4, %v1493_v28, %v2999_v15  ;;  %v1510_v34 = vsel %vm1030_vm4, %v1494_v32, %v3000_v17 }
 0x291   :  { %v1523_v58 = vpack.c.bf16 %v1510_v34, %v1509_v59 }
 0x292   :  { %v3008_v4 = vpop.permute.xlu0 %3007 }
 0x293   :  { %v3010_v40 = vunpack.i.h.bf16 %v3008_v4  ;;  %v3009_v43 = vunpack.i.l.bf16 %v3008_v4 }
 0x295   :  { %v1498_v8 = vsel %vm1013_vm9, %v4325_v6, %v3010_v40  ;;  %v1497_v57 = vsel %vm1013_vm9, %v1305_v36, %v3009_v43 }
 0x296   :  { %v3018_v45 = vpop.permute.xlu0 %3017 }
 0x297   :  { %v3020_v14 = vunpack.i.h.bf16 %v3018_v45  ;;  %v3019_v53 = vunpack.i.l.bf16 %v3018_v45 }
 0x298   :  { %v2978_v35 = vpop.permute.xlu1 %2977 }
 0x299   :  { %v1513_v55 = vsel %vm1030_vm4, %v1497_v57, %v3019_v53  ;;  %v1514_v26 = vsel %vm1030_vm4, %v1498_v8, %v3020_v14  ;;  %v2980_v50 = vunpack.i.h.bf16 %v2978_v35  ;;  %v2979_v16 = vunpack.i.l.bf16 %v2978_v35 }
 0x29a   :  { %v1525_v61 = vpack.c.bf16 %v1514_v26, %v1513_v55  ;;  %v3028_v38 = vpop.permute.xlu0 %3027 }
 0x29b   :  { %v1489_v46 = vsel %vm1013_vm9, %v1297_v30, %v2979_v16  ;;  %v1490_v6 = vsel %vm1013_vm9, %v4338_v18, %v2980_v50  ;;  %v3030_v39 = vunpack.i.h.bf16 %v3028_v38  ;;  %v3029_v33 = vunpack.i.l.bf16 %v3028_v38 }
 0x29c   :  { %v2983_v51 = vpop.permute.xlu1 %2982  ;;  %v1505_v27 = vsel %vm1030_vm4, %v1489_v46, %v2969_v63  ;;  %v1506_v49 = vsel %vm1030_vm4, %v1490_v6, %v2970_v12  ;;  %v1309_v18 = vsel %vm5299_vm5, %v4351_v25, 0.0  ;;  %vm5303_vm5 = vcmp.ge.s32.totalorder %v3439_v0, 2 }
 0x29d   :  { %v2985_v5 = vunpack.i.h.bf16 %v2983_v51  ;;  %v2984_v41 = vunpack.i.l.bf16 %v2983_v51  ;;  %v1521_v15 = vpack.c.bf16 %v1506_v49, %v1505_v27  ;;  %v1502_v1 = vsel %vm1013_vm9, %v4347_v20, %v3030_v39 }
 0x29e   :  { %v3033_v17 = vpop.permute.xlu0 %3032  ;;  %v1501_v4 = vsel %vm1013_vm9, %v1309_v18, %v3029_v33  ;;  %v1303_v20 = vsel %vm5303_vm5, %v4365_v42, 0.0  ;;  %vm5306_vm5 = vmmov %vm5300_vm0 }
 0x29f   :  { %v1508_v32 = vsel %vm1030_vm4, %v1492_v52, %v2985_v5  ;;  %v1507_v28 = vsel %vm1030_vm4, %v1491_v13, %v2984_v41  ;;  %v3035_v59 = vunpack.i.h.bf16 %v3033_v17  ;;  %v3034_v34 = vunpack.i.l.bf16 %v3033_v17  ;;  %2831 = vmatprep.mubr.msk.bf16.mxu1 %vm5300_vm0, %v1521_v15 }
 0x2a0   :  { %v1522_v62 = vpack.c.bf16 %v1508_v32, %v1507_v28  ;;  %v2993_v60 = vpop.permute.xlu1 %2992  ;;  %v1531_v13 = vsub.s32 5, %v3384_v22 }
 0x2a1   :  { %v1517_v40 = vsel %vm1030_vm4, %v1501_v4, %v3034_v34  ;;  %v1518_v25 = vsel %vm1030_vm4, %v1502_v1, %v3035_v59  ;;  %v2995_v45 = vunpack.i.h.bf16 %v2993_v60  ;;  %v2994_v36 = vunpack.i.l.bf16 %v2993_v60 }
 0x2a2   :  { %v1527_v43 = vpack.c.bf16 %v1518_v25, %v1517_v40  ;;  %2832 = vmatmul.mubr.msk.bf16.vlgmr.msra.gmra.mxu1 %vm5301_vm6, %v1522_v62  ;;  %vm5304_vm6 = vmmov %vm5300_vm0  ;;  %v4491_v17 = vrot.slane %v4165_v24, %v1531_v13  ;;  %v3132_v24 = vld [vmem:[%s5280_s3 + $0x54] ss:$8 sps:$4 sm:$0xff]   ;;  %v3134_v25 = vld [vmem:[%s5280_s3 + $0x50] ss:$8 sps:$4 sm:$0xff]  }
 0x2a3   :  { %2835 = vmatprep.mubr.msk.bf16.mxu1 %vm5302_vm10, %v1523_v58  ;;  %v1496_v8 = vsel %vm1013_vm9, %v4357_v47, %v2995_v45  ;;  %v1495_v57 = vsel %vm1013_vm9, %v1303_v20, %v2994_v36  ;;  %vm5305_vm10 = vcmp.ge.s32.totalorder %v3453_v9, 2  ;;  %2092 = vmatprep.subr.bf16.mxu0 %v3132_v24  ;;  %v3252_v13 = vld [vmem:[%s5277_s0 + $0x10] sm:$0xff] }
 0x2a4   :  { %v3003_v14 = vpop.permute.xlu1 %3002  ;;  %v1307_v16 = vsel %vm5305_vm10, %v4373_v19, 0.0  ;;  %vm5308_vm10 = vmmov %vm5300_vm0  ;;  %2093 = vmatpush1.bf16.msra.mxu0 %v3134_v25 }
 0x2a5   :  { %v3005_v53 = vunpack.i.h.bf16 %v3003_v14  ;;  %v3004_v12 = vunpack.i.l.bf16 %v3003_v14 }
 0x2a7   :  { %v1511_v35 = vsel %vm1030_vm4, %v1495_v57, %v3004_v12  ;;  %v1512_v30 = vsel %vm1030_vm4, %v1496_v8, %v3005_v53 }
 0x2a8   :  { %v1524_v55 = vpack.c.bf16 %v1512_v30, %v1511_v35  ;;  %v3013_v26 = vpop.permute.xlu1 %3012  ;;  %v3135_v35 = vld [vmem:[%s5280_s3 + $0x44] ss:$8 sps:$4 sm:$0xff]  }
 0x2a9   :  { %v3015_v50 = vunpack.i.h.bf16 %v3013_v26  ;;  %v3014_v58 = vunpack.i.l.bf16 %v3013_v26  ;;  %v3137_v26 = vld [vmem:[%s5280_s3 + $0x40] ss:$8 sps:$4 sm:$0xff]   ;;  %2094 = vmatprep.subr.bf16.mxu0 %v3135_v35  ;;  %v3146_v35 = vld [vmem:[%s5280_s3 + $0x10] ss:$8 sps:$4 sm:$0xff]  }
 0x2aa   :  { %2836 = vmatmul.mubr.msk.bf16.gmra.mxu1 %vm5300_vm0, %v1524_v55  ;;  %2095 = vmatpush1.bf16.msra.mxu0 %v3137_v26 }
 0x2ab   :  { %2839 = vmatprep.mubr.msk.bf16.mxu1 %vm5304_vm6, %v1525_v61  ;;  %v1500_v23 = vsel %vm1013_vm9, %v4369_v56, %v3015_v50  ;;  %v1499_v54 = vsel %vm1013_vm9, %v1307_v16, %v3014_v58  ;;  %vm5307_vm6 = vcmp.ge.s32.totalorder %v3455_v10, 2 }
 0x2ac   :  { %v3023_v42 = vpop.permute.xlu1 %3022  ;;  %v1311_v51 = vsel %vm5307_vm6, %v4382_v48, 0.0 }
 0x2ad   :  { %v3025_v47 = vunpack.i.h.bf16 %v3023_v42  ;;  %v3024_v63 = vunpack.i.l.bf16 %v3023_v42 }
 0x2af   :  { %v1515_v38 = vsel %vm1030_vm4, %v1499_v54, %v3024_v63  ;;  %v1516_v46 = vsel %vm1030_vm4, %v1500_v23, %v3025_v47 }
 0x2b0   :  { %v1526_v6 = vpack.c.bf16 %v1516_v46, %v1515_v38  ;;  %v3038_v39 = vpop.permute.xlu1 %3037  ;;  %v3138_v46 = vld [vmem:[%s5280_s3 + $0x34] ss:$8 sps:$4 sm:$0xff]  }
 0x2b1   :  { %v3040_v33 = vunpack.i.h.bf16 %v3038_v39  ;;  %v3039_v61 = vunpack.i.l.bf16 %v3038_v39  ;;  %v3140_v39 = vld [vmem:[%s5280_s3 + $0x30] ss:$8 sps:$4 sm:$0xff]   ;;  %2096 = vmatprep.subr.bf16.mxu0 %v3138_v46 }
 0x2b2   :  { %2840 = vmatmul.mubr.msk.bf16.gmra.mxu1 %vm5306_vm5, %v1526_v6  ;;  %2097 = vmatpush1.bf16.msra.mxu0 %v3140_v39 }
 0x2b3   :  { %2843 = vmatprep.mubr.msk.bf16.mxu1 %vm5300_vm0, %v1527_v43  ;;  %v1504_v49 = vsel %vm1013_vm9, %v4378_v37, %v3040_v33  ;;  %v1503_v3 = vsel %vm1013_vm9, %v1311_v51, %v3039_v61 }
 0x2b4   :  { %v3043_v19 = vpop.permute.xlu1 %3042 }
 0x2b5   :  { %v3045_v56 = vunpack.i.h.bf16 %v3043_v19  ;;  %v3044_v27 = vunpack.i.l.bf16 %v3043_v19 }
 0x2b7   :  { %v1519_v5 = vsel %vm1030_vm4, %v1503_v3, %v3044_v27  ;;  %v1520_v41 = vsel %vm1030_vm4, %v1504_v49, %v3045_v56  ;;  %v3251_v56 = vld [vmem:[%s5277_s0] sm:$0xff] }
 0x2b8   :  { %v1528_v52 = vpack.c.bf16 %v1520_v41, %v1519_v5  ;;  %v2201_v27 = vmul.f32 255.0, %v3251_v56 }
 0x2ba   :  { %2844 = vmatmul.mubr.msk.bf16.gmra.mxu1 %vm5308_vm10, %v1528_v52  ;;  %v3141_v52 = vld [vmem:[%s5280_s3 + $0x24] ss:$8 sps:$4 sm:$0xff]  }
 0x2bb   :  { %2098 = vmatprep.subr.bf16.mxu0 %v3141_v52 }
 0x362   :  { %v2833_v18 = vpop.f32.mrf.mxu1 }
 0x363   :  { %v1618_v59 = vadd.f32 %v2833_v18, %v4491_v17  ;;  %v4562_v18 = vmul.f32 255.0, %v3252_v13 }
 0x364   :  { %v1609_v48 = vpop.f32.mrf.mxu1 }
 0x365   :  { %v1610_v15 = vadd.f32 %v1609_v48, %v4491_v17  ;;  %v1690_v43 = vmul.f32 0.01, %v1618_v59  ;;  %vm1674_vm10 = vcmp.gt.f32.partialorder %v1618_v59, 0.0 }
 0x366   :  { %v2834_v32 = vpop.f32.mrf.mxu1 }
 0x367   :  { %v1621_v37 = vadd.f32 %v2834_v32, %v4491_v17  ;;  %v1688_v34 = vmul.f32 0.01, %v1610_v15  ;;  %vm1672_vm5 = vcmp.gt.f32.partialorder %v1610_v15, 0.0  ;;  %v4522_v50 = vsel %vm1674_vm10, %v1618_v59, %v1690_v43  ;;  %v3143_v32 = vld [vmem:[%s5280_s3 + $0x20] ss:$8 sps:$4 sm:$0xff]  }
 0x368   :  { %v1612_v28 = vpop.f32.mrf.mxu1  ;;  %2099 = vmatpush1.bf16.msra.mxu0 %v3143_v32  ;;  %v3144_v43 = vld [vmem:[%s5280_s3 + $0x14] ss:$8 sps:$4 sm:$0xff]  }
 0x369   :  { %v1613_v1 = vadd.f32 %v1612_v28, %v4491_v17  ;;  %v1691_v4 = vmul.f32 0.01, %v1621_v37  ;;  %vm1675_vm6 = vcmp.gt.f32.partialorder %v1621_v37, 0.0  ;;  %v4503_v45 = vsel %vm1672_vm5, %v1610_v15, %v1688_v34  ;;  %2100 = vmatprep.subr.bf16.mxu0 %v3144_v43 }
 0x36a   :  { %v2837_v62 = vpop.f32.mrf.mxu1  ;;  %v1720_v30 = vrot.slane %v4503_v45, 6 }
 0x36b   :  { %vm1673_vm0 = vcmp.gt.f32.partialorder %v1613_v1, 0.0  ;;  %v1689_v60 = vmul.f32 0.01, %v1613_v1  ;;  %v4511_v8 = vsel %vm1675_vm6, %v1621_v37, %v1691_v4  ;;  %v1634_v58 = vadd.f32 %v2837_v62, %v4491_v17  ;;  %v3253_v37 = vld [vmem:[%s5277_s0 + $0x18] sm:$0xff] }
 0x36c   :  { %v1625_v40 = vpop.f32.mrf.mxu1  ;;  %v3061_v23 = vpack.i.bf16 %v4511_v8, %v4522_v50  ;;  %v4572_v28 = vmul.f32 255.0, %v3253_v37  ;;  %v2847_v4 = vtrunc.f32 %v2201_v27  ;;  %2101 = vmatpush1.bf16.msra.mxu0 %v3146_v35  ;;  %v1723_v46 = vrot.slane %v4511_v8, 6 }
 0x36d   :  { %v4505_v36 = vsel %vm1673_vm0, %v1613_v1, %v1689_v60  ;;  %v1626_v14 = vadd.f32 %v1625_v40, %v4491_v17  ;;  %v1694_v33 = vmul.f32 0.01, %v1634_v58  ;;  %vm1678_vm10 = vcmp.gt.f32.partialorder %v1634_v58, 0.0 }
 0x36e   :  { %v1721_v20 = vrot.slane %v4505_v36, 6  ;;  %v2838_v53 = vpop.f32.mrf.mxu1  ;;  %v3051_v12 = vpack.i.bf16 %v4505_v36, %v4503_v45  ;;  %v1771_v40 = vrot.slane %v4511_v8, 7 }
 0x36f   :  { %v1637_v57 = vadd.f32 %v2838_v53, %v4491_v17  ;;  %v1692_v42 = vmul.f32 0.01, %v1626_v14  ;;  %vm1676_vm5 = vcmp.gt.f32.partialorder %v1626_v14, 0.0  ;;  %v4574_v59 = vsel %vm1678_vm10, %v1634_v58, %v1694_v33  ;;  %v3147_v33 = vld [vmem:[%s5280_s3 + $0x4] ss:$8 sps:$4 sm:$0xff]  }
 0x370   :  { %v1628_v55 = vpop.f32.mrf.mxu1  ;;  %3052 = vrot.lane.b32.xlu1 %v3051_v12, %s3292_s10  ;;  %v4534_v54 = vsel %vm555_vm1, %v1720_v30, %v1721_v20  ;;  %v1769_v53 = vrot.slane %v4505_v36, 7  ;;  %2102 = vmatprep.subr.bf16.mxu0 %v3147_v33 }
 0x371   :  { %v1629_v16 = vadd.f32 %v1628_v55, %v4491_v17  ;;  %v1695_v47 = vmul.f32 0.01, %v1637_v57  ;;  %vm1679_vm6 = vcmp.gt.f32.partialorder %v1637_v57, 0.0  ;;  %v4543_v61 = vsel %vm1676_vm5, %v1626_v14, %v1692_v42 }
 0x372   :  { %v2841_v63 = vpop.f32.mrf.mxu1  ;;  %v2851_v14 = vtrunc.f32 %v4562_v18  ;;  %v4595_v42 = vcvt.f32.s32 %v2847_v4  ;;  %v1724_v4 = vrot.slane %v4543_v61, 6 }
 0x373   :  { %vm1677_vm0 = vcmp.gt.f32.partialorder %v1629_v16, 0.0  ;;  %v1693_v38 = vmul.f32 0.01, %v1629_v16  ;;  %v4553_v5 = vsel %vm1679_vm6, %v1637_v57, %v1695_v47  ;;  %v1650_v48 = vadd.f32 %v2841_v63, %v4491_v17 }
 0x374   :  { %v1641_v6 = vpop.f32.mrf.mxu1  ;;  %3062 = vrot.lane.b32.xlu1 %v3061_v23, %s3292_s10  ;;  %v3081_v24 = vpack.i.bf16 %v4553_v5, %v4574_v59  ;;  %v1770_v47 = vrot.slane %v4522_v50, 7  ;;  %v4692_v36 = vsel %vm555_vm1, %v1723_v46, %v1724_v4 }
 0x375   :  { %v4545_v19 = vsel %vm1677_vm0, %v1629_v16, %v1693_v38  ;;  %v1642_v51 = vadd.f32 %v1641_v6, %v4491_v17  ;;  %v1698_v12 = vmul.f32 0.01, %v1650_v48  ;;  %vm1682_vm10 = vcmp.gt.f32.partialorder %v1650_v48, 0.0 }
 0x376   :  { %v2842_v49 = vpop.f32.mrf.mxu1  ;;  %v3071_v3 = vpack.i.bf16 %v4545_v19, %v4543_v61  ;;  %v1722_v16 = vrot.slane %v4522_v50, 6  ;;  %v1768_v38 = vrot.slane %v4503_v45, 7  ;;  %v4619_v27 = vsel %vm640_vm2, %v1770_v47, %v1771_v40 }
 0x377   :  { %v1653_v41 = vadd.f32 %v2842_v49, %v4491_v17  ;;  %v1696_v34 = vmul.f32 0.01, %v1642_v51  ;;  %vm1680_vm5 = vcmp.gt.f32.partialorder %v1642_v51, 0.0  ;;  %v4611_v50 = vsel %vm1682_vm10, %v1650_v48, %v1698_v12 }
 0x378   :  { %v1644_v15 = vpop.f32.mrf.mxu1  ;;  %3072 = vrot.lane.b32.xlu1 %v3071_v3, %s3292_s10  ;;  %v1797_v49 = vsel %vm640_vm2, %v1769_v53, %v1770_v47  ;;  %v3149_v3 = vld [vmem:[%s5280_s3] ss:$8 sps:$4 sm:$0xff]   ;;  %v1726_v48 = vrot.slane %v4574_v59, 6  ;;  %vm5309_vm10 = vcmp.ge.s32.totalorder %v3401_v31, 1  ;;  %v4647_v12 = vsel %vm555_vm1, %v1722_v16, %v1723_v46 }
 0x379   :  { %v1645_v1 = vadd.f32 %v1644_v15, %v4491_v17  ;;  %v1699_v62 = vmul.f32 0.01, %v1653_v41  ;;  %vm1683_vm6 = vcmp.gt.f32.partialorder %v1653_v41, 0.0  ;;  %v4590_v55 = vsel %vm1680_vm5, %v1642_v51, %v1696_v34  ;;  %2103 = vmatpush1.bf16.msra.mxu0 %v3149_v3 }
 0x37a   :  { %v2845_v60 = vpop.f32.mrf.mxu1  ;;  %v1774_v15 = vrot.slane %v4574_v59, 7  ;;  %v1727_v47 = vrot.slane %v4553_v5, 6  ;;  %v1728_v33 = vrot.slane %v4590_v55, 6 }
 0x37b   :  { %vm1681_vm0 = vcmp.gt.f32.partialorder %v1645_v1, 0.0  ;;  %v1697_v25 = vmul.f32 0.01, %v1645_v1  ;;  %v4604_v6 = vsel %vm1683_vm6, %v1653_v41, %v1699_v62  ;;  %v1666_v51 = vadd.f32 %v2845_v60, %v4491_v17 }
 0x37c   :  { %v1657_v57 = vpop.f32.mrf.mxu1  ;;  %3082 = vrot.lane.b32.xlu1 %v3081_v24, %s3292_s10  ;;  %v3101_v32 = vpack.i.bf16 %v4604_v6, %v4611_v50  ;;  %v1802_v60 = vsel %vm5309_vm10, %v1797_v49, 0.0 }
 0x37d   :  { %v4592_v26 = vsel %vm1681_vm0, %v1645_v1, %v1697_v25  ;;  %v1658_v58 = vadd.f32 %v1657_v57, %v4491_v17  ;;  %v1798_v1 = vsel %vm640_vm2, %v1768_v38, %v1769_v53  ;;  %v1725_v53 = vrot.slane %v4545_v19, 6 }
 0x37e   :  { %v2846_v63 = vpop.f32.mrf.mxu1  ;;  %v3091_v23 = vpack.i.bf16 %v4592_v26, %v4590_v55 }
 0x37f   :  { %v1669_v39 = vadd.f32 %v2846_v63, %v4491_v17  ;;  %v1700_v41 = vmul.f32 0.01, %v1658_v58  ;;  %vm1684_vm0 = vcmp.gt.f32.partialorder %v1658_v58, 0.0  ;;  %v4687_v45 = vsel %vm555_vm1, %v1724_v4, %v1725_v53 }
 0x380   :  { %v1660_v56 = vpop.f32.mrf.mxu1  ;;  %3092 = vrot.lane.b32.xlu1 %v3091_v23, %s3292_s10  ;;  %v3056_v23 = vpack.i.bf16 %v4619_v27, %v1802_v60 }
 0x381   :  { %vm1687_vm5 = vcmp.gt.f32.partialorder %v1669_v39, 0.0  ;;  %v1703_v52 = vmul.f32 0.01, %v1669_v39  ;;  %v1661_v13 = vadd.f32 %v1660_v56, %v4491_v17  ;;  %v1702_v17 = vmul.f32 0.01, %v1666_v51 }
 0x382   :  { %v4640_v24 = vsel %vm1684_vm0, %v1658_v58, %v1700_v41  ;;  %v1772_v58 = vrot.slane %v4543_v61, 7  ;;  %v1729_v56 = vrot.slane %v4592_v26, 6 }
 0x383   :  { %v4631_v37 = vsel %vm1687_vm5, %v1669_v39, %v1703_v52  ;;  %vm1685_vm6 = vcmp.gt.f32.partialorder %v1661_v13, 0.0  ;;  %v1701_v34 = vmul.f32 0.01, %v1661_v13  ;;  %vm1686_vm5 = vcmp.gt.f32.partialorder %v1666_v51, 0.0 }
 0x384   :  { %v1783_v62 = vrot.slane %v4631_v37, 7  ;;  %3102 = vrot.lane.b32.xlu1 %v3101_v32, %s3292_s10  ;;  %v1735_v25 = vrot.slane %v4631_v37, 6  ;;  %v1773_v39 = vrot.slane %v4545_v19, 7  ;;  %v4666_v3 = vsel %vm1686_vm5, %v1666_v51, %v1702_v17 }
 0x385   :  { %v4643_v43 = vsel %vm1685_vm6, %v1661_v13, %v1701_v34  ;;  %v4678_v19 = vsel %vm555_vm1, %v1721_v20, %v1722_v16  ;;  %v1732_v27 = vrot.slane %v4640_v24, 6  ;;  %v3121_v51 = vpack.i.bf16 %v4631_v37, %v4666_v3 }
 0x386   :  { %v3111_v57 = vpack.i.bf16 %v4643_v43, %v4640_v24  ;;  %v1799_v35 = vsel %vm640_vm2, %v1783_v62, %v1768_v38  ;;  %v1731_v38 = vrot.slane %v4604_v6, 6  ;;  %v4672_v61 = vsel %vm555_vm1, %v1735_v25, %v1720_v30 }
 0x387   :  { %v1800_v63 = vsel %vm246_vm7, %v1799_v35, 0.0  ;;  %v1733_v41 = vrot.slane %v4643_v43, 6  ;;  %v1730_v30 = vrot.slane %v4611_v50, 6  ;;  %v4696_v20 = vsel %vm555_vm1, %v1726_v48, %v1727_v47 }
 0x388   :  { %3112 = vrot.lane.b32.xlu1 %v3111_v57, %s3292_s10  ;;  %v3046_v49 = vpack.i.bf16 %v1798_v1, %v1800_v63  ;;  %v4700_v16 = vsel %vm555_vm1, %v1725_v53, %v1726_v48  ;;  %v1734_v52 = vrot.slane %v4666_v3, 6  ;;  %v1795_v13 = vsel %vm640_vm2, %v1771_v40, %v1772_v58  ;;  %v3254_v48 = vld [vmem:[%s5277_s0 + $0x28] sm:$0xff] }
 0x389   :  { %v4710_v46 = vsel %vm555_vm1, %v1728_v33, %v1729_v56  ;;  %v4714_v32 = vsel %vm555_vm1, %v1727_v47, %v1728_v33  ;;  %v2206_v34 = vmul.f32 255.0, %v3254_v48  ;;  %v1794_v1 = vsel %vm640_vm2, %v1772_v58, %v1773_v39 }
 0x38a   :  { %3047 = vrot.lane.b32.xlu0 %v3046_v49, %s3291_s7  ;;  %v4723_v8 = vsel %vm555_vm1, %v1730_v30, %v1731_v38  ;;  %v4727_v40 = vsel %vm555_vm1, %v1729_v56, %v1730_v30  ;;  %v1793_v4 = vsel %vm640_vm2, %v1773_v39, %v1774_v15  ;;  %v4736_v17 = vsel %vm555_vm1, %v1732_v27, %v1733_v41 }
 0x38b   :  { %v4740_v60 = vsel %vm555_vm1, %v1731_v38, %v1732_v27  ;;  %v4744_v53 = vsel %vm555_vm1, %v1734_v52, %v1735_v25  ;;  %v2853_v57 = vtrunc.f32 %v4572_v28  ;;  %v1775_v35 = vrot.slane %v4553_v5, 7 }
 0x38c   :  { %3122 = vrot.lane.b32.xlu1 %v3121_v51, %s3292_s10  ;;  %v1804_v58 = vsel %vm250_vm15, %v1795_v13, 0.0  ;;  %v4752_v47 = vsel %vm555_vm1, %v1733_v41, %v1734_v52  ;;  %v2852_v63 = vcvt.f32.s32 %v2851_v14  ;;  %v1777_v39 = vrot.slane %v4592_v26, 7  ;;  %v3255_v14 = vld [vmem:[%s5277_s0 + $0x38] sm:$0xff] }
 0x38d   :  { %v3066_v25 = vpack.i.bf16 %v1794_v1, %v1804_v58  ;;  %v1806_v5 = vsel %vm252_vm13, %v1793_v4, 0.0  ;;  %v2854_v28 = vcvt.f32.s32 %v2853_v57  ;;  %v2857_v33 = vtrunc.f32 %v2206_v34 }
 0x38e   :  { %3057 = vrot.lane.b32.xlu0 %v3056_v23, %s3291_s7  ;;  %v1776_v23 = vrot.slane %v4590_v55, 7  ;;  %v1792_v18 = vsel %vm640_vm2, %v1774_v15, %v1775_v35  ;;  %v2208_v55 = vmul.f32 255.0, %v3255_v14  ;;  %v3256_v15 = vld [vmem:[%s5277_s0 + $0x48] sm:$0xff]  ;;  %v1780_v30 = vrot.slane %v4640_v24, 7 }
 0x38f   :  { %v3076_v26 = vpack.i.bf16 %v1792_v18, %v1806_v5  ;;  %v2210_v38 = vmul.f32 255.0, %v3256_v15  ;;  %v2858_v41 = vcvt.f32.s32 %v2857_v33  ;;  %v1781_v13 = vrot.slane %v4643_v43, 7 }
 0x390   :  { %2237 = vperm.xlu1 %2885, %v4595_v42   ;;  %v1778_v42 = vrot.slane %v4611_v50, 7  ;;  %v1791_v56 = vsel %vm640_vm2, %v1775_v35, %v1776_v23  ;;  %v1790_v49 = vsel %vm640_vm2, %v1776_v23, %v1777_v39  ;;  %v1779_v50 = vrot.slane %v4604_v6, 7  ;;  %v3257_v6 = vld [vmem:[%s5277_s0 + $0x58] sm:$0xff] }
 0x391   :  { %v1808_v27 = vsel %vm254_vm14, %v1791_v56, 0.0  ;;  %v2861_v51 = vtrunc.f32 %v2208_v55  ;;  %v2865_v34 = vtrunc.f32 %v2210_v38  ;;  %v2212_v1 = vmul.f32 255.0, %v3257_v6 }
 0x392   :  { %3067 = vrot.lane.b32.xlu0 %v3066_v25, %s3291_s7  ;;  %v1789_v59 = vsel %vm640_vm2, %v1777_v39, %v1778_v42  ;;  %v3086_v52 = vpack.i.bf16 %v1790_v49, %v1808_v27  ;;  %v1788_v4 = vsel %vm640_vm2, %v1778_v42, %v1779_v50  ;;  %v1782_v24 = vrot.slane %v4666_v3, 7  ;;  %v3260_v42 = vld [vmem:[%s5277_s0 + $0x20] sm:$0xff]  ;;  %v3261_v27 = vld [vmem:[%s5277_s0 + $0x30] sm:$0xff] }
 0x393   :  { %v1810_v48 = vsel %vm256_vm12, %v1789_v59, 0.0  ;;  %v2862_v57 = vcvt.f32.s32 %v2861_v51  ;;  %v1787_v43 = vsel %vm640_vm2, %v1779_v50, %v1780_v30  ;;  %v1786_v58 = vsel %vm640_vm2, %v1780_v30, %v1781_v13 }
 0x394   :  { %2243 = vperm.xlu1 %2885, %v2852_v63   ;;  %v3096_v35 = vpack.i.bf16 %v1788_v4, %v1810_v48  ;;  %v3258_v63 = vld [vmem:[%s5277_s0 + $0x8] sm:$0xff]  ;;  %v1785_v25 = vsel %vm640_vm2, %v1781_v13, %v1782_v24  ;;  %v1812_v3 = vsel %vm258_vm3, %v1787_v43, 0.0  ;;  %v2866_v39 = vcvt.f32.s32 %v2865_v34  ;;  %v3263_v34 = vld [vmem:[%s5277_s0 + $0x50] sm:$0xff] }
 0x395   :  { %v2202_v23 = vmul.f32 255.0, %v3258_v63  ;;  %v2869_v5 = vtrunc.f32 %v2212_v1  ;;  %v3106_v18 = vpack.i.bf16 %v1786_v58, %v1812_v3  ;;  %v1814_v14 = vsel %vm260_vm11, %v1785_v25, 0.0 }
 0x396   :  { %3077 = vrot.lane.b32.xlu0 %v3076_v26, %s3291_s7  ;;  %v2205_v26 = vmul.f32 255.0, %v3260_v42  ;;  %v1784_v56 = vsel %vm640_vm2, %v1782_v24, %v1783_v62  ;;  %v3262_v62 = vld [vmem:[%s5277_s0 + $0x40] sm:$0xff]  ;;  %v2211_v6 = vmul.f32 255.0, %v3263_v34  ;;  %vm5310_vm1 = vcmp.ge.s32.totalorder %v3395_v29, 2 }
 0x397   :  { %v2849_v55 = vtrunc.f32 %v2202_v23  ;;  %v2870_v49 = vcvt.f32.s32 %v2869_v5  ;;  %v3116_v15 = vpack.i.bf16 %v1784_v56, %v1814_v14  ;;  %vm5311_vm2 = vcmp.ge.s32.totalorder %v3401_v31, 2 }
 0x398   :  { %2246 = vperm.xlu1 %2885, %v2854_v28   ;;  %v3259_v28 = vld [vmem:[%s5277_s0 + $0x68] sm:$0xff]  ;;  %v2855_v50 = vtrunc.f32 %v2205_v26  ;;  %v2867_v4 = vtrunc.f32 %v2211_v6  ;;  %v1754_v29 = vsel %vm5311_vm2, %v4678_v19, 0.0  ;;  %vm5312_vm13 = vcmask 785408  }
 0x399   :  { %v2214_v33 = vmul.f32 255.0, %v3259_v28  ;;  %v2850_v38 = vcvt.f32.s32 %v2849_v55  ;;  %vm5313_vm15 = vcmp.ge.s32.totalorder %v3439_v0, 2  ;;  %vm5315_vm7 = vcmp.ge.s32.totalorder %v3449_v7, 2 }
 0x39a   :  { %3087 = vrot.lane.b32.xlu0 %v3086_v52, %s3291_s7  ;;  %v2856_v30 = vcvt.f32.s32 %v2855_v50  ;;  %v2209_v52 = vmul.f32 255.0, %v3262_v62  ;;  %v1758_v44 = vsel %vm5313_vm15, %v4700_v16, 0.0  ;;  %vm5316_vm11 = vcmp.ge.s32.totalorder %v3453_v9, 2 }
 0x39b   :  { %v2873_v59 = vtrunc.f32 %v2214_v33  ;;  %v1762_v7 = vsel %vm5316_vm11, %v4727_v40, 0.0  ;;  %vm5318_vm12 = vcmp.ge.s32.totalorder %v3457_v11, 2  ;;  %vm5319_vm3 = vcmp.ge.s32.totalorder %v3455_v10, 2 }
 0x39c   :  { %2252 = vperm.xlu1 %2885, %v2858_v41   ;;  %v2207_v41 = vmul.f32 255.0, %v3261_v27  ;;  %v2863_v48 = vtrunc.f32 %v2209_v52  ;;  %v1766_v11 = vsel %vm5319_vm3, %v4752_v47, 0.0  ;;  %v1998_v10 = vsub.s32 6, %v3384_v22  ;;  %v3265_v47 = vld [vmem:[%s5278_s1] sm:$0xff] }
 0x39d   :  { %v2874_v51 = vcvt.f32.s32 %v2873_v59 }
 0x39e   :  { %3097 = vrot.lane.b32.xlu0 %v3096_v35, %s3291_s7  ;;  %v2859_v37 = vtrunc.f32 %v2207_v41  ;;  %v2864_v1 = vcvt.f32.s32 %v2863_v48  ;;  %v2868_v35 = vcvt.f32.s32 %v2867_v4 }
 0x3a0   :  { %2258 = vperm.xlu1 %2885, %v2862_v57   ;;  %v2860_v13 = vcvt.f32.s32 %v2859_v37  ;;  %v3264_v57 = vld [vmem:[%s5277_s0 + $0x60] sm:$0xff] }
 0x3a1   :  { %v2213_v24 = vmul.f32 255.0, %v3264_v57 }
 0x3a2   :  { %3107 = vrot.lane.b32.xlu0 %v3106_v18, %s3291_s7  ;;  %v1752_v18 = vsel %vm5310_vm1, %v4672_v61, 0.0 }
 0x3a3   :  { %v2871_v43 = vtrunc.f32 %v2213_v24 }
 0x3a4   :  { %2264 = vperm.xlu1 %2885, %v2866_v39  }
 0x3a5   :  { %v2872_v58 = vcvt.f32.s32 %v2871_v43 }
 0x3a6   :  { %3117 = vrot.lane.b32.xlu0 %v3116_v15, %s3291_s7 }
 0x3a8   :  { %2270 = vperm.xlu1 %2885, %v2870_v49  }
 0x3aa   :  { %2240 = vperm.xlu0 %2884, %v2850_v38  }
 0x3ac   :  { %2276 = vperm.xlu1 %2885, %v2874_v51  }
 0x3ae   :  { %2249 = vperm.xlu0 %2884, %v2856_v30  }
 0x3b2   :  { %2255 = vperm.xlu0 %2884, %v2860_v13  }
 0x3b6   :  { %2261 = vperm.xlu0 %2884, %v2864_v1  }
 0x3ba   :  { %2267 = vperm.xlu0 %2884, %v2868_v35  }
 0x3be   :  { %2273 = vperm.xlu0 %2884, %v2872_v58  }
 0x3e2   :  { %v3053_v63 = vpop.permute.xlu1 %3052 }
 0x3e3   :  { %v3055_v28 = vunpack.i.h.bf16 %v3053_v63  ;;  %v3054_v33 = vunpack.i.l.bf16 %v3053_v63 }
 0x3e6   :  { %v3063_v23 = vpop.permute.xlu1 %3062 }
 0x3e7   :  { %v3065_v50 = vunpack.i.h.bf16 %v3063_v23  ;;  %v3064_v27 = vunpack.i.l.bf16 %v3063_v23 }
 0x3ea   :  { %v3073_v25 = vpop.permute.xlu1 %3072 }
 0x3eb   :  { %v3075_v31 = vunpack.i.h.bf16 %v3073_v25  ;;  %v3074_v19 = vunpack.i.l.bf16 %v3073_v25 }
 0x3ee   :  { %v3083_v14 = vpop.permute.xlu1 %3082 }
 0x3ef   :  { %v3085_v43 = vunpack.i.h.bf16 %v3083_v14  ;;  %v3084_v58 = vunpack.i.l.bf16 %v3083_v14 }
 0x3f2   :  { %v3093_v37 = vpop.permute.xlu1 %3092 }
 0x3f3   :  { %v3095_v0 = vunpack.i.h.bf16 %v3093_v37  ;;  %v3094_v16 = vunpack.i.l.bf16 %v3093_v37 }
 0x3fc   :  { %v3048_v3 = vpop.permute.xlu0 %3047 }
 0x3fd   :  { %v3050_v39 = vunpack.i.h.bf16 %v3048_v3  ;;  %v3049_v5 = vunpack.i.l.bf16 %v3048_v3 }
 0x3ff   :  { %v1944_v55 = vsel %vm1013_vm9, %v1752_v18, %v3049_v5  ;;  %v1945_v42 = vsel %vm1013_vm9, %v4534_v54, %v3050_v39 }
 0x400   :  { %v3058_v26 = vpop.permute.xlu0 %3057  ;;  %v1960_v56 = vsel %vm1030_vm4, %v1944_v55, %v3054_v33  ;;  %v1961_v49 = vsel %vm1030_vm4, %v1945_v42, %v3055_v28 }
 0x401   :  { %v3060_v59 = vunpack.i.h.bf16 %v3058_v26  ;;  %v3059_v15 = vunpack.i.l.bf16 %v3058_v26  ;;  %v1976_v38 = vpack.c.bf16 %v1961_v49, %v1960_v56 }
 0x403   :  { %v1947_v61 = vsel %vm1013_vm9, %v4647_v12, %v3060_v59  ;;  %v1946_v41 = vsel %vm1013_vm9, %v1754_v29, %v3059_v15  ;;  %2755 = vmatmul.mubr.msk.bf16.vlgmr.msra.gmra.mxu0 %vm5312_vm13, %v1976_v38  ;;  %v1756_v12 = vsel %vm298_vm8, %v4692_v36, 0.0  ;;  %v3103_v36 = vpop.permute.xlu1 %3102  ;;  %vm5314_vm8 = vmmov %vm5312_vm13 }
 0x404   :  { %v3068_v54 = vpop.permute.xlu0 %3067  ;;  %2130 = vmatprep.mubr.bf16.mxu0 %v3290_v2  ;;  %v1962_v51 = vsel %vm1030_vm4, %v1946_v41, %v3064_v27  ;;  %v1963_v30 = vsel %vm1030_vm4, %v1947_v61, %v3065_v50  ;;  %v3105_v15 = vunpack.i.h.bf16 %v3103_v36  ;;  %v3104_v38 = vunpack.i.l.bf16 %v3103_v36  ;;  %vm5317_vm14 = vmmov %vm5314_vm8 }
 0x405   :  { %v3070_v62 = vunpack.i.h.bf16 %v3068_v54  ;;  %v3069_v52 = vunpack.i.l.bf16 %v3068_v54  ;;  %v1977_v13 = vpack.c.bf16 %v1963_v30, %v1962_v51  ;;  %vm5320_vm0 = vmmov %vm5314_vm8 }
 0x406   :  { %vm5321_vm6 = vmmov %vm5320_vm0 }
 0x407   :  { %v1949_v48 = vsel %vm1013_vm9, %v4687_v45, %v3070_v62  ;;  %v1948_v34 = vsel %vm1013_vm9, %v1756_v12, %v3069_v52  ;;  %v3113_v26 = vpop.permute.xlu1 %3112  ;;  %vm5322_vm10 = vmmov %vm5320_vm0 }
 0x408   :  { %v3078_v6 = vpop.permute.xlu0 %3077  ;;  %v1964_v1 = vsel %vm1030_vm4, %v1948_v34, %v3074_v19  ;;  %v1965_v4 = vsel %vm1030_vm4, %v1949_v48, %v3075_v31  ;;  %v3115_v51 = vunpack.i.h.bf16 %v3113_v26  ;;  %v3114_v9 = vunpack.i.l.bf16 %v3113_v26  ;;  %vm5323_vm5 = vmmov %vm5320_vm0 }
 0x409   :  { %v3080_v57 = vunpack.i.h.bf16 %v3078_v6  ;;  %v3079_v24 = vunpack.i.l.bf16 %v3078_v6  ;;  %v1978_v35 = vpack.c.bf16 %v1965_v4, %v1964_v1 }
 0x40b   :  { %v1951_v45 = vsel %vm1013_vm9, %v4696_v20, %v3080_v57  ;;  %v1950_v63 = vsel %vm1013_vm9, %v1758_v44, %v3079_v24  ;;  %2756 = vmatmul.mubr.msk.bf16.gmra.mxu0 %vm5314_vm8, %v1977_v13  ;;  %v1760_v20 = vsel %vm5315_vm7, %v4714_v32, 0.0  ;;  %v3123_v40 = vpop.permute.xlu1 %3122  ;;  %v4918_v57 = vrot.slane %v3265_v47, %v1998_v10 }
 0x40c   :  { %v3088_v23 = vpop.permute.xlu0 %3087  ;;  %2140 = vmatprep.mubr.bf16.mxu0 %v3290_v2  ;;  %v1966_v25 = vsel %vm1030_vm4, %v1950_v63, %v3084_v58  ;;  %v1967_v3 = vsel %vm1030_vm4, %v1951_v45, %v3085_v43  ;;  %v3125_v48 = vunpack.i.h.bf16 %v3123_v40  ;;  %v3124_v34 = vunpack.i.l.bf16 %v3123_v40 }
 0x40d   :  { %v3090_v39 = vunpack.i.h.bf16 %v3088_v23  ;;  %v3089_v5 = vunpack.i.l.bf16 %v3088_v23  ;;  %v1979_v28 = vpack.c.bf16 %v1967_v3, %v1966_v25 }
 0x40f   :  { %v1953_v33 = vsel %vm1013_vm9, %v4710_v46, %v3090_v39  ;;  %v1952_v18 = vsel %vm1013_vm9, %v1760_v20, %v3089_v5 }
 0x410   :  { %v3098_v14 = vpop.permute.xlu0 %3097  ;;  %v1968_v55 = vsel %vm1030_vm4, %v1952_v18, %v3094_v16  ;;  %v1969_v42 = vsel %vm1030_vm4, %v1953_v33, %v3095_v0 }
 0x411   :  { %v3100_v56 = vunpack.i.h.bf16 %v3098_v14  ;;  %v3099_v49 = vunpack.i.l.bf16 %v3098_v14  ;;  %v1980_v59 = vpack.c.bf16 %v1969_v42, %v1968_v55 }
 0x413   :  { %v1955_v46 = vsel %vm1013_vm9, %v4723_v8, %v3100_v56  ;;  %v1954_v32 = vsel %vm1013_vm9, %v1762_v7, %v3099_v49  ;;  %2757 = vmatmul.mubr.msk.bf16.gmra.mxu0 %vm5317_vm14, %v1978_v35  ;;  %v1764_v8 = vsel %vm5318_vm12, %v4740_v60, 0.0 }
 0x414   :  { %v3108_v50 = vpop.permute.xlu0 %3107  ;;  %2150 = vmatprep.mubr.bf16.mxu0 %v3290_v2  ;;  %v1970_v27 = vsel %vm1030_vm4, %v1954_v32, %v3104_v38  ;;  %v1971_v29 = vsel %vm1030_vm4, %v1955_v46, %v3105_v15 }
 0x415   :  { %v3110_v61 = vunpack.i.h.bf16 %v3108_v50  ;;  %v3109_v41 = vunpack.i.l.bf16 %v3108_v50  ;;  %v1981_v54 = vpack.c.bf16 %v1971_v29, %v1970_v27 }
 0x417   :  { %v1957_v30 = vsel %vm1013_vm9, %v4736_v17, %v3110_v61  ;;  %v1956_v37 = vsel %vm1013_vm9, %v1764_v8, %v3109_v41 }
 0x418   :  { %v3118_v62 = vpop.permute.xlu0 %3117  ;;  %v1972_v52 = vsel %vm1030_vm4, %v1956_v37, %v3114_v9  ;;  %v1973_v13 = vsel %vm1030_vm4, %v1957_v30, %v3115_v51 }
 0x419   :  { %v3120_v31 = vunpack.i.h.bf16 %v3118_v62  ;;  %v3119_v19 = vunpack.i.l.bf16 %v3118_v62  ;;  %v1982_v12 = vpack.c.bf16 %v1973_v13, %v1972_v52 }
 0x41b   :  { %v1959_v60 = vsel %vm1013_vm9, %v4744_v53, %v3120_v31  ;;  %v1958_v17 = vsel %vm1013_vm9, %v1766_v11, %v3119_v19  ;;  %2758 = vmatmul.mubr.msk.bf16.gmra.mxu0 %vm5320_vm0, %v1979_v28  ;;  %vm5324_vm9 = vmmov %vm5320_vm0  ;;  %v36_v53 = vld [vmem:[%s5278_s1 + $0x8] sm:$0xff] }
 0x41c   :  { %2160 = vmatprep.mubr.bf16.mxu0 %v3290_v2  ;;  %v1974_v6 = vsel %vm1030_vm4, %v1958_v17, %v3124_v34  ;;  %v1975_v1 = vsel %vm1030_vm4, %v1959_v60, %v3125_v48  ;;  %v4920_v24 = vrot.slane %v36_v53, %v1998_v10 }
 0x41d   :  { %v1983_v4 = vpack.c.bf16 %v1975_v1, %v1974_v6 }
 0x423   :  { %2759 = vmatmul.mubr.msk.bf16.gmra.mxu0 %vm5321_vm6, %v1980_v59 }
 0x424   :  { %2170 = vmatprep.mubr.bf16.mxu0 %v3290_v2 }
 0x42b   :  { %2760 = vmatmul.mubr.msk.bf16.gmra.mxu0 %vm5322_vm10, %v1981_v54 }
 0x42c   :  { %2180 = vmatprep.mubr.bf16.mxu0 %v3290_v2 }
 0x433   :  { %2761 = vmatmul.mubr.msk.bf16.gmra.mxu0 %vm5323_vm5, %v1982_v12 }
 0x434   :  { %2190 = vmatprep.mubr.bf16.mxu0 %v3290_v2 }
 0x43b   :  { %2762 = vmatmul.mubr.msk.bf16.gmra.mxu0 %vm5324_vm9, %v1983_v4 }
 0x4c3   :  { %v2122_v35 = vpop.f32.mrf.mxu0 }
 0x4c4   :  { %v4923_v2 = vadd.f32 %v2122_v35, %v4918_v57 }
 0x4c5   :  { %v2124_v43 = vpop.f32.mrf.mxu0 }
 0x4c6   :  { %v4926_v58 = vadd.f32 %v2124_v43, %v4920_v24 }
 0x4c7   :  { %v2126_v22 = vpop.f32.mrf.mxu0 }
 0x4c8   :  { %v2396_v44 = vmax.f32 %v4923_v2, %v4926_v58  ;;  %v4931_v45 = vadd.f32 %v2126_v22, %v4918_v57 }
 0x4c9   :  { %v2128_v36 = vpop.f32.mrf.mxu0 }
 0x4ca   :  { %v4934_v63 = vadd.f32 %v2128_v36, %v4920_v24  ;;  %2397 = vmax.xlane.f32.xlu0 %v2396_v44 }
 0x4cb   :  { %v2132_v23 = vpop.f32.mrf.mxu0 }
 0x4cc   :  { %v2399_v25 = vmax.f32 %v4931_v45, %v4934_v63  ;;  %v4939_v39 = vadd.f32 %v2132_v23, %v4918_v57 }
 0x4cd   :  { %v2134_v3 = vpop.f32.mrf.mxu0 }
 0x4ce   :  { %v4942_v5 = vadd.f32 %v2134_v3, %v4920_v24  ;;  %2400 = vmax.xlane.f32.xlu1 %v2399_v25 }
 0x4cf   :  { %v2136_v28 = vpop.f32.mrf.mxu0 }
 0x4d0   :  { %v2402_v0 = vmax.f32 %v4939_v39, %v4942_v5  ;;  %v4947_v20 = vadd.f32 %v2136_v28, %v4918_v57 }
 0x4d1   :  { %v2138_v16 = vpop.f32.mrf.mxu0 }
 0x4d2   :  { %v4950_v33 = vadd.f32 %v2138_v16, %v4920_v24  ;;  %2403 = vmax.xlane.f32.xlu0 %v2402_v0 }
 0x4d3   :  { %v2142_v18 = vpop.f32.mrf.mxu0 }
 0x4d4   :  { %v2405_v14 = vmax.f32 %v4947_v20, %v4950_v33  ;;  %v4955_v42 = vadd.f32 %v2142_v18, %v4918_v57 }
 0x4d5   :  { %v2144_v55 = vpop.f32.mrf.mxu0 }
 0x4d6   :  { %v4958_v26 = vadd.f32 %v2144_v55, %v4920_v24  ;;  %2406 = vmax.xlane.f32.xlu0 %v2405_v14 }
 0x4d7   :  { %v2146_v56 = vpop.f32.mrf.mxu0 }
 0x4d8   :  { %v2408_v49 = vmax.f32 %v4955_v42, %v4958_v26  ;;  %v4963_v15 = vadd.f32 %v2146_v56, %v4918_v57 }
 0x4d9   :  { %v2148_v59 = vpop.f32.mrf.mxu0 }
 0x4da   :  { %v4966_v38 = vadd.f32 %v2148_v59, %v4920_v24  ;;  %2409 = vmax.xlane.f32.xlu1 %v2408_v49 }
 0x4db   :  { %v2152_v7 = vpop.f32.mrf.mxu0 }
 0x4dc   :  { %v2411_v46 = vmax.f32 %v4963_v15, %v4966_v38  ;;  %v4971_v50 = vadd.f32 %v2152_v7, %v4918_v57 }
 0x4dd   :  { %v2154_v32 = vpop.f32.mrf.mxu0 }
 0x4de   :  { %v4974_v27 = vadd.f32 %v2154_v32, %v4920_v24  ;;  %2412 = vmax.xlane.f32.xlu0 %v2411_v46  ;;  %v3266_v32 = vld [vmem:[%s5277_s0 + $0x78] sm:$0xff] }
 0x4df   :  { %v2156_v29 = vpop.f32.mrf.mxu0 }
 0x4e0   :  { %v2414_v61 = vmax.f32 %v4971_v50, %v4974_v27  ;;  %v4979_v54 = vadd.f32 %v2156_v29, %v4918_v57  ;;  %v2216_v29 = vmul.f32 255.0, %v3266_v32 }
 0x4e1   :  { %v2158_v41 = vpop.f32.mrf.mxu0 }
 0x4e2   :  { %v4982_v51 = vadd.f32 %v2158_v41, %v4920_v24  ;;  %2415 = vmax.xlane.f32.xlu1 %v2414_v61  ;;  %v2877_v61 = vtrunc.f32 %v2216_v29 }
 0x4e3   :  { %v2162_v9 = vpop.f32.mrf.mxu0 }
 0x4e4   :  { %v2417_v8 = vmax.f32 %v4979_v54, %v4982_v51  ;;  %v4987_v30 = vadd.f32 %v2162_v9, %v4918_v57  ;;  %v2878_v41 = vcvt.f32.s32 %v2877_v61 }
 0x4e5   :  { %v2164_v40 = vpop.f32.mrf.mxu0 }
 0x4e6   :  { %v4990_v37 = vadd.f32 %v2164_v40, %v4920_v24  ;;  %2418 = vmax.xlane.f32.xlu0 %v2417_v8  ;;  %v5057_v40 = vand.u32 127, %v37_v21 }
 0x4e7   :  { %v2166_v62 = vpop.f32.mrf.mxu0 }
 0x4e8   :  { %v2420_v52 = vmax.f32 %v4987_v30, %v4990_v37  ;;  %v4995_v31 = vadd.f32 %v2166_v62, %v4918_v57  ;;  %v2238_v62 = vpop.permute.xlu1 %2237 }
 0x4e9   :  { %v2168_v13 = vpop.f32.mrf.mxu0  ;;  %vm2284_vm1 = vcmp.eq.s32.totalorder %v5057_v40, %v2238_v62 }
 0x4ea   :  { %v4998_v19 = vadd.f32 %v2168_v13, %v4920_v24  ;;  %2421 = vmax.xlane.f32.xlu1 %v2420_v52  ;;  %v5060_v52 = vadd.s32 128, %v5057_v40 }
 0x4eb   :  { %v2172_v12 = vpop.f32.mrf.mxu0 }
 0x4ec   :  { %v2423_v48 = vmax.f32 %v4995_v31, %v4998_v19  ;;  %v5003_v11 = vadd.f32 %v2172_v12, %v4918_v57  ;;  %v2244_v13 = vpop.permute.xlu1 %2243  ;;  %vm2285_vm4 = vcmp.eq.s32.totalorder %v5060_v52, %v2238_v62  ;;  %v2241_v12 = vpop.permute.xlu0 %2240 }
 0x4ed   :  { %v2174_v34 = vpop.f32.mrf.mxu0  ;;  %vm2287_vm2 = vcmp.eq.s32.totalorder %v5060_v52, %v2241_v12  ;;  %vm2286_vm13 = vcmp.eq.s32.totalorder %v5057_v40, %v2241_v12  ;;  %vm2289_vm15 = vcmp.eq.s32.totalorder %v5060_v52, %v2244_v13  ;;  %vm2288_vm8 = vcmp.eq.s32.totalorder %v5057_v40, %v2244_v13 }
 0x4ee   :  { %v5006_v60 = vadd.f32 %v2174_v34, %v4920_v24  ;;  %2424 = vmax.xlane.f32.xlu0 %v2423_v48  ;;  %v2317_v48 = vsel %vm2285_vm4, %v4926_v58, 0.0  ;;  %v2316_v34 = vsel %vm2284_vm1, %v4923_v2, 0.0  ;;  %v2319_v21 = vsel %vm2287_vm2, %v4934_v63, 0.0 }
 0x4ef   :  { %v2176_v17 = vpop.f32.mrf.mxu0 }
 0x4f0   :  { %v2426_v6 = vmax.f32 %v5003_v11, %v5006_v60  ;;  %v5011_v4 = vadd.f32 %v2176_v17, %v4918_v57  ;;  %v2247_v17 = vpop.permute.xlu1 %2246 }
 0x4f1   :  { %v2178_v1 = vpop.f32.mrf.mxu0  ;;  %vm2291_vm7 = vcmp.eq.s32.totalorder %v5060_v52, %v2247_v17  ;;  %vm2290_vm11 = vcmp.eq.s32.totalorder %v5057_v40, %v2247_v17 }
 0x4f2   :  { %v5014_v10 = vadd.f32 %v2178_v1, %v4920_v24  ;;  %2427 = vmax.xlane.f32.xlu1 %v2426_v6  ;;  %v2348_v6 = vadd.f32 %v2317_v48, %v2316_v34  ;;  %v2250_v1 = vpop.permute.xlu0 %2249 }
 0x4f3   :  { %v2182_v53 = vpop.f32.mrf.mxu0  ;;  %vm2293_vm14 = vcmp.eq.s32.totalorder %v5060_v52, %v2250_v1  ;;  %vm2292_vm12 = vcmp.eq.s32.totalorder %v5057_v40, %v2250_v1 }
 0x4f4   :  { %v2429_v47 = vmax.f32 %v5011_v4, %v5014_v10  ;;  %v5019_v43 = vadd.f32 %v2182_v53, %v4918_v57  ;;  %v2318_v53 = vsel %vm2286_vm13, %v4931_v45, 0.0  ;;  %v2324_v32 = vsel %vm2292_vm12, %v4955_v42, 0.0 }
 0x4f5   :  { %v2184_v35 = vpop.f32.mrf.mxu0 }
 0x4f6   :  { %v5022_v22 = vadd.f32 %v2184_v35, %v4920_v24  ;;  %2430 = vmax.xlane.f32.xlu0 %v2429_v47  ;;  %v2351_v47 = vadd.f32 %v2319_v21, %v2318_v53  ;;  %v2321_v35 = vsel %vm2289_vm15, %v4942_v5, 0.0 }
 0x4f7   :  { %v2186_v44 = vpop.f32.mrf.mxu0 }
 0x4f8   :  { %v2432_v36 = vmax.f32 %v5019_v43, %v5022_v22  ;;  %v5027_v25 = vadd.f32 %v2186_v44, %v4918_v57  ;;  %v5073_v44 = vpop.permute.xlu1 %2252 }
 0x4f9   :  { %v2188_v23 = vpop.f32.mrf.mxu0  ;;  %vm2295_vm3 = vcmp.eq.s32.totalorder %v5060_v52, %v5073_v44  ;;  %vm2294_vm0 = vcmp.eq.s32.totalorder %v5057_v40, %v5073_v44 }
 0x4fa   :  { %v5030_v3 = vadd.f32 %v2188_v23, %v4920_v24  ;;  %2433 = vmax.xlane.f32.xlu1 %v2432_v36  ;;  %v2320_v36 = vsel %vm2288_vm8, %v4939_v39, 0.0  ;;  %v5077_v23 = vpop.permute.xlu0 %2255 }
 0x4fb   :  { %v2192_v28 = vpop.f32.mrf.mxu0  ;;  %vm2297_vm6 = vcmp.eq.s32.totalorder %v5060_v52, %v5077_v23  ;;  %vm2296_vm10 = vcmp.eq.s32.totalorder %v5057_v40, %v5077_v23 }
 0x4fc   :  { %v2435_v0 = vmax.f32 %v5027_v25, %v5030_v3  ;;  %v5035_v18 = vadd.f32 %v2192_v28, %v4918_v57  ;;  %v2354_v28 = vadd.f32 %v2321_v35, %v2320_v36 }
 0x4fd   :  { %v2194_v16 = vpop.f32.mrf.mxu0 }
 0x4fe   :  { %v5038_v14 = vadd.f32 %v2194_v16, %v4920_v24  ;;  %2436 = vmax.xlane.f32.xlu0 %v2435_v0  ;;  %v2323_v0 = vsel %vm2291_vm7, %v4950_v33, 0.0  ;;  %v2322_v16 = vsel %vm2290_vm11, %v4947_v20, 0.0 }
 0x4ff   :  { %v2196_v55 = vpop.f32.mrf.mxu0 }
 0x500   :  { %v2438_v56 = vmax.f32 %v5035_v18, %v5038_v14  ;;  %v5043_v59 = vadd.f32 %v2196_v55, %v4918_v57  ;;  %v3267_v57 = vld [vmem:[%s5277_s0 + $0x70] sm:$0xff]  ;;  %v5082_v55 = vpop.permute.xlu1 %2258  ;;  %s3294_s0 = smov [#allocation2]  }
 0x501   :  { %v2198_v49 = vpop.f32.mrf.mxu0  ;;  %v2215_v9 = vmul.f32 255.0, %v3267_v57  ;;  %vm2299_vm5 = vcmp.eq.s32.totalorder %v5060_v52, %v5082_v55  ;;  %vm2298_vm9 = vcmp.eq.s32.totalorder %v5057_v40, %v5082_v55  ;;  %s2713_s26 = sshll.u32 %s3294_s0, 4  ;;  %s2714_s26 = int_to_ptr.vmem [resolvable:$true] %s2713_s26 }
 0x502   :  { %v5046_v7 = vadd.f32 %v2198_v49, %v4920_v24  ;;  %2439 = vmax.xlane.f32.xlu1 %v2438_v56  ;;  %v2357_v56 = vadd.f32 %v2323_v0, %v2322_v16  ;;  %v2325_v49 = vsel %vm2293_vm14, %v4958_v26, 0.0  ;;  %s3268_s10 = scalar_lea.vmem %s2714_s26, 128  ;;  %p3273_p1 = scmp.lt.s32.totalorder %s2714_s26, %s2714_s26 }
 0x503   :  { %v2875_v24 = vtrunc.f32 %v2215_v9  ;;  %v2360_v29 = vadd.f32 %v2325_v49, %v2324_v32  ;;  %p3269_p0 = scmp.ne.s32.totalorder %s2714_s26, %s3268_s10  ;;  %p3274_p2 = scmp.lt.s32.totalorder %s3268_s10, %s3268_s10 }
 0x504   :  { %v2441_v46 = vmax.f32 %v5043_v59, %v5046_v7  ;;  %v5090_v61 = vpop.permute.xlu1 %2264 }
 0x505   :  { %v2876_v8 = vcvt.f32.s32 %v2875_v24  ;;  %vm2303_vm2 = vcmp.eq.s32.totalorder %v5060_v52, %v5090_v61  ;;  %vm2302_vm13 = vcmp.eq.s32.totalorder %v5057_v40, %v5090_v61  ;;  %p3275_p3 = por %p3274_p2, %p3273_p1 }
 0x506   :  { %2442 = vmax.xlane.f32.xlu0 %v2441_v46  ;;  %v5087_v46 = vpop.permute.xlu0 %2261 }
 0x507   :  { %vm2301_vm4 = vcmp.eq.s32.totalorder %v5060_v52, %v5087_v46  ;;  %vm2300_vm1 = vcmp.eq.s32.totalorder %v5057_v40, %v5087_v46  ;;  %p3276_p4 = pnand %p3275_p3, %p3269_p0 }
 0x508   :  { %v5094_v57 = vpop.permute.xlu1 %2270 }
 0x509   :  { %vm2307_vm15 = vcmp.eq.s32.totalorder %v5060_v52, %v5094_v57  ;;  %vm2306_vm8 = vcmp.eq.s32.totalorder %v5057_v40, %v5094_v57 }
 0x50c   :  { %v5098_v24 = vpop.permute.xlu1 %2276 }
 0x50d   :  { %vm2311_vm7 = vcmp.eq.s32.totalorder %v5060_v52, %v5098_v24  ;;  %vm2310_vm11 = vcmp.eq.s32.totalorder %v5057_v40, %v5098_v24 }
 0x513   :  { %2282 = vperm.xlu1 %2885, %v2878_v41   ;;  %v5092_v41 = vpop.permute.xlu0 %2267 }
 0x517   :  { %v5096_v9 = vpop.permute.xlu0 %2273 }
 0x51c   :  { %2279 = vperm.xlu0 %2884, %v2876_v8  }
 0x537   :  { %2349 = vadd.xlane.f32.xlu1 %v2348_v6 }
 0x53b   :  { %2352 = vadd.xlane.f32.xlu0 %v2351_v47 }
 0x53f   :  { %2355 = vadd.xlane.f32.xlu0 %v2354_v28 }
 0x543   :  { %2358 = vadd.xlane.f32.xlu0 %v2357_v56 }
 0x547   :  { %2361 = vadd.xlane.f32.xlu0 %v2360_v29 }
 0x553   :  { %v5100_v8 = vpop.xlane.xlu0 %2397 }
 0x554   :  { %v2444_v62 = vsub.f32 %v4923_v2, %v5100_v8  ;;  %v2445_v13 = vsub.f32 %v4926_v58, %v5100_v8 }
 0x556   :  { %v2476_v12 = vmul.f32 1.442695, %v2444_v62  ;;  %v2478_v48 = vmul.f32 1.442695, %v2445_v13 }
 0x557   :  { %v5106_v34 = vpop.xlane.xlu1 %2400 }
 0x558   :  { %3150 = vpow2.f32 %v2476_v12  ;;  %v2446_v17 = vsub.f32 %v4931_v45, %v5106_v34  ;;  %v2447_v6 = vsub.f32 %v4934_v63, %v5106_v34 }
 0x559   :  { %3152 = vpow2.f32 %v2478_v48 }
 0x55a   :  { %v2480_v21 = vmul.f32 1.442695, %v2446_v17  ;;  %v2482_v1 = vmul.f32 1.442695, %v2447_v6 }
 0x55b   :  { %v5112_v53 = vpop.xlane.xlu0 %2403 }
 0x55c   :  { %3154 = vpow2.f32 %v2480_v21  ;;  %v2448_v2 = vsub.f32 %v4939_v39, %v5112_v53  ;;  %v2449_v58 = vsub.f32 %v4942_v5, %v5112_v53 }
 0x55d   :  { %3156 = vpow2.f32 %v2482_v1 }
 0x55e   :  { %v2484_v47 = vmul.f32 1.442695, %v2448_v2  ;;  %v2486_v35 = vmul.f32 1.442695, %v2449_v58 }
 0x55f   :  { %v5118_v36 = vpop.xlane.xlu0 %2406 }
 0x560   :  { %3158 = vpow2.f32 %v2484_v47  ;;  %v2450_v45 = vsub.f32 %v4947_v20, %v5118_v36  ;;  %v2451_v63 = vsub.f32 %v4950_v33, %v5118_v36 }
 0x561   :  { %3160 = vpow2.f32 %v2486_v35 }
 0x562   :  { %v2488_v28 = vmul.f32 1.442695, %v2450_v45  ;;  %v2490_v0 = vmul.f32 1.442695, %v2451_v63 }
 0x563   :  { %v5124_v16 = vpop.xlane.xlu1 %2409 }
 0x564   :  { %3162 = vpow2.f32 %v2488_v28  ;;  %v2452_v39 = vsub.f32 %v4955_v42, %v5124_v16  ;;  %v2453_v5 = vsub.f32 %v4958_v26, %v5124_v16 }
 0x565   :  { %v3151_v56 = vpop.eup %3150  ;;  %3164 = vpow2.f32 %v2490_v0 }
 0x566   :  { %v3153_v49 = vpop.eup %3152  ;;  %v2492_v32 = vmul.f32 1.442695, %v2452_v39  ;;  %v2494_v20 = vmul.f32 1.442695, %v2453_v5 }
 0x567   :  { %v5130_v29 = vpop.xlane.xlu0 %2412  ;;  %v2540_v33 = vadd.f32 %v3153_v49, %v3151_v56 }
 0x568   :  { %3166 = vpow2.f32 %v2492_v32  ;;  %v2454_v62 = vsub.f32 %v4963_v15, %v5130_v29  ;;  %v2455_v13 = vsub.f32 %v4966_v38, %v5130_v29 }
 0x569   :  { %v3155_v12 = vpop.eup %3154  ;;  %3168 = vpow2.f32 %v2494_v20  ;;  %2541 = vadd.xlane.f32.xlu0 %v2540_v33 }
 0x56a   :  { %v3157_v42 = vpop.eup %3156  ;;  %v2496_v26 = vmul.f32 1.442695, %v2454_v62  ;;  %v2498_v48 = vmul.f32 1.442695, %v2455_v13 }
 0x56b   :  { %v5136_v17 = vpop.xlane.xlu1 %2415  ;;  %v2543_v6 = vadd.f32 %v3157_v42, %v3155_v12 }
 0x56c   :  { %3170 = vpow2.f32 %v2496_v26  ;;  %v2456_v21 = vsub.f32 %v4971_v50, %v5136_v17  ;;  %v2457_v1 = vsub.f32 %v4974_v27, %v5136_v17 }
 0x56d   :  { %v3159_v2 = vpop.eup %3158  ;;  %3172 = vpow2.f32 %v2498_v48  ;;  %2544 = vadd.xlane.f32.xlu1 %v2543_v6 }
 0x56e   :  { %v3161_v58 = vpop.eup %3160  ;;  %v2500_v47 = vmul.f32 1.442695, %v2456_v21  ;;  %v2502_v35 = vmul.f32 1.442695, %v2457_v1 }
 0x56f   :  { %v5142_v45 = vpop.xlane.xlu0 %2418  ;;  %v2546_v63 = vadd.f32 %v3161_v58, %v3159_v2 }
 0x570   :  { %3174 = vpow2.f32 %v2500_v47  ;;  %v2458_v28 = vsub.f32 %v4979_v54, %v5142_v45  ;;  %v2459_v0 = vsub.f32 %v4982_v51, %v5142_v45 }
 0x571   :  { %v3163_v39 = vpop.eup %3162  ;;  %3176 = vpow2.f32 %v2502_v35  ;;  %2547 = vadd.xlane.f32.xlu0 %v2546_v63 }
 0x572   :  { %v3165_v5 = vpop.eup %3164  ;;  %v2504_v56 = vmul.f32 1.442695, %v2458_v28  ;;  %v2506_v49 = vmul.f32 1.442695, %v2459_v0 }
 0x573   :  { %v5148_v32 = vpop.xlane.xlu1 %2421  ;;  %v2549_v20 = vadd.f32 %v3165_v5, %v3163_v39 }
 0x574   :  { %3178 = vpow2.f32 %v2504_v56  ;;  %v2460_v33 = vsub.f32 %v4987_v30, %v5148_v32  ;;  %v2461_v62 = vsub.f32 %v4990_v37, %v5148_v32 }
 0x575   :  { %v3167_v13 = vpop.eup %3166  ;;  %3180 = vpow2.f32 %v2506_v49  ;;  %2550 = vadd.xlane.f32.xlu0 %v2549_v20 }
 0x576   :  { %v3169_v12 = vpop.eup %3168  ;;  %v2508_v42 = vmul.f32 1.442695, %v2460_v33  ;;  %v2510_v26 = vmul.f32 1.442695, %v2461_v62 }
 0x577   :  { %v5154_v48 = vpop.xlane.xlu0 %2424  ;;  %v2552_v6 = vadd.f32 %v3169_v12, %v3167_v13 }
 0x578   :  { %3182 = vpow2.f32 %v2508_v42  ;;  %v2462_v21 = vsub.f32 %v4995_v31, %v5154_v48  ;;  %v2463_v1 = vsub.f32 %v4998_v19, %v5154_v48 }
 0x579   :  { %v3171_v2 = vpop.eup %3170  ;;  %3184 = vpow2.f32 %v2510_v26  ;;  %2553 = vadd.xlane.f32.xlu1 %v2552_v6 }
 0x57a   :  { %v3173_v58 = vpop.eup %3172  ;;  %v2512_v47 = vmul.f32 1.442695, %v2462_v21  ;;  %v2514_v35 = vmul.f32 1.442695, %v2463_v1 }
 0x57b   :  { %v5160_v63 = vpop.xlane.xlu1 %2427  ;;  %v2555_v28 = vadd.f32 %v3173_v58, %v3171_v2 }
 0x57c   :  { %3186 = vpow2.f32 %v2512_v47  ;;  %v2464_v0 = vsub.f32 %v5003_v11, %v5160_v63  ;;  %v2465_v39 = vsub.f32 %v5006_v60, %v5160_v63 }
 0x57d   :  { %v3175_v5 = vpop.eup %3174  ;;  %3188 = vpow2.f32 %v2514_v35  ;;  %2556 = vadd.xlane.f32.xlu0 %v2555_v28  ;;  %v2327_v35 = vsel %vm2295_vm3, %v4966_v38, 0.0  ;;  %vm2305_vm3 = vcmp.eq.s32.totalorder %v5060_v52, %v5092_v41 }
 0x57e   :  { %v3177_v56 = vpop.eup %3176  ;;  %v2516_v49 = vmul.f32 1.442695, %v2464_v0  ;;  %v2518_v20 = vmul.f32 1.442695, %v2465_v39 }
 0x57f   :  { %v5166_v33 = vpop.xlane.xlu0 %2430  ;;  %v2558_v62 = vadd.f32 %v3177_v56, %v3175_v5  ;;  %v2326_v56 = vsel %vm2294_vm0, %v4963_v15, 0.0  ;;  %vm2304_vm0 = vcmp.eq.s32.totalorder %v5057_v40, %v5092_v41 }
 0x580   :  { %3190 = vpow2.f32 %v2516_v49  ;;  %v2466_v13 = vsub.f32 %v5011_v4, %v5166_v33  ;;  %v2467_v12 = vsub.f32 %v5014_v10, %v5166_v33 }
 0x581   :  { %v3179_v42 = vpop.eup %3178  ;;  %3192 = vpow2.f32 %v2518_v20  ;;  %2559 = vadd.xlane.f32.xlu1 %v2558_v62  ;;  %v2363_v20 = vadd.f32 %v2327_v35, %v2326_v56 }
 0x582   :  { %v3181_v26 = vpop.eup %3180  ;;  %v2520_v6 = vmul.f32 1.442695, %v2466_v13  ;;  %v2522_v21 = vmul.f32 1.442695, %v2467_v12  ;;  %v2329_v13 = vsel %vm2297_vm6, %v4974_v27, 0.0  ;;  %vm2309_vm6 = vcmp.eq.s32.totalorder %v5060_v52, %v5096_v9 }
 0x583   :  { %v5174_v1 = vpop.xlane.xlu1 %2433  ;;  %v2561_v2 = vadd.f32 %v3181_v26, %v3179_v42 }
 0x584   :  { %3194 = vpow2.f32 %v2520_v6  ;;  %v2468_v58 = vsub.f32 %v5019_v43, %v5174_v1  ;;  %v2469_v47 = vsub.f32 %v5022_v22, %v5174_v1  ;;  %v2328_v6 = vsel %vm2296_vm10, %v4971_v50, 0.0 }
 0x585   :  { %v3183_v28 = vpop.eup %3182  ;;  %3196 = vpow2.f32 %v2522_v21  ;;  %2562 = vadd.xlane.f32.xlu0 %v2561_v2  ;;  %v2366_v2 = vadd.f32 %v2329_v13, %v2328_v6  ;;  %v2334_v6 = vsel %vm2302_vm13, %v4995_v31, 0.0  ;;  %vm2308_vm10 = vcmp.eq.s32.totalorder %v5057_v40, %v5096_v9 }
 0x586   :  { %v3185_v0 = vpop.eup %3184  ;;  %v2524_v39 = vmul.f32 1.442695, %v2468_v58  ;;  %v2526_v5 = vmul.f32 1.442695, %v2469_v47  ;;  %v2331_v47 = vsel %vm2299_vm5, %v4982_v51, 0.0 }
 0x587   :  { %v5186_v49 = vpop.xlane.xlu0 %2436  ;;  %v2564_v62 = vadd.f32 %v3185_v0, %v3183_v28 }
 0x588   :  { %3198 = vpow2.f32 %v2524_v39  ;;  %v2470_v38 = vsub.f32 %v5027_v25, %v5186_v49  ;;  %v2471_v44 = vsub.f32 %v5030_v3, %v5186_v49  ;;  %v2330_v39 = vsel %vm2298_vm9, %v4979_v54, 0.0 }
 0x589   :  { %v3187_v12 = vpop.eup %3186  ;;  %3200 = vpow2.f32 %v2526_v5  ;;  %2364 = vadd.xlane.f32.xlu0 %v2363_v20  ;;  %2565 = vadd.xlane.f32.xlu1 %v2564_v62  ;;  %v2369_v56 = vadd.f32 %v2331_v47, %v2330_v39  ;;  %v2333_v62 = vsel %vm2301_vm4, %v4990_v37, 0.0  ;;  %v2335_v37 = vsel %vm2303_vm2, %v4998_v19, 0.0 }
 0x58a   :  { %v3189_v15 = vpop.eup %3188  ;;  %v2528_v42 = vmul.f32 1.442695, %v2470_v38  ;;  %v2530_v26 = vmul.f32 1.442695, %v2471_v44 }
 0x58b   :  { %v5198_v21 = vpop.xlane.xlu1 %2439  ;;  %v2567_v58 = vadd.f32 %v3189_v15, %v3187_v12  ;;  %v2332_v12 = vsel %vm2300_vm1, %v4987_v30, 0.0  ;;  %v2375_v30 = vadd.f32 %v2335_v37, %v2334_v6 }
 0x58c   :  { %3202 = vpow2.f32 %v2528_v42  ;;  %v2472_v27 = vsub.f32 %v5035_v18, %v5198_v21  ;;  %v2473_v23 = vsub.f32 %v5038_v14, %v5198_v21  ;;  %v2372_v15 = vadd.f32 %v2333_v62, %v2332_v12 }
 0x58d   :  { %v3191_v35 = vpop.eup %3190  ;;  %3204 = vpow2.f32 %v2530_v26  ;;  %2367 = vadd.xlane.f32.xlu0 %v2366_v2  ;;  %2568 = vadd.xlane.f32.xlu1 %v2567_v58  ;;  %v2339_v58 = vsel %vm2307_vm15, %v5014_v10, 0.0 }
 0x58e   :  { %v3193_v50 = vpop.eup %3192  ;;  %v2532_v28 = vmul.f32 1.442695, %v2472_v27  ;;  %v2534_v0 = vmul.f32 1.442695, %v2473_v23  ;;  %v2338_v23 = vsel %vm2306_vm8, %v5011_v4, 0.0  ;;  %v2342_v4 = vsel %vm2310_vm11, %v5027_v25, 0.0 }
 0x58f   :  { %v5210_v5 = vpop.xlane.xlu0 %2442  ;;  %v2570_v20 = vadd.f32 %v3193_v50, %v3191_v35  ;;  %v2283_v61 = vpop.permute.xlu1 %2282  ;;  %v2381_v31 = vadd.f32 %v2339_v58, %v2338_v23  ;;  %v2343_v35 = vsel %vm2311_vm7, %v5030_v3, 0.0 }
 0x590   :  { %3206 = vpow2.f32 %v2532_v28  ;;  %v2474_v51 = vsub.f32 %v5043_v59, %v5210_v5  ;;  %v2475_v55 = vsub.f32 %v5046_v7, %v5210_v5  ;;  %vm2314_vm14 = vcmp.eq.s32.totalorder %v5057_v40, %v2283_v61 }
 0x591   :  { %v3195_v38 = vpop.eup %3194  ;;  %3208 = vpow2.f32 %v2534_v0  ;;  %2370 = vadd.xlane.f32.xlu0 %v2369_v56  ;;  %2571 = vadd.xlane.f32.xlu1 %v2570_v20  ;;  %vm2315_vm12 = vcmp.eq.s32.totalorder %v5060_v52, %v2283_v61  ;;  %v2387_v57 = vadd.f32 %v2343_v35, %v2342_v4  ;;  %v2346_v0 = vsel %vm2314_vm14, %v5043_v59, 0.0 }
 0x592   :  { %v3197_v54 = vpop.eup %3196  ;;  %v2536_v44 = vmul.f32 1.442695, %v2474_v51  ;;  %v2538_v13 = vmul.f32 1.442695, %v2475_v55  ;;  %v2347_v39 = vsel %vm2315_vm12, %v5046_v7, 0.0  ;;  %v2337_v51 = vsel %vm2305_vm3, %v5006_v60, 0.0 }
 0x593   :  { %v2573_v42 = vadd.f32 %v3197_v54, %v3195_v38  ;;  %v2393_v24 = vadd.f32 %v2347_v39, %v2346_v0  ;;  %v2336_v59 = vsel %vm2304_vm0, %v5003_v11, 0.0  ;;  %v2341_v55 = vsel %vm2309_vm6, %v5022_v22, 0.0 }
 0x594   :  { %3210 = vpow2.f32 %v2536_v44  ;;  %v2378_v7 = vadd.f32 %v2337_v51, %v2336_v59  ;;  %v2340_v60 = vsel %vm2308_vm10, %v5019_v43, 0.0 }
 0x595   :  { %v3199_v26 = vpop.eup %3198  ;;  %3212 = vpow2.f32 %v2538_v13  ;;  %2373 = vadd.xlane.f32.xlu0 %v2372_v15  ;;  %2574 = vadd.xlane.f32.xlu1 %v2573_v42  ;;  %v2384_v41 = vadd.f32 %v2341_v55, %v2340_v60 }
 0x596   :  { %v3201_v46 = vpop.eup %3200 }
 0x597   :  { %v2576_v2 = vadd.f32 %v3201_v46, %v3199_v26  ;;  %v2280_v25 = vpop.permute.xlu0 %2279 }
 0x598   :  { %vm2312_vm5 = vcmp.eq.s32.totalorder %v5057_v40, %v2280_v25  ;;  %vm2313_vm9 = vcmp.eq.s32.totalorder %v5060_v52, %v2280_v25 }
 0x599   :  { %v3203_v27 = vpop.eup %3202  ;;  %2376 = vadd.xlane.f32.xlu0 %v2375_v30  ;;  %2577 = vadd.xlane.f32.xlu1 %v2576_v2  ;;  %v2344_v62 = vsel %vm2312_vm5, %v5035_v18, 0.0  ;;  %v2345_v11 = vsel %vm2313_vm9, %v5038_v14, 0.0 }
 0x59a   :  { %v3205_v19 = vpop.eup %3204  ;;  %v2390_v38 = vadd.f32 %v2345_v11, %v2344_v62 }
 0x59b   :  { %v2579_v47 = vadd.f32 %v3205_v19, %v3203_v27 }
 0x59d   :  { %v3207_v50 = vpop.eup %3206  ;;  %2382 = vadd.xlane.f32.xlu0 %v2381_v31  ;;  %2580 = vadd.xlane.f32.xlu1 %v2579_v47 }
 0x59e   :  { %v3209_v10 = vpop.eup %3208 }
 0x59f   :  { %v2582_v28 = vadd.f32 %v3209_v10, %v3207_v50 }
 0x5a1   :  { %v3211_v3 = vpop.eup %3210  ;;  %2388 = vadd.xlane.f32.xlu0 %v2387_v57  ;;  %2583 = vadd.xlane.f32.xlu1 %v2582_v28 }
 0x5a2   :  { %v3213_v56 = vpop.eup %3212 }
 0x5a3   :  { %v2585_v20 = vadd.f32 %v3213_v56, %v3211_v3 }
 0x5a5   :  { %2586 = vadd.xlane.f32.xlu1 %v2585_v20  ;;  %2394 = vadd.xlane.f32.xlu0 %v2393_v24 }
 0x5a9   :  { %2379 = vadd.xlane.f32.xlu1 %v2378_v7 }
 0x5ad   :  { %2385 = vadd.xlane.f32.xlu1 %v2384_v41 }
 0x5b1   :  { %2391 = vadd.xlane.f32.xlu1 %v2390_v38 }
 0x5c0   :  { %v2350_v12 = vpop.xlane.xlu1 %2349 }
 0x5c1   :  { %v2620_v10 = vsub.f32 %v2350_v12, %v5100_v8 }
 0x5c4   :  { %v2353_v54 = vpop.xlane.xlu0 %2352 }
 0x5c5   :  { %v2621_v61 = vsub.f32 %v2353_v54, %v5106_v34 }
 0x5c8   :  { %v2356_v22 = vpop.xlane.xlu0 %2355 }
 0x5c9   :  { %v2622_v4 = vsub.f32 %v2356_v22, %v5112_v53 }
 0x5cc   :  { %v2359_v44 = vpop.xlane.xlu0 %2358 }
 0x5cd   :  { %v2623_v24 = vsub.f32 %v2359_v44, %v5118_v36 }
 0x5d0   :  { %v2362_v13 = vpop.xlane.xlu0 %2361 }
 0x5d1   :  { %v2624_v51 = vsub.f32 %v2362_v13, %v5124_v16 }
 0x5f2   :  { %v2542_v9 = vpop.xlane.xlu0 %2541 }
 0x5f6   :  { %v2545_v15 = vpop.xlane.xlu1 %2544 }
 0x5f7   :  { %3214 = vlog2.f32 %v2545_v15 }
 0x5f8   :  { %3216 = vlog2.f32 %v2542_v9 }
 0x5fa   :  { %v2548_v40 = vpop.xlane.xlu0 %2547 }
 0x5fb   :  { %3218 = vlog2.f32 %v2548_v40 }
 0x5fe   :  { %v2551_v52 = vpop.xlane.xlu0 %2550 }
 0x5ff   :  { %3220 = vlog2.f32 %v2551_v52 }
 0x602   :  { %v2554_v43 = vpop.xlane.xlu1 %2553 }
 0x603   :  { %3222 = vlog2.f32 %v2554_v43 }
 0x604   :  { %v3215_v46 = vpop.eup %3214 }
 0x605   :  { %v3217_v6 = vpop.eup %3216  ;;  %v2591_v27 = vmul.f32 0.6931472, %v3215_v46 }
 0x606   :  { %v2557_v42 = vpop.xlane.xlu0 %2556  ;;  %v2589_v23 = vmul.f32 0.6931472, %v3217_v6 }
 0x607   :  { %3224 = vlog2.f32 %v2557_v42  ;;  %v2637_v57 = vsub.f32 %v2621_v61, %v2591_v27 }
 0x608   :  { %v3219_v30 = vpop.eup %3218  ;;  %v2636_v39 = vsub.f32 %v2620_v10, %v2589_v23 }
 0x609   :  { %v2593_v31 = vmul.f32 0.6931472, %v3219_v30  ;;  %v2653_v25 = vmax.f32 %v2637_v57, -11.512925 }
 0x60a   :  { %v2560_v18 = vpop.xlane.xlu1 %2559  ;;  %v2652_v60 = vmax.f32 %v2636_v39, -11.512925 }
 0x60b   :  { %3226 = vlog2.f32 %v2560_v18  ;;  %v2638_v3 = vsub.f32 %v2622_v4, %v2593_v31  ;;  %v2669_v22 = vmin.f32 %v2653_v25, -1.000005e-05 }
 0x60c   :  { %v3221_v19 = vpop.eup %3220  ;;  %v2668_v13 = vmin.f32 %v2652_v60, -1.000005e-05 }
 0x60d   :  { %v2595_v28 = vmul.f32 0.6931472, %v3221_v19  ;;  %v2654_v53 = vmax.f32 %v2638_v3, -11.512925 }
 0x60e   :  { %v2563_v14 = vpop.xlane.xlu0 %2562 }
 0x60f   :  { %3228 = vlog2.f32 %v2563_v14  ;;  %v2639_v59 = vsub.f32 %v2623_v24, %v2595_v28  ;;  %v2670_v12 = vmin.f32 %v2654_v53, -1.000005e-05  ;;  %v2684_v14 = vadd.f32 %v2669_v22, %v2668_v13 }
 0x610   :  { %v3223_v47 = vpop.eup %3222 }
 0x611   :  { %v2597_v56 = vmul.f32 0.6931472, %v3223_v47  ;;  %v2655_v36 = vmax.f32 %v2639_v59, -11.512925 }
 0x612   :  { %v2365_v37 = vpop.xlane.xlu0 %2364  ;;  %v2566_v26 = vpop.xlane.xlu1 %2565 }
 0x613   :  { %3230 = vlog2.f32 %v2566_v26  ;;  %v2640_v41 = vsub.f32 %v2624_v51, %v2597_v56  ;;  %v2625_v11 = vsub.f32 %v2365_v37, %v5130_v29  ;;  %v2671_v37 = vmin.f32 %v2655_v36, -1.000005e-05 }
 0x614   :  { %v3225_v0 = vpop.eup %3224 }
 0x615   :  { %v2599_v7 = vmul.f32 0.6931472, %v3225_v0  ;;  %v2656_v40 = vmax.f32 %v2640_v41, -11.512925 }
 0x616   :  { %v2368_v2 = vpop.xlane.xlu0 %2367  ;;  %v2569_v58 = vpop.xlane.xlu1 %2568 }
 0x617   :  { %3232 = vlog2.f32 %v2569_v58  ;;  %v2641_v9 = vsub.f32 %v2625_v11, %v2599_v7  ;;  %v2626_v16 = vsub.f32 %v2368_v2, %v5136_v17  ;;  %v2685_v17 = vadd.f32 %v2684_v14, %v2670_v12 }
 0x618   :  { %v3227_v34 = vpop.eup %3226  ;;  %v2672_v2 = vmin.f32 %v2656_v40, -1.000005e-05 }
 0x619   :  { %v2601_v62 = vmul.f32 0.6931472, %v3227_v34  ;;  %v2657_v26 = vmax.f32 %v2641_v9, -11.512925  ;;  %v2686_v23 = vadd.f32 %v2685_v17, %v2671_v37 }
 0x61a   :  { %v2371_v35 = vpop.xlane.xlu0 %2370  ;;  %v2572_v50 = vpop.xlane.xlu1 %2571 }
 0x61b   :  { %v2642_v43 = vsub.f32 %v2626_v16, %v2601_v62  ;;  %v2627_v42 = vsub.f32 %v2371_v35, %v5142_v45  ;;  %v2673_v31 = vmin.f32 %v2657_v26, -1.000005e-05  ;;  %v2687_v10 = vadd.f32 %v2686_v23, %v2672_v2 }
 0x61c   :  { %v3229_v8 = vpop.eup %3228 }
 0x61d   :  { %v2603_v44 = vmul.f32 0.6931472, %v3229_v8  ;;  %v2658_v58 = vmax.f32 %v2642_v43, -11.512925  ;;  %v2688_v39 = vadd.f32 %v2687_v10, %v2673_v31 }
 0x61e   :  { %v2575_v20 = vpop.xlane.xlu1 %2574  ;;  %v2374_v55 = vpop.xlane.xlu0 %2373 }
 0x61f   :  { %3234 = vlog2.f32 %v2575_v20  ;;  %v2643_v46 = vsub.f32 %v2627_v42, %v2603_v44  ;;  %v2628_v6 = vsub.f32 %v2374_v55, %v5148_v32  ;;  %v2674_v4 = vmin.f32 %v2658_v58, -1.000005e-05 }
 0x620   :  { %v3231_v54 = vpop.eup %3230  ;;  %3236 = vlog2.f32 %v2572_v50 }
 0x621   :  { %v2605_v52 = vmul.f32 0.6931472, %v3231_v54  ;;  %v2659_v47 = vmax.f32 %v2643_v46, -11.512925 }
 0x622   :  { %v2578_v38 = vpop.xlane.xlu1 %2577  ;;  %v2377_v18 = vpop.xlane.xlu0 %2376 }
 0x623   :  { %3238 = vlog2.f32 %v2578_v38  ;;  %v2644_v27 = vsub.f32 %v2628_v6, %v2605_v52  ;;  %v2629_v61 = vsub.f32 %v2377_v18, %v5154_v48  ;;  %v2675_v3 = vmin.f32 %v2659_v47, -1.000005e-05 }
 0x624   :  { %v3233_v15 = vpop.eup %3232  ;;  %v2689_v48 = vadd.f32 %v2688_v39, %v2674_v4 }
 0x625   :  { %v2607_v30 = vmul.f32 0.6931472, %v3233_v15  ;;  %v2660_v57 = vmax.f32 %v2644_v27, -11.512925 }
 0x626   :  { %v2581_v29 = vpop.xlane.xlu1 %2580  ;;  %v2383_v35 = vpop.xlane.xlu0 %2382  ;;  %v2690_v60 = vadd.f32 %v2689_v48, %v2675_v3 }
 0x627   :  { %3240 = vlog2.f32 %v2581_v29  ;;  %v2645_v50 = vsub.f32 %v2629_v61, %v2607_v30  ;;  %v2631_v56 = vsub.f32 %v2383_v35, %v5166_v33  ;;  %v2676_v20 = vmin.f32 %v2660_v57, -1.000005e-05 }
 0x629   :  { %v2661_v24 = vmax.f32 %v2645_v50, -11.512925  ;;  %v2691_v38 = vadd.f32 %v2690_v60, %v2676_v20 }
 0x62a   :  { %v2584_v19 = vpop.xlane.xlu1 %2583  ;;  %v2389_v51 = vpop.xlane.xlu0 %2388 }
 0x62b   :  { %3242 = vlog2.f32 %v2584_v19  ;;  %v2677_v53 = vmin.f32 %v2661_v24, -1.000005e-05  ;;  %v2633_v62 = vsub.f32 %v2389_v51, %v5186_v49 }
 0x62c   :  { %v3235_v45 = vpop.eup %3234 }
 0x62d   :  { %v2611_v28 = vmul.f32 0.6931472, %v3235_v45  ;;  %v3237_v0 = vpop.eup %3236  ;;  %v2692_v13 = vadd.f32 %v2691_v38, %v2677_v53 }
 0x62e   :  { %v2587_v32 = vpop.xlane.xlu1 %2586  ;;  %v2609_v7 = vmul.f32 0.6931472, %v3237_v0  ;;  %v2395_v12 = vpop.xlane.xlu0 %2394 }
 0x62f   :  { %3244 = vlog2.f32 %v2587_v32  ;;  %v2647_v34 = vsub.f32 %v2631_v56, %v2611_v28  ;;  %v2635_v37 = vsub.f32 %v2395_v12, %v5210_v5 }
 0x630   :  { %v3239_v59 = vpop.eup %3238 }
 0x631   :  { %v2663_v54 = vmax.f32 %v2647_v34, -11.512925  ;;  %v2613_v22 = vmul.f32 0.6931472, %v3239_v59 }
 0x632   :  { %v2380_v25 = vpop.xlane.xlu1 %2379 }
 0x633   :  { %v2630_v55 = vsub.f32 %v2380_v25, %v5160_v63  ;;  %v2679_v15 = vmin.f32 %v2663_v54, -1.000005e-05 }
 0x634   :  { %v3241_v8 = vpop.eup %3240 }
 0x635   :  { %v2615_v41 = vmul.f32 0.6931472, %v3241_v8  ;;  %v2646_v11 = vsub.f32 %v2630_v55, %v2609_v7 }
 0x636   :  { %v2386_v33 = vpop.xlane.xlu1 %2385 }
 0x637   :  { %v2649_v36 = vsub.f32 %v2633_v62, %v2615_v41  ;;  %v2662_v44 = vmax.f32 %v2646_v11, -11.512925  ;;  %v2632_v9 = vsub.f32 %v2386_v33, %v5174_v1 }
 0x638   :  { %v3243_v16 = vpop.eup %3242 }
 0x639   :  { %v2678_v40 = vmin.f32 %v2662_v44, -1.000005e-05  ;;  %v2648_v63 = vsub.f32 %v2632_v9, %v2613_v22  ;;  %v2665_v52 = vmax.f32 %v2649_v36, -11.512925  ;;  %v2617_v42 = vmul.f32 0.6931472, %v3243_v16 }
 0x63a   :  { %v2392_v43 = vpop.xlane.xlu1 %2391 }
 0x63b   :  { %v2693_v18 = vadd.f32 %v2692_v13, %v2678_v40  ;;  %v2664_v49 = vmax.f32 %v2648_v63, -11.512925  ;;  %v2634_v29 = vsub.f32 %v2392_v43, %v5198_v21  ;;  %v2681_v30 = vmin.f32 %v2665_v52, -1.000005e-05 }
 0x63c   :  { %v3245_v14 = vpop.eup %3244 }
 0x63d   :  { %v2619_v26 = vmul.f32 0.6931472, %v3245_v14  ;;  %v2694_v46 = vadd.f32 %v2693_v18, %v2679_v15  ;;  %v2680_v6 = vmin.f32 %v2664_v49, -1.000005e-05  ;;  %v2650_v1 = vsub.f32 %v2634_v29, %v2617_v42 }
 0x63f   :  { %v2651_v17 = vsub.f32 %v2635_v37, %v2619_v26  ;;  %v2695_v2 = vadd.f32 %v2694_v46, %v2680_v6  ;;  %v2666_v58 = vmax.f32 %v2650_v1, -11.512925 }
 0x641   :  { %v2667_v27 = vmax.f32 %v2651_v17, -11.512925  ;;  %v2696_v19 = vadd.f32 %v2695_v2, %v2681_v30  ;;  %v2682_v61 = vmin.f32 %v2666_v58, -1.000005e-05 }
 0x643   :  { %v2683_v45 = vmin.f32 %v2667_v27, -1.000005e-05  ;;  %v2697_v23 = vadd.f32 %v2696_v19, %v2682_v61 }
 0x645   :  { %v2698_v31 = vadd.f32 %v2697_v23, %v2683_v45 }
 0x647   :  { %v2699_v47 = vrot.slane %v2698_v31, 4 }
 0x649   :  { %v2700_v35 = vadd.f32 %v2699_v47, %v2698_v31 }
 0x64b   :  { %v2701_v21 = vrot.slane %v2700_v35, 2 }
 0x64d   :  { %v2702_v50 = vadd.f32 %v2701_v21, %v2700_v35 }
 0x64f   :  { %v2703_v10 = vrot.slane %v2702_v50, 1 }
 0x651   :  { %v2704_v5 = vadd.f32 %v2703_v10, %v2702_v50 }
 0x653   :  { %v2705_v4 = vmul.f32 -0.125, %v2704_v5 }
 0x655   :  { %2706 = vst [vmem:[#allocation2] sm:$0xff] %v2705_v4 }
 0x656   :  { %3279 = shalt.err (!%p3276_p4)
}
 0x657   :  { %2716 = dma.vmem_to_hbm [thread:$0]  %s2714_s26, 128, %s5281_s4, [#allocation3]  }
 0x658   :  { %3288 = dma.done.wait [#allocation3], 128  }
 0x659   :  { %3289 = vsyncadd [#allocation3], 4294967168 }
 0x65a   :  { %2720 = vsyncpa [#allocation3], 1 }

</bundles_post_ra>
